<compile_context>
chip_gen: v7x
topology: tpu7x:2x2x1
jax: 0.10.0
libtpu: 0.0.40
codegen_flags: <defaults>
</compile_context>

<pallas_src>
import functools

import jax
import jax.numpy as jnp
from jax.experimental import pallas as pl
from jax.experimental.pallas import tpu as pltpu

_C4_PAD = 128  # lane-dense padding of the final 3-channel output


# ----------------------------------------------------------------------------
# Kernel A: 1x1 conv + folded BN + ReLU, tiled over M = N*H*W.
# ----------------------------------------------------------------------------
def _conv1x1_bn_relu_kernel(x_ref, w_ref, s_ref, b_ref, o_ref):
    # x_ref: (TM, 1024) f32, w_ref: (1024, 128) bf16, s/b: (1, 128) f32.
    acc = jnp.dot(x_ref[...].astype(jnp.bfloat16), w_ref[...],
                  preferred_element_type=jnp.float32)
    o_ref[...] = jnp.maximum(acc * s_ref[...] + b_ref[...], 0.0)


def _conv1x1_bn_relu(x_flat, w_bf16, scale, bias, tm=256):
    M, K = x_flat.shape
    Cout = w_bf16.shape[-1]
    tm = min(tm, M)
    return pl.pallas_call(
        _conv1x1_bn_relu_kernel,
        out_shape=jax.ShapeDtypeStruct((M, Cout), jnp.float32),
        grid=(pl.cdiv(M, tm),),
        in_specs=[
            pl.BlockSpec((tm, K), lambda i: (i, 0)),
            pl.BlockSpec((K, Cout), lambda i: (0, 0)),
            pl.BlockSpec((1, Cout), lambda i: (0, 0)),
            pl.BlockSpec((1, Cout), lambda i: (0, 0)),
        ],
        out_specs=pl.BlockSpec((tm, Cout), lambda i: (i, 0)),
        compiler_params=pltpu.CompilerParams(
            dimension_semantics=("parallel",)),
    )(x_flat, w_bf16, scale.reshape(1, Cout), bias.reshape(1, Cout))


# ----------------------------------------------------------------------------
# Kernel B: fused 3x(3x3 conv) tail, one image per grid step.
#
# Spatial dims are kept flattened as (H*W, C).  A VALID 3x3 conv is computed
# as 9 row-shifted matmuls on the flat tile:
#   out[m] = sum_{dy,dx} src[m + dy*W + dx] @ w[dy,dx]
# This is exact for output columns c <= W-3 and produces "wraparound garbage"
# in the last 2 columns of each row; the garbage stays confined to the
# rightmost columns through the layer stack (2/4/6 columns) and is sliced
# away in the wrapper.  Row counts are chosen so every read is in-bounds:
#   n2 = (H-2)*W - 2, n3 = (H-4)*W - 4, n4 = (H-6)*W - 6.
# ----------------------------------------------------------------------------
def _tail_kernel(x1_ref, w2_ref, w3_ref, w4_ref, s2_ref, b2_ref, s3_ref, b3_ref,
                 o_ref, a2_ref, a3_ref, *, W, n2, n3, n4):
    def conv3x3(src_ref, w_ref, n_rows):
        acc = None
        for dy in range(3):
            for dx in range(3):
                xs = src_ref[pl.ds(dy * W + dx, n_rows), :].astype(jnp.bfloat16)
                d = jnp.dot(xs, w_ref[dy * 3 + dx],
                            preferred_element_type=jnp.float32)
                acc = d if acc is None else acc + d
        return acc

    # layer 2: 128 -> 64, BN + ReLU (f32 epilogue, kept in VMEM scratch)
    a2_ref[...] = jnp.maximum(
        conv3x3(x1_ref, w2_ref, n2) * s2_ref[...] + b2_ref[...], 0.0)
    # layer 3: 64 -> 64, BN + ReLU
    a3_ref[...] = jnp.maximum(
        conv3x3(a2_ref, w3_ref, n3) * s3_ref[...] + b3_ref[...], 0.0)
    # layer 4: 64 -> 3 (padded to 128 lanes), sigmoid, no BN / no bias
    o_ref[...] = jax.nn.sigmoid(conv3x3(a3_ref, w4_ref, n4))


def _tail_convs(x1, w2, w3, w4, s2, b2, s3, b3, *, H, W):
    N, HW, C1 = x1.shape
    C2 = w2.shape[-1]
    C3 = w3.shape[-1]
    C4P = w4.shape[-1]
    n2 = (H - 2) * W - 2
    n3 = (H - 4) * W - 4
    n4 = (H - 6) * W - 6
    kernel = functools.partial(_tail_kernel, W=W, n2=n2, n3=n3, n4=n4)
    return pl.pallas_call(
        kernel,
        out_shape=jax.ShapeDtypeStruct((N, n4, C4P), jnp.float32),
        grid=(N,),
        in_specs=[
            pl.BlockSpec((None, HW, C1), lambda n: (n, 0, 0)),
            pl.BlockSpec((9, C1, C2), lambda n: (0, 0, 0)),
            pl.BlockSpec((9, C2, C3), lambda n: (0, 0, 0)),
            pl.BlockSpec((9, C3, C4P), lambda n: (0, 0, 0)),
            pl.BlockSpec((1, C2), lambda n: (0, 0)),
            pl.BlockSpec((1, C2), lambda n: (0, 0)),
            pl.BlockSpec((1, C3), lambda n: (0, 0)),
            pl.BlockSpec((1, C3), lambda n: (0, 0)),
        ],
        out_specs=pl.BlockSpec((None, n4, C4P), lambda n: (n, 0, 0)),
        scratch_shapes=[
            pltpu.VMEM((n2, C2), jnp.float32),
            pltpu.VMEM((n3, C3), jnp.float32),
        ],
        compiler_params=pltpu.CompilerParams(
            dimension_semantics=("parallel",)),
    )(x1, w2, w3, w4,
      s2.reshape(1, C2), b2.reshape(1, C2),
      s3.reshape(1, C3), b3.reshape(1, C3))


# ----------------------------------------------------------------------------
# Wrapper / parameter folding.
# ----------------------------------------------------------------------------
def _fold_bn(gamma, beta, mean, var, eps=1e-5):
    scale = gamma / jnp.sqrt(var + eps)
    bias = beta - mean * scale
    return scale, bias


def pen_forward(x_nchw, params):
    """PEN forward. x_nchw: (N, 1024, H, W) float32 (PyTorch convention)."""
    # grad_reverse is identity in the forward pass (gradient reversal only).
    x = jnp.transpose(x_nchw, (0, 2, 3, 1))  # NCHW -> NHWC
    N, H, W, Cin = x.shape
    assert H >= 7 and W >= 7, "PEN needs H,W >= 7 (three VALID 3x3 convs)"

    s1, b1 = _fold_bn(*params["bn1"])
    s2, b2 = _fold_bn(*params["bn2"])
    s3, b3 = _fold_bn(*params["bn3"])

    c1 = params["w1"].shape[-1]   # 128
    c2 = params["w2"].shape[-1]   # 64
    c3 = params["w3"].shape[-1]   # 64
    c4 = params["w4"].shape[-1]   # 3

    # ---- layer 1: 1x1 conv == per-pixel matmul, tiled over M = N*H*W ----
    w1 = params["w1"].reshape(Cin, c1).astype(jnp.bfloat16)
    y1 = _conv1x1_bn_relu(x.reshape(N * H * W, Cin), w1, s1, b1)  # (M, 128)
    x1 = y1.reshape(N, H * W, c1)

    # ---- layers 2-4: fused tail kernel, one image per grid step ----
    w2 = params["w2"].reshape(9, c1, c2).astype(jnp.bfloat16)
    w3 = params["w3"].reshape(9, c2, c3).astype(jnp.bfloat16)
    w4 = jnp.pad(params["w4"], ((0, 0), (0, 0), (0, 0), (0, _C4_PAD - c4)))
    w4 = w4.reshape(9, c3, _C4_PAD).astype(jnp.bfloat16)

    out_flat = _tail_convs(x1, w2, w3, w4, s2, b2, s3, b3, H=H, W=W)

    # Unflatten: pad the 6 missing trailing rows, drop wraparound columns and
    # the zero-padded output channels.
    n4 = (H - 6) * W - 6
    out = jnp.pad(out_flat, ((0, 0), (0, (H - 6) * W - n4), (0, 0)))
    out = out.reshape(N, H - 6, W, _C4_PAD)[:, :, :W - 6, :c4]
    return jnp.transpose(out, (0, 3, 1, 2))  # back to NCHW


# ----------------------------------------------------------------------------
# Pure-JAX reference (faithful f32 version of the PyTorch module).
# ----------------------------------------------------------------------------
def pen_forward_ref(x_nchw, params):
    x = jnp.transpose(x_nchw, (0, 2, 3, 1))

    def conv(x, w):
        return jax.lax.conv_general_dilated(
            x, w, window_strides=(1, 1), padding="VALID",
            dimension_numbers=("NHWC", "HWIO", "NHWC"))

    def bn(x, gamma, beta, mean, var, eps=1e-5):
        return (x - mean) / jnp.sqrt(var + eps) * gamma + beta

    x = jax.nn.relu(bn(conv(x, params["w1"]), *params["bn1"]))
    x = jax.nn.relu(bn(conv(x, params["w2"]), *params["bn2"]))
    x = jax.nn.relu(bn(conv(x, params["w3"]), *params["bn3"]))
    x = jax.nn.sigmoid(conv(x, params["w4"]))
    return jnp.transpose(x, (0, 3, 1, 2))


# ----------------------------------------------------------------------------
# Deterministic synthetic parameters (shapes from PEN.__init__).
# ----------------------------------------------------------------------------
def make_params(key):
    ks = jax.random.split(key, 16)

    def bn_params(k, c):
        k1, k2, k3, k4 = jax.random.split(k, 4)
        gamma = 1.0 + 0.1 * jax.random.normal(k1, (c,), jnp.float32)
        beta = 0.1 * jax.random.normal(k2, (c,), jnp.float32)
        mean = 0.05 * jax.random.normal(k3, (c,), jnp.float32)
        var = jax.random.uniform(k4, (c,), jnp.float32, 0.5, 1.5)
        return (gamma, beta, mean, var)

    return {
        # conv weights in HWIO layout (kh, kw, Cin, Cout)
        "w1": 0.02 * jax.random.normal(ks[0], (1, 1, 1024, 128), jnp.float32),
        "w2": 0.02 * jax.random.normal(ks[1], (3, 3, 128, 64), jnp.float32),
        "w3": 0.02 * jax.random.normal(ks[2], (3, 3, 64, 64), jnp.float32),
        "w4": 0.02 * jax.random.normal(ks[3], (3, 3, 64, 3), jnp.float32),
        "bn1": bn_params(ks[4], 128),
        "bn2": bn_params(ks[5], 64),
        "bn3": bn_params(ks[6], 64),
    }


if __name__ == "__main__":
    key = jax.random.PRNGKey(0)
    k_param, k_x = jax.random.split(key)

    params = make_params(k_param)
    # Small but module-consistent input: conv1 requires 1024 input channels.
    x = jax.random.normal(k_x, (2, 1024, 16, 16), jnp.float32)  # NCHW

    out = jax.block_until_ready(jax.jit(pen_forward)(x, params))
    assert out.shape == (2, 3, 10, 10), out.shape  # 16 -> 14 -> 12 -> 10

    ref = jax.block_until_ready(jax.jit(pen_forward_ref)(x, params))
    # bf16 MXU inputs (f32 accumulation / epilogues) => relaxed tolerance.
    assert jnp.allclose(out, ref, rtol=2e-2, atol=2e-2), (
        float(jnp.max(jnp.abs(out - ref))))

    print("KERNEL_OK")
</pallas_src>

<mosaic_0001>
module attributes {stable_mosaic.version = 11 : i64} {
  func.func @_conv1x1_bn_relu_kernel(%arg0: i32, %arg1: memref<256x1024xf32, #tpu.memory_space<vmem>>, %arg2: memref<1024x128xbf16, #tpu.memory_space<vmem>>, %arg3: memref<1x128xf32, #tpu.memory_space<vmem>>, %arg4: memref<1x128xf32, #tpu.memory_space<vmem>>, %arg5: memref<256x128xf32, #tpu.memory_space<vmem>>) attributes {dimension_semantics = [#tpu.dimension_semantics<parallel>], iteration_bounds = array<i64: 2>, scalar_prefetch = 0 : i64, scratch_operands = 0 : i64, tpu.core_type = #tpu.core_type<tc>, window_params = [{transform_indices = @transform_0, window_bounds = array<i64: 256, 1024>}, {pipeline_mode = #tpu.pipeline_mode<synchronous>, transform_indices = @transform_1, window_bounds = array<i64: 1024, 128>}, {pipeline_mode = #tpu.pipeline_mode<synchronous>, transform_indices = @transform_2, window_bounds = array<i64: 1, 128>}, {pipeline_mode = #tpu.pipeline_mode<synchronous>, transform_indices = @transform_3, window_bounds = array<i64: 1, 128>}, {transform_indices = @transform_4, window_bounds = array<i64: 256, 128>}]} {
    %c0 = arith.constant 0 : index
    %c0_0 = arith.constant 0 : index
    %0 = vector.load %arg1[%c0, %c0_0] : memref<256x1024xf32, #tpu.memory_space<vmem>>, vector<256x1024xf32>
    %1 = arith.truncf %0 : vector<256x1024xf32> to vector<256x1024xbf16>
    %c0_1 = arith.constant 0 : index
    %c0_2 = arith.constant 0 : index
    %2 = vector.load %arg2[%c0_1, %c0_2] : memref<1024x128xbf16, #tpu.memory_space<vmem>>, vector<1024x128xbf16>
    %cst = arith.constant dense<0.000000e+00> : vector<256x128xf32>
    %3 = tpu.matmul %1, %2, %cst {dimension_numbers = #tpu.dot_dimension_numbers<[1], [0], [0], [1], [0, 0, 1, 1], [], []>} : vector<256x1024xbf16>, vector<1024x128xbf16>, vector<256x128xf32> -> vector<256x128xf32>
    %c0_3 = arith.constant 0 : index
    %c0_4 = arith.constant 0 : index
    %4 = vector.load %arg3[%c0_3, %c0_4] : memref<1x128xf32, #tpu.memory_space<vmem>>, vector<1x128xf32>
    %5 = vector.broadcast %4 : vector<1x128xf32> to vector<256x128xf32>
    %6 = arith.mulf %3, %5 : vector<256x128xf32>
    %c0_5 = arith.constant 0 : index
    %c0_6 = arith.constant 0 : index
    %7 = vector.load %arg4[%c0_5, %c0_6] : memref<1x128xf32, #tpu.memory_space<vmem>>, vector<1x128xf32>
    %8 = vector.broadcast %7 : vector<1x128xf32> to vector<256x128xf32>
    %9 = arith.addf %6, %8 : vector<256x128xf32>
    %cst_7 = arith.constant 0.000000e+00 : f32
    %10 = vector.broadcast %cst_7 : f32 to vector<256x128xf32>
    %11 = arith.maximumf %9, %10 : vector<256x128xf32>
    %c0_8 = arith.constant 0 : index
    %c0_9 = arith.constant 0 : index
    %12 = vector.load %arg5[%c0_8, %c0_9] : memref<256x128xf32, #tpu.memory_space<vmem>>, vector<256x128xf32>
    tpu.vector_store %arg5[%c0_8, %c0_9], %11 {strides = array<i32>} : memref<256x128xf32, #tpu.memory_space<vmem>>, vector<256x128xf32>,
    return
  }
  func.func @transform_0(%arg0: i32) -> (i32, i32) {
    %c0_i32 = arith.constant 0 : i32
    %c0_i32_0 = arith.constant 0 : i32
    return %arg0, %c0_i32 : i32, i32
  }
  func.func @transform_1(%arg0: i32) -> (i32, i32) {
    %c0_i32 = arith.constant 0 : i32
    %c0_i32_0 = arith.constant 0 : i32
    %c0_i32_1 = arith.constant 0 : i32
    return %c0_i32, %c0_i32_0 : i32, i32
  }
  func.func @transform_2(%arg0: i32) -> (i32, i32) {
    %c0_i32 = arith.constant 0 : i32
    %c0_i32_0 = arith.constant 0 : i32
    %c0_i32_1 = arith.constant 0 : i32
    return %c0_i32, %c0_i32_0 : i32, i32
  }
  func.func @transform_3(%arg0: i32) -> (i32, i32) {
    %c0_i32 = arith.constant 0 : i32
    %c0_i32_0 = arith.constant 0 : i32
    %c0_i32_1 = arith.constant 0 : i32
    return %c0_i32, %c0_i32_0 : i32, i32
  }
  func.func @transform_4(%arg0: i32) -> (i32, i32) {
    %c0_i32 = arith.constant 0 : i32
    %c0_i32_0 = arith.constant 0 : i32
    return %arg0, %c0_i32 : i32, i32
  }
}

module attributes {stable_mosaic.version = 11 : i64} {
  func.func @_tail_kernel(%arg0: i32, %arg1: memref<1x256x128xf32, #tpu.memory_space<vmem>>, %arg2: memref<9x128x64xbf16, #tpu.memory_space<vmem>>, %arg3: memref<9x64x64xbf16, #tpu.memory_space<vmem>>, %arg4: memref<9x64x128xbf16, #tpu.memory_space<vmem>>, %arg5: memref<1x64xf32, #tpu.memory_space<vmem>>, %arg6: memref<1x64xf32, #tpu.memory_space<vmem>>, %arg7: memref<1x64xf32, #tpu.memory_space<vmem>>, %arg8: memref<1x64xf32, #tpu.memory_space<vmem>>, %arg9: memref<1x154x128xf32, #tpu.memory_space<vmem>>, %arg10: memref<222x64xf32, #tpu.memory_space<vmem>>, %arg11: memref<188x64xf32, #tpu.memory_space<vmem>>) attributes {dimension_semantics = [#tpu.dimension_semantics<parallel>], iteration_bounds = array<i64: 2>, scalar_prefetch = 0 : i64, scratch_operands = 2 : i64, tpu.core_type = #tpu.core_type<tc>, window_params = [{transform_indices = @transform_0, window_bounds = array<i64: 1, 256, 128>}, {pipeline_mode = #tpu.pipeline_mode<synchronous>, transform_indices = @transform_1, window_bounds = array<i64: 9, 128, 64>}, {pipeline_mode = #tpu.pipeline_mode<synchronous>, transform_indices = @transform_2, window_bounds = array<i64: 9, 64, 64>}, {pipeline_mode = #tpu.pipeline_mode<synchronous>, transform_indices = @transform_3, window_bounds = array<i64: 9, 64, 128>}, {pipeline_mode = #tpu.pipeline_mode<synchronous>, transform_indices = @transform_4, window_bounds = array<i64: 1, 64>}, {pipeline_mode = #tpu.pipeline_mode<synchronous>, transform_indices = @transform_5, window_bounds = array<i64: 1, 64>}, {pipeline_mode = #tpu.pipeline_mode<synchronous>, transform_indices = @transform_6, window_bounds = array<i64: 1, 64>}, {pipeline_mode = #tpu.pipeline_mode<synchronous>, transform_indices = @transform_7, window_bounds = array<i64: 1, 64>}, {transform_indices = @transform_8, window_bounds = array<i64: 1, 154, 128>}]} {
    %c0 = arith.constant 0 : index
    %c0_0 = arith.constant 0 : index
    %c0_1 = arith.constant 0 : index
    %0 = vector.load %arg1[%c0, %c0_0, %c0_1] : memref<1x256x128xf32, #tpu.memory_space<vmem>>, vector<1x222x128xf32>
    %1 = vector.shape_cast %0 : vector<1x222x128xf32> to vector<222x128xf32>
    %2 = arith.truncf %1 : vector<222x128xf32> to vector<222x128xbf16>
    %c0_2 = arith.constant 0 : index
    %c0_3 = arith.constant 0 : index
    %c0_4 = arith.constant 0 : index
    %3 = vector.load %arg2[%c0_2, %c0_3, %c0_4] : memref<9x128x64xbf16, #tpu.memory_space<vmem>>, vector<1x128x64xbf16>
    %4 = vector.shape_cast %3 : vector<1x128x64xbf16> to vector<128x64xbf16>
    %cst = arith.constant dense<0.000000e+00> : vector<222x64xf32>
    %5 = tpu.matmul %2, %4, %cst {dimension_numbers = #tpu.dot_dimension_numbers<[1], [0], [0], [1], [0, 0, 1, 1], [], []>} : vector<222x128xbf16>, vector<128x64xbf16>, vector<222x64xf32> -> vector<222x64xf32>
    %c0_5 = arith.constant 0 : index
    %c1 = arith.constant 1 : index
    %c0_6 = arith.constant 0 : index
    %6 = vector.load %arg1[%c0_5, %c1, %c0_6] : memref<1x256x128xf32, #tpu.memory_space<vmem>>, vector<1x222x128xf32>
    %7 = vector.shape_cast %6 : vector<1x222x128xf32> to vector<222x128xf32>
    %8 = arith.truncf %7 : vector<222x128xf32> to vector<222x128xbf16>
    %c1_7 = arith.constant 1 : index
    %c0_8 = arith.constant 0 : index
    %c0_9 = arith.constant 0 : index
    %9 = vector.load %arg2[%c1_7, %c0_8, %c0_9] : memref<9x128x64xbf16, #tpu.memory_space<vmem>>, vector<1x128x64xbf16>
    %10 = vector.shape_cast %9 : vector<1x128x64xbf16> to vector<128x64xbf16>
    %cst_10 = arith.constant dense<0.000000e+00> : vector<222x64xf32>
    %11 = tpu.matmul %8, %10, %cst_10 {dimension_numbers = #tpu.dot_dimension_numbers<[1], [0], [0], [1], [0, 0, 1, 1], [], []>} : vector<222x128xbf16>, vector<128x64xbf16>, vector<222x64xf32> -> vector<222x64xf32>
    %12 = arith.addf %5, %11 : vector<222x64xf32>
    %c0_11 = arith.constant 0 : index
    %c2 = arith.constant 2 : index
    %c0_12 = arith.constant 0 : index
    %13 = vector.load %arg1[%c0_11, %c2, %c0_12] : memref<1x256x128xf32, #tpu.memory_space<vmem>>, vector<1x222x128xf32>
    %14 = vector.shape_cast %13 : vector<1x222x128xf32> to vector<222x128xf32>
    %15 = arith.truncf %14 : vector<222x128xf32> to vector<222x128xbf16>
    %c2_13 = arith.constant 2 : index
    %c0_14 = arith.constant 0 : index
    %c0_15 = arith.constant 0 : index
    %16 = vector.load %arg2[%c2_13, %c0_14, %c0_15] : memref<9x128x64xbf16, #tpu.memory_space<vmem>>, vector<1x128x64xbf16>
    %17 = vector.shape_cast %16 : vector<1x128x64xbf16> to vector<128x64xbf16>
    %cst_16 = arith.constant dense<0.000000e+00> : vector<222x64xf32>
    %18 = tpu.matmul %15, %17, %cst_16 {dimension_numbers = #tpu.dot_dimension_numbers<[1], [0], [0], [1], [0, 0, 1, 1], [], []>} : vector<222x128xbf16>, vector<128x64xbf16>, vector<222x64xf32> -> vector<222x64xf32>
    %19 = arith.addf %12, %18 : vector<222x64xf32>
    %c0_17 = arith.constant 0 : index
    %c16 = arith.constant 16 : index
    %c0_18 = arith.constant 0 : index
    %20 = vector.load %arg1[%c0_17, %c16, %c0_18] : memref<1x256x128xf32, #tpu.memory_space<vmem>>, vector<1x222x128xf32>
    %21 = vector.shape_cast %20 : vector<1x222x128xf32> to vector<222x128xf32>
    %22 = arith.truncf %21 : vector<222x128xf32> to vector<222x128xbf16>
    %c3 = arith.constant 3 : index
    %c0_19 = arith.constant 0 : index
    %c0_20 = arith.constant 0 : index
    %23 = vector.load %arg2[%c3, %c0_19, %c0_20] : memref<9x128x64xbf16, #tpu.memory_space<vmem>>, vector<1x128x64xbf16>
    %24 = vector.shape_cast %23 : vector<1x128x64xbf16> to vector<128x64xbf16>
    %cst_21 = arith.constant dense<0.000000e+00> : vector<222x64xf32>
    %25 = tpu.matmul %22, %24, %cst_21 {dimension_numbers = #tpu.dot_dimension_numbers<[1], [0], [0], [1], [0, 0, 1, 1], [], []>} : vector<222x128xbf16>, vector<128x64xbf16>, vector<222x64xf32> -> vector<222x64xf32>
    %26 = arith.addf %19, %25 : vector<222x64xf32>
    %c0_22 = arith.constant 0 : index
    %c17 = arith.constant 17 : index
    %c0_23 = arith.constant 0 : index
    %27 = vector.load %arg1[%c0_22, %c17, %c0_23] : memref<1x256x128xf32, #tpu.memory_space<vmem>>, vector<1x222x128xf32>
    %28 = vector.shape_cast %27 : vector<1x222x128xf32> to vector<222x128xf32>
    %29 = arith.truncf %28 : vector<222x128xf32> to vector<222x128xbf16>
    %c4 = arith.constant 4 : index
    %c0_24 = arith.constant 0 : index
    %c0_25 = arith.constant 0 : index
    %30 = vector.load %arg2[%c4, %c0_24, %c0_25] : memref<9x128x64xbf16, #tpu.memory_space<vmem>>, vector<1x128x64xbf16>
    %31 = vector.shape_cast %30 : vector<1x128x64xbf16> to vector<128x64xbf16>
    %cst_26 = arith.constant dense<0.000000e+00> : vector<222x64xf32>
    %32 = tpu.matmul %29, %31, %cst_26 {dimension_numbers = #tpu.dot_dimension_numbers<[1], [0], [0], [1], [0, 0, 1, 1], [], []>} : vector<222x128xbf16>, vector<128x64xbf16>, vector<222x64xf32> -> vector<222x64xf32>
    %33 = arith.addf %26, %32 : vector<222x64xf32>
    %c0_27 = arith.constant 0 : index
    %c18 = arith.constant 18 : index
    %c0_28 = arith.constant 0 : index
    %34 = vector.load %arg1[%c0_27, %c18, %c0_28] : memref<1x256x128xf32, #tpu.memory_space<vmem>>, vector<1x222x128xf32>
    %35 = vector.shape_cast %34 : vector<1x222x128xf32> to vector<222x128xf32>
    %36 = arith.truncf %35 : vector<222x128xf32> to vector<222x128xbf16>
    %c5 = arith.constant 5 : index
    %c0_29 = arith.constant 0 : index
    %c0_30 = arith.constant 0 : index
    %37 = vector.load %arg2[%c5, %c0_29, %c0_30] : memref<9x128x64xbf16, #tpu.memory_space<vmem>>, vector<1x128x64xbf16>
    %38 = vector.shape_cast %37 : vector<1x128x64xbf16> to vector<128x64xbf16>
    %cst_31 = arith.constant dense<0.000000e+00> : vector<222x64xf32>
    %39 = tpu.matmul %36, %38, %cst_31 {dimension_numbers = #tpu.dot_dimension_numbers<[1], [0], [0], [1], [0, 0, 1, 1], [], []>} : vector<222x128xbf16>, vector<128x64xbf16>, vector<222x64xf32> -> vector<222x64xf32>
    %40 = arith.addf %33, %39 : vector<222x64xf32>
    %c0_32 = arith.constant 0 : index
    %c32 = arith.constant 32 : index
    %c0_33 = arith.constant 0 : index
    %41 = vector.load %arg1[%c0_32, %c32, %c0_33] : memref<1x256x128xf32, #tpu.memory_space<vmem>>, vector<1x222x128xf32>
    %42 = vector.shape_cast %41 : vector<1x222x128xf32> to vector<222x128xf32>
    %43 = arith.truncf %42 : vector<222x128xf32> to vector<222x128xbf16>
    %c6 = arith.constant 6 : index
    %c0_34 = arith.constant 0 : index
    %c0_35 = arith.constant 0 : index
    %44 = vector.load %arg2[%c6, %c0_34, %c0_35] : memref<9x128x64xbf16, #tpu.memory_space<vmem>>, vector<1x128x64xbf16>
    %45 = vector.shape_cast %44 : vector<1x128x64xbf16> to vector<128x64xbf16>
    %cst_36 = arith.constant dense<0.000000e+00> : vector<222x64xf32>
    %46 = tpu.matmul %43, %45, %cst_36 {dimension_numbers = #tpu.dot_dimension_numbers<[1], [0], [0], [1], [0, 0, 1, 1], [], []>} : vector<222x128xbf16>, vector<128x64xbf16>, vector<222x64xf32> -> vector<222x64xf32>
    %47 = arith.addf %40, %46 : vector<222x64xf32>
    %c0_37 = arith.constant 0 : index
    %c33 = arith.constant 33 : index
    %c0_38 = arith.constant 0 : index
    %48 = vector.load %arg1[%c0_37, %c33, %c0_38] : memref<1x256x128xf32, #tpu.memory_space<vmem>>, vector<1x222x128xf32>
    %49 = vector.shape_cast %48 : vector<1x222x128xf32> to vector<222x128xf32>
    %50 = arith.truncf %49 : vector<222x128xf32> to vector<222x128xbf16>
    %c7 = arith.constant 7 : index
    %c0_39 = arith.constant 0 : index
    %c0_40 = arith.constant 0 : index
    %51 = vector.load %arg2[%c7, %c0_39, %c0_40] : memref<9x128x64xbf16, #tpu.memory_space<vmem>>, vector<1x128x64xbf16>
    %52 = vector.shape_cast %51 : vector<1x128x64xbf16> to vector<128x64xbf16>
    %cst_41 = arith.constant dense<0.000000e+00> : vector<222x64xf32>
    %53 = tpu.matmul %50, %52, %cst_41 {dimension_numbers = #tpu.dot_dimension_numbers<[1], [0], [0], [1], [0, 0, 1, 1], [], []>} : vector<222x128xbf16>, vector<128x64xbf16>, vector<222x64xf32> -> vector<222x64xf32>
    %54 = arith.addf %47, %53 : vector<222x64xf32>
    %c0_42 = arith.constant 0 : index
    %c34 = arith.constant 34 : index
    %c0_43 = arith.constant 0 : index
    %55 = vector.load %arg1[%c0_42, %c34, %c0_43] : memref<1x256x128xf32, #tpu.memory_space<vmem>>, vector<1x222x128xf32>
    %56 = vector.shape_cast %55 : vector<1x222x128xf32> to vector<222x128xf32>
    %57 = arith.truncf %56 : vector<222x128xf32> to vector<222x128xbf16>
    %c8 = arith.constant 8 : index
    %c0_44 = arith.constant 0 : index
    %c0_45 = arith.constant 0 : index
    %58 = vector.load %arg2[%c8, %c0_44, %c0_45] : memref<9x128x64xbf16, #tpu.memory_space<vmem>>, vector<1x128x64xbf16>
    %59 = vector.shape_cast %58 : vector<1x128x64xbf16> to vector<128x64xbf16>
    %cst_46 = arith.constant dense<0.000000e+00> : vector<222x64xf32>
    %60 = tpu.matmul %57, %59, %cst_46 {dimension_numbers = #tpu.dot_dimension_numbers<[1], [0], [0], [1], [0, 0, 1, 1], [], []>} : vector<222x128xbf16>, vector<128x64xbf16>, vector<222x64xf32> -> vector<222x64xf32>
    %61 = arith.addf %54, %60 : vector<222x64xf32>
    %c0_47 = arith.constant 0 : index
    %c0_48 = arith.constant 0 : index
    %62 = vector.load %arg5[%c0_47, %c0_48] : memref<1x64xf32, #tpu.memory_space<vmem>>, vector<1x64xf32>
    %63 = vector.broadcast %62 : vector<1x64xf32> to vector<222x64xf32>
    %64 = arith.mulf %61, %63 : vector<222x64xf32>
    %c0_49 = arith.constant 0 : index
    %c0_50 = arith.constant 0 : index
    %65 = vector.load %arg6[%c0_49, %c0_50] : memref<1x64xf32, #tpu.memory_space<vmem>>, vector<1x64xf32>
    %66 = vector.broadcast %65 : vector<1x64xf32> to vector<222x64xf32>
    %67 = arith.addf %64, %66 : vector<222x64xf32>
    %cst_51 = arith.constant 0.000000e+00 : f32
    %68 = vector.broadcast %cst_51 : f32 to vector<222x64xf32>
    %69 = arith.maximumf %67, %68 : vector<222x64xf32>
    %c0_52 = arith.constant 0 : index
    %c0_53 = arith.constant 0 : index
    %70 = vector.load %arg10[%c0_52, %c0_53] : memref<222x64xf32, #tpu.memory_space<vmem>>, vector<222x64xf32>
    tpu.vector_store %arg10[%c0_52, %c0_53], %69 {strides = array<i32>} : memref<222x64xf32, #tpu.memory_space<vmem>>, vector<222x64xf32>,
    %c0_54 = arith.constant 0 : index
    %c0_55 = arith.constant 0 : index
    %71 = vector.load %arg10[%c0_54, %c0_55] : memref<222x64xf32, #tpu.memory_space<vmem>>, vector<188x64xf32>
    %72 = arith.truncf %71 : vector<188x64xf32> to vector<188x64xbf16>
    %c0_56 = arith.constant 0 : index
    %c0_57 = arith.constant 0 : index
    %c0_58 = arith.constant 0 : index
    %73 = vector.load %arg3[%c0_56, %c0_57, %c0_58] : memref<9x64x64xbf16, #tpu.memory_space<vmem>>, vector<1x64x64xbf16>
    %74 = vector.shape_cast %73 : vector<1x64x64xbf16> to vector<64x64xbf16>
    %cst_59 = arith.constant dense<0.000000e+00> : vector<188x64xf32>
    %75 = tpu.matmul %72, %74, %cst_59 {dimension_numbers = #tpu.dot_dimension_numbers<[1], [0], [0], [1], [0, 0, 1, 1], [], []>} : vector<188x64xbf16>, vector<64x64xbf16>, vector<188x64xf32> -> vector<188x64xf32>
    %c1_60 = arith.constant 1 : index
    %c0_61 = arith.constant 0 : index
    %76 = vector.load %arg10[%c1_60, %c0_61] : memref<222x64xf32, #tpu.memory_space<vmem>>, vector<188x64xf32>
    %77 = arith.truncf %76 : vector<188x64xf32> to vector<188x64xbf16>
    %c1_62 = arith.constant 1 : index
    %c0_63 = arith.constant 0 : index
    %c0_64 = arith.constant 0 : index
    %78 = vector.load %arg3[%c1_62, %c0_63, %c0_64] : memref<9x64x64xbf16, #tpu.memory_space<vmem>>, vector<1x64x64xbf16>
    %79 = vector.shape_cast %78 : vector<1x64x64xbf16> to vector<64x64xbf16>
    %cst_65 = arith.constant dense<0.000000e+00> : vector<188x64xf32>
    %80 = tpu.matmul %77, %79, %cst_65 {dimension_numbers = #tpu.dot_dimension_numbers<[1], [0], [0], [1], [0, 0, 1, 1], [], []>} : vector<188x64xbf16>, vector<64x64xbf16>, vector<188x64xf32> -> vector<188x64xf32>
    %81 = arith.addf %75, %80 : vector<188x64xf32>
    %c2_66 = arith.constant 2 : index
    %c0_67 = arith.constant 0 : index
    %82 = vector.load %arg10[%c2_66, %c0_67] : memref<222x64xf32, #tpu.memory_space<vmem>>, vector<188x64xf32>
    %83 = arith.truncf %82 : vector<188x64xf32> to vector<188x64xbf16>
    %c2_68 = arith.constant 2 : index
    %c0_69 = arith.constant 0 : index
    %c0_70 = arith.constant 0 : index
    %84 = vector.load %arg3[%c2_68, %c0_69, %c0_70] : memref<9x64x64xbf16, #tpu.memory_space<vmem>>, vector<1x64x64xbf16>
    %85 = vector.shape_cast %84 : vector<1x64x64xbf16> to vector<64x64xbf16>
    %cst_71 = arith.constant dense<0.000000e+00> : vector<188x64xf32>
    %86 = tpu.matmul %83, %85, %cst_71 {dimension_numbers = #tpu.dot_dimension_numbers<[1], [0], [0], [1], [0, 0, 1, 1], [], []>} : vector<188x64xbf16>, vector<64x64xbf16>, vector<188x64xf32> -> vector<188x64xf32>
    %87 = arith.addf %81, %86 : vector<188x64xf32>
    %c16_72 = arith.constant 16 : index
    %c0_73 = arith.constant 0 : index
    %88 = vector.load %arg10[%c16_72, %c0_73] : memref<222x64xf32, #tpu.memory_space<vmem>>, vector<188x64xf32>
    %89 = arith.truncf %88 : vector<188x64xf32> to vector<188x64xbf16>
    %c3_74 = arith.constant 3 : index
    %c0_75 = arith.constant 0 : index
    %c0_76 = arith.constant 0 : index
    %90 = vector.load %arg3[%c3_74, %c0_75, %c0_76] : memref<9x64x64xbf16, #tpu.memory_space<vmem>>, vector<1x64x64xbf16>
    %91 = vector.shape_cast %90 : vector<1x64x64xbf16> to vector<64x64xbf16>
    %cst_77 = arith.constant dense<0.000000e+00> : vector<188x64xf32>
    %92 = tpu.matmul %89, %91, %cst_77 {dimension_numbers = #tpu.dot_dimension_numbers<[1], [0], [0], [1], [0, 0, 1, 1], [], []>} : vector<188x64xbf16>, vector<64x64xbf16>, vector<188x64xf32> -> vector<188x64xf32>
    %93 = arith.addf %87, %92 : vector<188x64xf32>
    %c17_78 = arith.constant 17 : index
    %c0_79 = arith.constant 0 : index
    %94 = vector.load %arg10[%c17_78, %c0_79] : memref<222x64xf32, #tpu.memory_space<vmem>>, vector<188x64xf32>
    %95 = arith.truncf %94 : vector<188x64xf32> to vector<188x64xbf16>
    %c4_80 = arith.constant 4 : index
    %c0_81 = arith.constant 0 : index
    %c0_82 = arith.constant 0 : index
    %96 = vector.load %arg3[%c4_80, %c0_81, %c0_82] : memref<9x64x64xbf16, #tpu.memory_space<vmem>>, vector<1x64x64xbf16>
    %97 = vector.shape_cast %96 : vector<1x64x64xbf16> to vector<64x64xbf16>
    %cst_83 = arith.constant dense<0.000000e+00> : vector<188x64xf32>
    %98 = tpu.matmul %95, %97, %cst_83 {dimension_numbers = #tpu.dot_dimension_numbers<[1], [0], [0], [1], [0, 0, 1, 1], [], []>} : vector<188x64xbf16>, vector<64x64xbf16>, vector<188x64xf32> -> vector<188x64xf32>
    %99 = arith.addf %93, %98 : vector<188x64xf32>
    %c18_84 = arith.constant 18 : index
    %c0_85 = arith.constant 0 : index
    %100 = vector.load %arg10[%c18_84, %c0_85] : memref<222x64xf32, #tpu.memory_space<vmem>>, vector<188x64xf32>
    %101 = arith.truncf %100 : vector<188x64xf32> to vector<188x64xbf16>
    %c5_86 = arith.constant 5 : index
    %c0_87 = arith.constant 0 : index
    %c0_88 = arith.constant 0 : index
    %102 = vector.load %arg3[%c5_86, %c0_87, %c0_88] : memref<9x64x64xbf16, #tpu.memory_space<vmem>>, vector<1x64x64xbf16>
    %103 = vector.shape_cast %102 : vector<1x64x64xbf16> to vector<64x64xbf16>
    %cst_89 = arith.constant dense<0.000000e+00> : vector<188x64xf32>
    %104 = tpu.matmul %101, %103, %cst_89 {dimension_numbers = #tpu.dot_dimension_numbers<[1], [0], [0], [1], [0, 0, 1, 1], [], []>} : vector<188x64xbf16>, vector<64x64xbf16>, vector<188x64xf32> -> vector<188x64xf32>
    %105 = arith.addf %99, %104 : vector<188x64xf32>
    %c32_90 = arith.constant 32 : index
    %c0_91 = arith.constant 0 : index
    %106 = vector.load %arg10[%c32_90, %c0_91] : memref<222x64xf32, #tpu.memory_space<vmem>>, vector<188x64xf32>
    %107 = arith.truncf %106 : vector<188x64xf32> to vector<188x64xbf16>
    %c6_92 = arith.constant 6 : index
    %c0_93 = arith.constant 0 : index
    %c0_94 = arith.constant 0 : index
    %108 = vector.load %arg3[%c6_92, %c0_93, %c0_94] : memref<9x64x64xbf16, #tpu.memory_space<vmem>>, vector<1x64x64xbf16>
    %109 = vector.shape_cast %108 : vector<1x64x64xbf16> to vector<64x64xbf16>
    %cst_95 = arith.constant dense<0.000000e+00> : vector<188x64xf32>
    %110 = tpu.matmul %107, %109, %cst_95 {dimension_numbers = #tpu.dot_dimension_numbers<[1], [0], [0], [1], [0, 0, 1, 1], [], []>} : vector<188x64xbf16>, vector<64x64xbf16>, vector<188x64xf32> -> vector<188x64xf32>
    %111 = arith.addf %105, %110 : vector<188x64xf32>
    %c33_96 = arith.constant 33 : index
    %c0_97 = arith.constant 0 : index
    %112 = vector.load %arg10[%c33_96, %c0_97] : memref<222x64xf32, #tpu.memory_space<vmem>>, vector<188x64xf32>
    %113 = arith.truncf %112 : vector<188x64xf32> to vector<188x64xbf16>
    %c7_98 = arith.constant 7 : index
    %c0_99 = arith.constant 0 : index
    %c0_100 = arith.constant 0 : index
    %114 = vector.load %arg3[%c7_98, %c0_99, %c0_100] : memref<9x64x64xbf16, #tpu.memory_space<vmem>>, vector<1x64x64xbf16>
    %115 = vector.shape_cast %114 : vector<1x64x64xbf16> to vector<64x64xbf16>
    %cst_101 = arith.constant dense<0.000000e+00> : vector<188x64xf32>
    %116 = tpu.matmul %113, %115, %cst_101 {dimension_numbers = #tpu.dot_dimension_numbers<[1], [0], [0], [1], [0, 0, 1, 1], [], []>} : vector<188x64xbf16>, vector<64x64xbf16>, vector<188x64xf32> -> vector<188x64xf32>
    %117 = arith.addf %111, %116 : vector<188x64xf32>
    %c34_102 = arith.constant 34 : index
    %c0_103 = arith.constant 0 : index
    %118 = vector.load %arg10[%c34_102, %c0_103] : memref<222x64xf32, #tpu.memory_space<vmem>>, vector<188x64xf32>
    %119 = arith.truncf %118 : vector<188x64xf32> to vector<188x64xbf16>
    %c8_104 = arith.constant 8 : index
    %c0_105 = arith.constant 0 : index
    %c0_106 = arith.constant 0 : index
    %120 = vector.load %arg3[%c8_104, %c0_105, %c0_106] : memref<9x64x64xbf16, #tpu.memory_space<vmem>>, vector<1x64x64xbf16>
    %121 = vector.shape_cast %120 : vector<1x64x64xbf16> to vector<64x64xbf16>
    %cst_107 = arith.constant dense<0.000000e+00> : vector<188x64xf32>
    %122 = tpu.matmul %119, %121, %cst_107 {dimension_numbers = #tpu.dot_dimension_numbers<[1], [0], [0], [1], [0, 0, 1, 1], [], []>} : vector<188x64xbf16>, vector<64x64xbf16>, vector<188x64xf32> -> vector<188x64xf32>
    %123 = arith.addf %117, %122 : vector<188x64xf32>
    %c0_108 = arith.constant 0 : index
    %c0_109 = arith.constant 0 : index
    %124 = vector.load %arg7[%c0_108, %c0_109] : memref<1x64xf32, #tpu.memory_space<vmem>>, vector<1x64xf32>
    %125 = vector.broadcast %124 : vector<1x64xf32> to vector<188x64xf32>
    %126 = arith.mulf %123, %125 : vector<188x64xf32>
    %c0_110 = arith.constant 0 : index
    %c0_111 = arith.constant 0 : index
    %127 = vector.load %arg8[%c0_110, %c0_111] : memref<1x64xf32, #tpu.memory_space<vmem>>, vector<1x64xf32>
    %128 = vector.broadcast %127 : vector<1x64xf32> to vector<188x64xf32>
    %129 = arith.addf %126, %128 : vector<188x64xf32>
    %cst_112 = arith.constant 0.000000e+00 : f32
    %130 = vector.broadcast %cst_112 : f32 to vector<188x64xf32>
    %131 = arith.maximumf %129, %130 : vector<188x64xf32>
    %c0_113 = arith.constant 0 : index
    %c0_114 = arith.constant 0 : index
    %132 = vector.load %arg11[%c0_113, %c0_114] : memref<188x64xf32, #tpu.memory_space<vmem>>, vector<188x64xf32>
    tpu.vector_store %arg11[%c0_113, %c0_114], %131 {strides = array<i32>} : memref<188x64xf32, #tpu.memory_space<vmem>>, vector<188x64xf32>,
    %c0_115 = arith.constant 0 : index
    %c0_116 = arith.constant 0 : index
    %133 = vector.load %arg11[%c0_115, %c0_116] : memref<188x64xf32, #tpu.memory_space<vmem>>, vector<154x64xf32>
    %134 = arith.truncf %133 : vector<154x64xf32> to vector<154x64xbf16>
    %c0_117 = arith.constant 0 : index
    %c0_118 = arith.constant 0 : index
    %c0_119 = arith.constant 0 : index
    %135 = vector.load %arg4[%c0_117, %c0_118, %c0_119] : memref<9x64x128xbf16, #tpu.memory_space<vmem>>, vector<1x64x128xbf16>
    %136 = vector.shape_cast %135 : vector<1x64x128xbf16> to vector<64x128xbf16>
    %cst_120 = arith.constant dense<0.000000e+00> : vector<154x128xf32>
    %137 = tpu.matmul %134, %136, %cst_120 {dimension_numbers = #tpu.dot_dimension_numbers<[1], [0], [0], [1], [0, 0, 1, 1], [], []>} : vector<154x64xbf16>, vector<64x128xbf16>, vector<154x128xf32> -> vector<154x128xf32>
    %c1_121 = arith.constant 1 : index
    %c0_122 = arith.constant 0 : index
    %138 = vector.load %arg11[%c1_121, %c0_122] : memref<188x64xf32, #tpu.memory_space<vmem>>, vector<154x64xf32>
    %139 = arith.truncf %138 : vector<154x64xf32> to vector<154x64xbf16>
    %c1_123 = arith.constant 1 : index
    %c0_124 = arith.constant 0 : index
    %c0_125 = arith.constant 0 : index
    %140 = vector.load %arg4[%c1_123, %c0_124, %c0_125] : memref<9x64x128xbf16, #tpu.memory_space<vmem>>, vector<1x64x128xbf16>
    %141 = vector.shape_cast %140 : vector<1x64x128xbf16> to vector<64x128xbf16>
    %cst_126 = arith.constant dense<0.000000e+00> : vector<154x128xf32>
    %142 = tpu.matmul %139, %141, %cst_126 {dimension_numbers = #tpu.dot_dimension_numbers<[1], [0], [0], [1], [0, 0, 1, 1], [], []>} : vector<154x64xbf16>, vector<64x128xbf16>, vector<154x128xf32> -> vector<154x128xf32>
    %143 = arith.addf %137, %142 : vector<154x128xf32>
    %c2_127 = arith.constant 2 : index
    %c0_128 = arith.constant 0 : index
    %144 = vector.load %arg11[%c2_127, %c0_128] : memref<188x64xf32, #tpu.memory_space<vmem>>, vector<154x64xf32>
    %145 = arith.truncf %144 : vector<154x64xf32> to vector<154x64xbf16>
    %c2_129 = arith.constant 2 : index
    %c0_130 = arith.constant 0 : index
    %c0_131 = arith.constant 0 : index
    %146 = vector.load %arg4[%c2_129, %c0_130, %c0_131] : memref<9x64x128xbf16, #tpu.memory_space<vmem>>, vector<1x64x128xbf16>
    %147 = vector.shape_cast %146 : vector<1x64x128xbf16> to vector<64x128xbf16>
    %cst_132 = arith.constant dense<0.000000e+00> : vector<154x128xf32>
    %148 = tpu.matmul %145, %147, %cst_132 {dimension_numbers = #tpu.dot_dimension_numbers<[1], [0], [0], [1], [0, 0, 1, 1], [], []>} : vector<154x64xbf16>, vector<64x128xbf16>, vector<154x128xf32> -> vector<154x128xf32>
    %149 = arith.addf %143, %148 : vector<154x128xf32>
    %c16_133 = arith.constant 16 : index
    %c0_134 = arith.constant 0 : index
    %150 = vector.load %arg11[%c16_133, %c0_134] : memref<188x64xf32, #tpu.memory_space<vmem>>, vector<154x64xf32>
    %151 = arith.truncf %150 : vector<154x64xf32> to vector<154x64xbf16>
    %c3_135 = arith.constant 3 : index
    %c0_136 = arith.constant 0 : index
    %c0_137 = arith.constant 0 : index
    %152 = vector.load %arg4[%c3_135, %c0_136, %c0_137] : memref<9x64x128xbf16, #tpu.memory_space<vmem>>, vector<1x64x128xbf16>
    %153 = vector.shape_cast %152 : vector<1x64x128xbf16> to vector<64x128xbf16>
    %cst_138 = arith.constant dense<0.000000e+00> : vector<154x128xf32>
    %154 = tpu.matmul %151, %153, %cst_138 {dimension_numbers = #tpu.dot_dimension_numbers<[1], [0], [0], [1], [0, 0, 1, 1], [], []>} : vector<154x64xbf16>, vector<64x128xbf16>, vector<154x128xf32> -> vector<154x128xf32>
    %155 = arith.addf %149, %154 : vector<154x128xf32>
    %c17_139 = arith.constant 17 : index
    %c0_140 = arith.constant 0 : index
    %156 = vector.load %arg11[%c17_139, %c0_140] : memref<188x64xf32, #tpu.memory_space<vmem>>, vector<154x64xf32>
    %157 = arith.truncf %156 : vector<154x64xf32> to vector<154x64xbf16>
    %c4_141 = arith.constant 4 : index
    %c0_142 = arith.constant 0 : index
    %c0_143 = arith.constant 0 : index
    %158 = vector.load %arg4[%c4_141, %c0_142, %c0_143] : memref<9x64x128xbf16, #tpu.memory_space<vmem>>, vector<1x64x128xbf16>
    %159 = vector.shape_cast %158 : vector<1x64x128xbf16> to vector<64x128xbf16>
    %cst_144 = arith.constant dense<0.000000e+00> : vector<154x128xf32>
    %160 = tpu.matmul %157, %159, %cst_144 {dimension_numbers = #tpu.dot_dimension_numbers<[1], [0], [0], [1], [0, 0, 1, 1], [], []>} : vector<154x64xbf16>, vector<64x128xbf16>, vector<154x128xf32> -> vector<154x128xf32>
    %161 = arith.addf %155, %160 : vector<154x128xf32>
    %c18_145 = arith.constant 18 : index
    %c0_146 = arith.constant 0 : index
    %162 = vector.load %arg11[%c18_145, %c0_146] : memref<188x64xf32, #tpu.memory_space<vmem>>, vector<154x64xf32>
    %163 = arith.truncf %162 : vector<154x64xf32> to vector<154x64xbf16>
    %c5_147 = arith.constant 5 : index
    %c0_148 = arith.constant 0 : index
    %c0_149 = arith.constant 0 : index
    %164 = vector.load %arg4[%c5_147, %c0_148, %c0_149] : memref<9x64x128xbf16, #tpu.memory_space<vmem>>, vector<1x64x128xbf16>
    %165 = vector.shape_cast %164 : vector<1x64x128xbf16> to vector<64x128xbf16>
    %cst_150 = arith.constant dense<0.000000e+00> : vector<154x128xf32>
    %166 = tpu.matmul %163, %165, %cst_150 {dimension_numbers = #tpu.dot_dimension_numbers<[1], [0], [0], [1], [0, 0, 1, 1], [], []>} : vector<154x64xbf16>, vector<64x128xbf16>, vector<154x128xf32> -> vector<154x128xf32>
    %167 = arith.addf %161, %166 : vector<154x128xf32>
    %c32_151 = arith.constant 32 : index
    %c0_152 = arith.constant 0 : index
    %168 = vector.load %arg11[%c32_151, %c0_152] : memref<188x64xf32, #tpu.memory_space<vmem>>, vector<154x64xf32>
    %169 = arith.truncf %168 : vector<154x64xf32> to vector<154x64xbf16>
    %c6_153 = arith.constant 6 : index
    %c0_154 = arith.constant 0 : index
    %c0_155 = arith.constant 0 : index
    %170 = vector.load %arg4[%c6_153, %c0_154, %c0_155] : memref<9x64x128xbf16, #tpu.memory_space<vmem>>, vector<1x64x128xbf16>
    %171 = vector.shape_cast %170 : vector<1x64x128xbf16> to vector<64x128xbf16>
    %cst_156 = arith.constant dense<0.000000e+00> : vector<154x128xf32>
    %172 = tpu.matmul %169, %171, %cst_156 {dimension_numbers = #tpu.dot_dimension_numbers<[1], [0], [0], [1], [0, 0, 1, 1], [], []>} : vector<154x64xbf16>, vector<64x128xbf16>, vector<154x128xf32> -> vector<154x128xf32>
    %173 = arith.addf %167, %172 : vector<154x128xf32>
    %c33_157 = arith.constant 33 : index
    %c0_158 = arith.constant 0 : index
    %174 = vector.load %arg11[%c33_157, %c0_158] : memref<188x64xf32, #tpu.memory_space<vmem>>, vector<154x64xf32>
    %175 = arith.truncf %174 : vector<154x64xf32> to vector<154x64xbf16>
    %c7_159 = arith.constant 7 : index
    %c0_160 = arith.constant 0 : index
    %c0_161 = arith.constant 0 : index
    %176 = vector.load %arg4[%c7_159, %c0_160, %c0_161] : memref<9x64x128xbf16, #tpu.memory_space<vmem>>, vector<1x64x128xbf16>
    %177 = vector.shape_cast %176 : vector<1x64x128xbf16> to vector<64x128xbf16>
    %cst_162 = arith.constant dense<0.000000e+00> : vector<154x128xf32>
    %178 = tpu.matmul %175, %177, %cst_162 {dimension_numbers = #tpu.dot_dimension_numbers<[1], [0], [0], [1], [0, 0, 1, 1], [], []>} : vector<154x64xbf16>, vector<64x128xbf16>, vector<154x128xf32> -> vector<154x128xf32>
    %179 = arith.addf %173, %178 : vector<154x128xf32>
    %c34_163 = arith.constant 34 : index
    %c0_164 = arith.constant 0 : index
    %180 = vector.load %arg11[%c34_163, %c0_164] : memref<188x64xf32, #tpu.memory_space<vmem>>, vector<154x64xf32>
    %181 = arith.truncf %180 : vector<154x64xf32> to vector<154x64xbf16>
    %c8_165 = arith.constant 8 : index
    %c0_166 = arith.constant 0 : index
    %c0_167 = arith.constant 0 : index
    %182 = vector.load %arg4[%c8_165, %c0_166, %c0_167] : memref<9x64x128xbf16, #tpu.memory_space<vmem>>, vector<1x64x128xbf16>
    %183 = vector.shape_cast %182 : vector<1x64x128xbf16> to vector<64x128xbf16>
    %cst_168 = arith.constant dense<0.000000e+00> : vector<154x128xf32>
    %184 = tpu.matmul %181, %183, %cst_168 {dimension_numbers = #tpu.dot_dimension_numbers<[1], [0], [0], [1], [0, 0, 1, 1], [], []>} : vector<154x64xbf16>, vector<64x128xbf16>, vector<154x128xf32> -> vector<154x128xf32>
    %185 = arith.addf %179, %184 : vector<154x128xf32>
    %186 = arith.negf %185 : vector<154x128xf32>
    %187 = math.exp %186 : vector<154x128xf32>
    %cst_169 = arith.constant 1.000000e+00 : f32
    %188 = vector.broadcast %cst_169 : f32 to vector<154x128xf32>
    %189 = arith.addf %188, %187 : vector<154x128xf32>
    %190 = arith.divf %188, %189 : vector<154x128xf32>
    %c0_170 = arith.constant 0 : index
    %c0_171 = arith.constant 0 : index
    %c0_172 = arith.constant 0 : index
    %191 = vector.load %arg9[%c0_170, %c0_171, %c0_172] : memref<1x154x128xf32, #tpu.memory_space<vmem>>, vector<1x154x128xf32>
    %192 = vector.shape_cast %191 : vector<1x154x128xf32> to vector<154x128xf32>
    %193 = vector.shape_cast %190 : vector<154x128xf32> to vector<1x154x128xf32>
    tpu.vector_store %arg9[%c0_170, %c0_171, %c0_172], %193 {strides = array<i32>} : memref<1x154x128xf32, #tpu.memory_space<vmem>>, vector<1x154x128xf32>,
    return
  }
  func.func @transform_0(%arg0: i32) -> (i32, i32, i32) {
    %c0_i32 = arith.constant 0 : i32
    %c0_i32_0 = arith.constant 0 : i32
    %c0_i32_1 = arith.constant 0 : i32
    return %arg0, %c0_i32, %c0_i32_0 : i32, i32, i32
  }
  func.func @transform_1(%arg0: i32) -> (i32, i32, i32) {
    %c0_i32 = arith.constant 0 : i32
    %c0_i32_0 = arith.constant 0 : i32
    %c0_i32_1 = arith.constant 0 : i32
    %c0_i32_2 = arith.constant 0 : i32
    return %c0_i32, %c0_i32_0, %c0_i32_1 : i32, i32, i32
  }
  func.func @transform_2(%arg0: i32) -> (i32, i32, i32) {
    %c0_i32 = arith.constant 0 : i32
    %c0_i32_0 = arith.constant 0 : i32
    %c0_i32_1 = arith.constant 0 : i32
    %c0_i32_2 = arith.constant 0 : i32
    return %c0_i32, %c0_i32_0, %c0_i32_1 : i32, i32, i32
  }
  func.func @transform_3(%arg0: i32) -> (i32, i32, i32) {
    %c0_i32 = arith.constant 0 : i32
    %c0_i32_0 = arith.constant 0 : i32
    %c0_i32_1 = arith.constant 0 : i32
    %c0_i32_2 = arith.constant 0 : i32
    return %c0_i32, %c0_i32_0, %c0_i32_1 : i32, i32, i32
  }
  func.func @transform_4(%arg0: i32) -> (i32, i32) {
    %c0_i32 = arith.constant 0 : i32
    %c0_i32_0 = arith.constant 0 : i32
    %c0_i32_1 = arith.constant 0 : i32
    return %c0_i32, %c0_i32_0 : i32, i32
  }
  func.func @transform_5(%arg0: i32) -> (i32, i32) {
    %c0_i32 = arith.constant 0 : i32
    %c0_i32_0 = arith.constant 0 : i32
    %c0_i32_1 = arith.constant 0 : i32
    return %c0_i32, %c0_i32_0 : i32, i32
  }
  func.func @transform_6(%arg0: i32) -> (i32, i32) {
    %c0_i32 = arith.constant 0 : i32
    %c0_i32_0 = arith.constant 0 : i32
    %c0_i32_1 = arith.constant 0 : i32
    return %c0_i32, %c0_i32_0 : i32, i32
  }
  func.func @transform_7(%arg0: i32) -> (i32, i32) {
    %c0_i32 = arith.constant 0 : i32
    %c0_i32_0 = arith.constant 0 : i32
    %c0_i32_1 = arith.constant 0 : i32
    return %c0_i32, %c0_i32_0 : i32, i32
  }
  func.func @transform_8(%arg0: i32) -> (i32, i32, i32) {
    %c0_i32 = arith.constant 0 : i32
    %c0_i32_0 = arith.constant 0 : i32
    %c0_i32_1 = arith.constant 0 : i32
    return %arg0, %c0_i32, %c0_i32_0 : i32, i32, i32
  }
}

</mosaic_0001>

<bundles_post_ra>
// kernel: pen_forward.2
= control target key start
LH: loop header
LB: loop body
LE: loop exit
PB: predicated region body
PF: predicated region fallthrough
CT: control target
= control target key end

     0   :  { %9 = vsyncpa [#allocation3], 0  ;;  %s3461_s0 = inlined_call_operand.hbm [shape: f32[512,1024], index: 0, kind: input, shape index: {}]   ;;  %s3462_s1 = inlined_call_operand.vmem [shape: bf16[1024,128], index: 1, kind: input, shape index: {}]   ;;  %s3463_s2 = inlined_call_operand.vmem [shape: f32[1,128], index: 2, kind: input, shape index: {}]   ;;  %s3464_s3 = inlined_call_operand.vmem [shape: f32[1,128], index: 3, kind: input, shape index: {}]   ;;  %s3465_s4 = inlined_call_operand.vmem [shape: f32[512,128], index: 4, kind: output, shape index: {}]  }
   0x1   :  { %11 = vsyncpa [#allocation3 + $0x1], 0  ;;  %s2700_s15 = smov 0   ;;  %s2702_s16 = smov 0  }
   0x2   :  { %s2704_s17 = smov 0   ;;  %s2706_s18 = smov 0  }
   0x3 LB: > { %s1971_s19 = sadd.s32 4294967295, %s2670_s18   ;;  %s2720_s20 = sadd.s32 1, %s2670_s18   ;;  %s2670_s18 = sphi %s2706_s18, %s3472_s18   ;;  %s2666_s17 = sphi %s2704_s17, %s3471_s17   ;;  %s2662_s16 = sphi %s2702_s16, %s3470_s16   ;;  %s2658_s15 = sphi %s2700_s15, %s3469_s15  }
   0x4   : > { %s21_s21 = ssub.s32 %s2670_s18, %s2720_s20  ;;  %s24_s22 = sadd.s32 1, %s2666_s17 }
   0x5   : > { %p22_p0 = scmp.eq.s32.totalorder %s21_s21, 0  ;;  %p31_p1 = scmp.ne.s32.totalorder %s2666_s17, %s2662_s16 }
   0x6   : > { %p32_p2 = scmp.eq.s32.totalorder %s2670_s18, 0  ;;  %p37_p3 = scmp.ne.s32.totalorder %s2662_s16, %s2658_s15 }
   0x7   : > { %s2730_s23 = scalar_select %p22_p0, %s2666_s17, %s24_s22  }
   0x8   : > { %p33_p4 = por %p32_p2, %p31_p1  ;;  %p38_p5 = scmp.eq.s32.totalorder %s1971_s19, 0 }
   0x9   : > { %p2507_p6 = scmp.lt.s32.totalorder %s2670_s18, 2  ;;  %s159_s25 = sand.u32 1, %s2666_s17  }
   0xa   : > { %p2735_p7 = por %p38_p5, %p37_p3  ;;  %s1975_s26 = sshll.u32 %s159_s25, 11 }
   0xb   : > { %s2052_s27 = sshll.u32 %s2670_s18, 15  ;;  %s163_s5 = scalar_lea.vmem [#allocation2], %s1975_s26 }
   0xc   : > { %s2744_s30 = scalar_lea.hbm %s3461_s0, %s2052_s27  ;;  %s171_s6 = sshll.u32 %s163_s5, 4  ;;  %s2746_s6 = int_to_ptr.vmem [resolvable:$true] %s171_s6 }
   0xd   : > { %p2748_p8 = pnand %p2507_p6, %p33_p4  ;;  %s2753_s8 = scalar_lea.sflag [#allocation3], %s159_s25 }
   0xe   : > { %s2606_s9 = scalar_lea.hbm %s2744_s30, 32768  ;;  %s2611_s12 = scalar_lea.hbm %s3461_s0, 65536 }
   0xf   : > { %p2607_p10 = scmp.ne.s32.totalorder %s2744_s30, %s2606_s9  ;;  %p2608_p11 = pneg %p2748_p8 }
  0x10   : > { %p2612_p0 = scmp.lt.u32.totalorder %s2744_s30, %s3461_s0  ;;  %p2613_p1 = scmp.lt.u32.totalorder %s2611_s12, %s2606_s9 }
  0x11   : > { %p2609_p12 = pnand %p2608_p11, %p2607_p10  ;;  %p2615_p3 = scmp.lt.u32.totalorder %s2606_s9, %s2744_s30 }
  0x12   : > { %p2614_p2 = por %p2613_p1, %p2612_p0 }
  0x13   : > { %p2610_p13 = pneg %p2609_p12 }
  0x14   : > { %p2616_p4 = por %p2615_p3, %p2614_p2 }
  0x16   : > { %p2617_p5 = pnand %p2616_p4, %p2610_p13 }
  0x18   : > { %2620 = shalt.err (!%p2617_p5)
}
  0x19   : > { %s2621_s15 = scalar_lea.vmem %s2746_s6, 32768  ;;  %s2672_s21 = smov [#allocation2]  }
  0x1a   : > { %p2622_p6 = scmp.ne.s32.totalorder %s2746_s6, %s2621_s15  ;;  %s2626_s22 = sshll.u32 %s2672_s21, 4  ;;  %s2627_s22 = int_to_ptr.vmem [resolvable:$false] %s2626_s22 }
  0x1b   : > { %s2628_s25 = scalar_lea.vmem %s2627_s22, 65536  ;;  %p2629_p9 = scmp.lt.s32.totalorder %s2746_s6, %s2627_s22 }
  0x1c   : > { %p2624_p10 = pnand %p2622_p6, %p2608_p11  ;;  %p2630_p0 = scmp.lt.s32.totalorder %s2628_s25, %s2621_s15 }
  0x1e   : > { %p2625_p12 = pneg %p2624_p10  ;;  %p2631_p1 = por %p2630_p0, %p2629_p9 }
  0x20   : > { %p2632_p2 = pnand %p2631_p1, %p2625_p12 }
  0x22   : > { %2635 = shalt.err (!%p2632_p2)
}
  0x23   : > { %s2673_s26 = smov 1024   ;;  %s2674_s27 = smov 64  }
  0x24   : > { %2506 = dma.hbm_to_vmem [thread:$0]  (!%p2748_p8), %s2744_s30, 32768, %s2746_s6, %s2753_s8, %s2673_s26, %s2673_s26, %s2674_s27  }
  0x25   : > { %p179_p11 = scmp.lt.s32.totalorder %s2670_s18, 3  ;;  %p3468_p13 = scmp.ge.s32.totalorder %s2670_s18, 1 }
  0x27   : > { %p180_p3 = pnand %p3468_p13, %p179_p11 }
  0x28   : > { %s185_s28 = sand.u32 (!%p180_p3), 1, %s2662_s16  }
  0x29   : > { %183 = sbr.rel (%p180_p3) target bundleno = 559 (0x22f), region = 36  ;;  %s1980_s29 = sshll.u32 (!%p180_p3), %s185_s28, 11 }
  0x2a   : > { %s186_s5 = scalar_lea.sflag (!%p180_p3), [#allocation3], %s185_s28  ;;  %s2785_s9 = scalar_lea.vmem (!%p180_p3), [#allocation2], %s1980_s29 }
  0x30   : > { %2653 = dma.done.wait (%p2735_p7), %s186_s5, 32768  }
  0x31   : > { %2655 = vsyncadd (%p2735_p7), %s186_s5, 4294934528  ;;  %v2542_v0 = vld [vmem:[%s3462_s1 + $0x40] sm:$0xff]   ;;  %v2546_v4 = vld [vmem:[%s3462_s1 + $0x48] sm:$0xff]  }
  0x32   : > { %v2543_v1 = vld [vmem:[%s3462_s1 + $0xc0] sm:$0xff]   ;;  %2053 = vmatprep.subr.bf16.mxu0 %v2542_v0  ;;  %v2547_v5 = vld [vmem:[%s3462_s1 + $0xc8] sm:$0xff]   ;;  %v2550_v8 = vld [vmem:[%s3462_s1 + $0x50] sm:$0xff]  }
  0x33   : > { %v2544_v2 = vld [vmem:[%s3462_s1] sm:$0xff]   ;;  %2165 = vmatprep.subr.bf16.mxu1 %v2543_v1  ;;  %v2548_v6 = vld [vmem:[%s3462_s1 + $0x8] sm:$0xff]   ;;  %v2551_v9 = vld [vmem:[%s3462_s1 + $0xd0] sm:$0xff]  }
  0x34   : > { %v2545_v3 = vld [vmem:[%s3462_s1 + $0x80] sm:$0xff]   ;;  %2054 = vmatpush3.bf16.msra.mxu0 %v2544_v2  ;;  %v2549_v7 = vld [vmem:[%s3462_s1 + $0x88] sm:$0xff]   ;;  %v2552_v10 = vld [vmem:[%s3462_s1 + $0x10] sm:$0xff]  }
  0x35   : > { %2166 = vmatpush3.bf16.msra.mxu1 %v2545_v3  ;;  %2055 = vmatprep.subr.bf16.mxu0 %v2546_v4  ;;  %v2553_v11 = vld [vmem:[%s3462_s1 + $0x90] sm:$0xff]   ;;  %v2554_v12 = vld [vmem:[%s3462_s1 + $0x58] sm:$0xff]   ;;  %v2558_v16 = vld [vmem:[%s3462_s1 + $0x60] sm:$0xff]  }
  0x36   : > { %2167 = vmatprep.subr.bf16.mxu1 %v2547_v5  ;;  %v2555_v13 = vld [vmem:[%s3462_s1 + $0xd8] sm:$0xff]   ;;  %v2559_v17 = vld [vmem:[%s3462_s1 + $0xe0] sm:$0xff]   ;;  %v2562_v20 = vld [vmem:[%s3462_s1 + $0x68] sm:$0xff]  }
  0x37   : > { %v2556_v14 = vld [vmem:[%s3462_s1 + $0x18] sm:$0xff]   ;;  %v2560_v18 = vld [vmem:[%s3462_s1 + $0x20] sm:$0xff]   ;;  %v2563_v21 = vld [vmem:[%s3462_s1 + $0xe8] sm:$0xff]  }
  0x38   : > { %2056 = vmatpush3.bf16.msra.mxu0 %v2548_v6  ;;  %v2557_v15 = vld [vmem:[%s3462_s1 + $0x98] sm:$0xff]   ;;  %v2561_v19 = vld [vmem:[%s3462_s1 + $0xa0] sm:$0xff]   ;;  %v2564_v22 = vld [vmem:[%s3462_s1 + $0x28] sm:$0xff]  }
  0x39   : > { %2168 = vmatpush3.bf16.msra.mxu1 %v2549_v7  ;;  %2057 = vmatprep.subr.bf16.mxu0 %v2550_v8  ;;  %v2565_v23 = vld [vmem:[%s3462_s1 + $0xa8] sm:$0xff]   ;;  %v2566_v24 = vld [vmem:[%s3462_s1 + $0x70] sm:$0xff]   ;;  %v2570_v28 = vld [vmem:[%s3462_s1 + $0x78] sm:$0xff]  }
  0x3a   : > { %2169 = vmatprep.subr.bf16.mxu1 %v2551_v9  ;;  %v2567_v25 = vld [vmem:[%s3462_s1 + $0xf0] sm:$0xff]   ;;  %v2571_v29 = vld [vmem:[%s3462_s1 + $0xf8] sm:$0xff]   ;;  %v223_v32 = vld [vmem:[%s2785_s9 + $0x8] sm:$0xff] }
  0x3b   : > { %v2568_v26 = vld [vmem:[%s3462_s1 + $0x30] sm:$0xff]   ;;  %v2572_v30 = vld [vmem:[%s3462_s1 + $0x38] sm:$0xff]   ;;  %v231_v33 = vld [vmem:[%s2785_s9 + $0x48] sm:$0xff] }
  0x3c   : > { %2058 = vmatpush3.bf16.msra.mxu0 %v2552_v10  ;;  %v2569_v27 = vld [vmem:[%s3462_s1 + $0xb0] sm:$0xff]   ;;  %v2573_v31 = vld [vmem:[%s3462_s1 + $0xb8] sm:$0xff]   ;;  %v479_v35 = vpack.c.bf16 %v231_v33, %v223_v32  ;;  %v222_v37 = vld [vmem:[%s2785_s9] sm:$0xff] }
  0x3d   : > { %2170 = vmatpush3.bf16.msra.mxu1 %v2553_v11  ;;  %2059 = vmatprep.subr.bf16.mxu0 %v2554_v12  ;;  %v225_v34 = vld [vmem:[%s2785_s9 + $0x18] sm:$0xff]  ;;  %v230_v38 = vld [vmem:[%s2785_s9 + $0x40] sm:$0xff]  ;;  %v224_v41 = vld [vmem:[%s2785_s9 + $0x10] sm:$0xff] }
  0x3e   : > { %2171 = vmatprep.subr.bf16.mxu1 %v2555_v13  ;;  %v233_v36 = vld [vmem:[%s2785_s9 + $0x58] sm:$0xff]  ;;  %v478_v40 = vpack.c.bf16 %v230_v38, %v222_v37  ;;  %v232_v42 = vld [vmem:[%s2785_s9 + $0x50] sm:$0xff]  ;;  %1150 = vmatprep.mubr.bf16.mxu0 %v479_v35  ;;  %v2574_v44 = vld [vmem:[%s3462_s1 + $0x140] sm:$0xff]  }
  0x3f   : > { %v481_v39 = vpack.c.bf16 %v233_v36, %v225_v34  ;;  %v480_v43 = vpack.c.bf16 %v232_v42, %v224_v41  ;;  %v2575_v45 = vld [vmem:[%s3462_s1 + $0x100] sm:$0xff]   ;;  %v239_v48 = vld [vmem:[%s2785_s9 + $0x88] sm:$0xff]  ;;  %v241_v50 = vld [vmem:[%s2785_s9 + $0x98] sm:$0xff] }
  0x40   : > { %2060 = vmatpush3.bf16.msra.mxu0 %v2556_v14  ;;  %v2576_v46 = vld [vmem:[%s3462_s1 + $0x1c0] sm:$0xff]   ;;  %v247_v49 = vld [vmem:[%s2785_s9 + $0xc8] sm:$0xff]  ;;  %v249_v51 = vld [vmem:[%s2785_s9 + $0xd8] sm:$0xff] }
  0x41   : > { %2172 = vmatpush3.bf16.msra.mxu1 %v2557_v15  ;;  %2061 = vmatprep.subr.bf16.mxu0 %v2558_v16  ;;  %v2577_v47 = vld [vmem:[%s3462_s1 + $0x180] sm:$0xff]   ;;  %v487_v52 = vpack.c.bf16 %v247_v49, %v239_v48  ;;  %v489_v53 = vpack.c.bf16 %v249_v51, %v241_v50  ;;  %v240_v56 = vld [vmem:[%s2785_s9 + $0x90] sm:$0xff]  ;;  %v255_v59 = vld [vmem:[%s2785_s9 + $0x108] sm:$0xff] }
  0x42   : > { %2173 = vmatprep.subr.bf16.mxu1 %v2559_v17  ;;  %1311 = vmatprep.mubr.bf16.mxu1 %v481_v39  ;;  %v238_v54 = vld [vmem:[%s2785_s9 + $0x80] sm:$0xff]  ;;  %v248_v58 = vld [vmem:[%s2785_s9 + $0xd0] sm:$0xff]  ;;  %v263_v60 = vld [vmem:[%s2785_s9 + $0x148] sm:$0xff] }
  0x43   : > { %v246_v55 = vld [vmem:[%s2785_s9 + $0xc0] sm:$0xff]  ;;  %v488_v61 = vpack.c.bf16 %v248_v58, %v240_v56  ;;  %v495_v62 = vpack.c.bf16 %v263_v60, %v255_v59  ;;  %v257_v63 = vld [vmem:[%s2785_s9 + $0x118] sm:$0xff]  ;;  %v256_v4 = vld [vmem:[%s2785_s9 + $0x110] sm:$0xff] }
  0x44   : > { %2062 = vmatpush3.bf16.msra.mxu0 %v2560_v18  ;;  %v486_v57 = vpack.c.bf16 %v246_v55, %v238_v54  ;;  %v265_v0 = vld [vmem:[%s2785_s9 + $0x158] sm:$0xff]  ;;  %v254_v2 = vld [vmem:[%s2785_s9 + $0x100] sm:$0xff]  ;;  %v264_v5 = vld [vmem:[%s2785_s9 + $0x150] sm:$0xff] }
  0x45   : > { %2174 = vmatpush3.bf16.msra.mxu1 %v2561_v19  ;;  %2063 = vmatprep.subr.bf16.mxu0 %v2562_v20  ;;  %v497_v1 = vpack.c.bf16 %v265_v0, %v257_v63  ;;  %v262_v3 = vld [vmem:[%s2785_s9 + $0x140] sm:$0xff]  ;;  %v2578_v6 = vld [vmem:[%s3462_s1 + $0x148] sm:$0xff]   ;;  %v273_v13 = vld [vmem:[%s2785_s9 + $0x198] sm:$0xff]  ;;  %v496_v14 = vpack.c.bf16 %v264_v5, %v256_v4 }
  0x46   : > { %2175 = vmatprep.subr.bf16.mxu1 %v2563_v21  ;;  %v2579_v7 = vld [vmem:[%s3462_s1 + $0x108] sm:$0xff]   ;;  %v494_v10 = vpack.c.bf16 %v262_v3, %v254_v2  ;;  %v281_v16 = vld [vmem:[%s2785_s9 + $0x1d8] sm:$0xff]  ;;  %v270_v18 = vld [vmem:[%s2785_s9 + $0x180] sm:$0xff] }
  0x47   : > { %v2580_v8 = vld [vmem:[%s3462_s1 + $0x1c8] sm:$0xff]   ;;  %v505_v17 = vpack.c.bf16 %v281_v16, %v273_v13  ;;  %v278_v19 = vld [vmem:[%s2785_s9 + $0x1c0] sm:$0xff]  ;;  %v272_v20 = vld [vmem:[%s2785_s9 + $0x190] sm:$0xff] }
  0x48   : > { %2064 = vmatpush3.bf16.msra.mxu0 %v2564_v22  ;;  %v2581_v9 = vld [vmem:[%s3462_s1 + $0x188] sm:$0xff]   ;;  %v280_v21 = vld [vmem:[%s2785_s9 + $0x1d0] sm:$0xff]  ;;  %v286_v34 = vld [vmem:[%s2785_s9 + $0x200] sm:$0xff] }
  0x49   : > { %2176 = vmatpush3.bf16.msra.mxu1 %v2565_v23  ;;  %2065 = vmatprep.subr.bf16.mxu0 %v2566_v24  ;;  %v271_v11 = vld [vmem:[%s2785_s9 + $0x188] sm:$0xff]  ;;  %v289_v24 = vld [vmem:[%s2785_s9 + $0x218] sm:$0xff]  ;;  %v2585_v32 = vld [vmem:[%s3462_s1 + $0x190] sm:$0xff]  }
  0x4a   : > { %2177 = vmatprep.subr.bf16.mxu1 %v2567_v25  ;;  %v279_v12 = vld [vmem:[%s2785_s9 + $0x1c8] sm:$0xff]  ;;  %v297_v25 = vld [vmem:[%s2785_s9 + $0x258] sm:$0xff]  ;;  %v294_v35 = vld [vmem:[%s2785_s9 + $0x240] sm:$0xff] }
  0x4b   : > { %v503_v15 = vpack.c.bf16 %v279_v12, %v271_v11  ;;  %v287_v22 = vld [vmem:[%s2785_s9 + $0x208] sm:$0xff]  ;;  %v513_v33 = vpack.c.bf16 %v297_v25, %v289_v24  ;;  %v288_v36 = vld [vmem:[%s2785_s9 + $0x210] sm:$0xff]  ;;  %v313_v41 = vld [vmem:[%s2785_s9 + $0x2d8] sm:$0xff] }
  0x4c   : > { %2066 = vmatpush3.bf16.msra.mxu0 %v2568_v26  ;;  %v295_v23 = vld [vmem:[%s2785_s9 + $0x248] sm:$0xff]  ;;  %v2582_v26 = vld [vmem:[%s3462_s1 + $0x150] sm:$0xff]   ;;  %v2586_v42 = vld [vmem:[%s3462_s1 + $0x158] sm:$0xff]  }
  0x4d   : > { %2178 = vmatpush3.bf16.msra.mxu1 %v2569_v27  ;;  %2067 = vmatprep.subr.bf16.mxu0 %v2570_v28  ;;  %v2583_v27 = vld [vmem:[%s3462_s1 + $0x110] sm:$0xff]   ;;  %v502_v28 = vpack.c.bf16 %v278_v19, %v270_v18  ;;  %v303_v38 = vld [vmem:[%s2785_s9 + $0x288] sm:$0xff]  ;;  %v2589_v49 = vld [vmem:[%s3462_s1 + $0x198] sm:$0xff]  }
  0x4e   : > { %2179 = vmatprep.subr.bf16.mxu1 %v2571_v29  ;;  %v2584_v29 = vld [vmem:[%s3462_s1 + $0x1d0] sm:$0xff]   ;;  %v311_v39 = vld [vmem:[%s2785_s9 + $0x2c8] sm:$0xff]  ;;  %v302_v50 = vld [vmem:[%s2785_s9 + $0x280] sm:$0xff] }
  0x4f   : > { %v296_v37 = vld [vmem:[%s2785_s9 + $0x250] sm:$0xff]  ;;  %v310_v51 = vld [vmem:[%s2785_s9 + $0x2c0] sm:$0xff]  ;;  %v319_v54 = vld [vmem:[%s2785_s9 + $0x308] sm:$0xff] }
  0x50   : > { %2068 = vmatpush3.bf16.msra.mxu0 %v2572_v30  ;;  %v504_v30 = vpack.c.bf16 %v280_v21, %v272_v20  ;;  %v327_v55 = vld [vmem:[%s2785_s9 + $0x348] sm:$0xff]  ;;  %v321_v56 = vld [vmem:[%s2785_s9 + $0x318] sm:$0xff]  ;;  %v518_v58 = vpack.c.bf16 %v310_v51, %v302_v50  ;;  %v2590_v59 = vld [vmem:[%s3462_s1 + $0x160] sm:$0xff]  }
  0x51   : > { %2180 = vmatpush3.bf16.msra.mxu1 %v2573_v31  ;;  %2277 = vmatprep.subr.bf16.mxu0 %v2574_v44  ;;  %v511_v31 = vpack.c.bf16 %v295_v23, %v287_v22  ;;  %v2587_v44 = vld [vmem:[%s3462_s1 + $0x118] sm:$0xff]   ;;  %v2592_v0 = vld [vmem:[%s3462_s1 + $0x1e0] sm:$0xff]   ;;  %v320_v4 = vld [vmem:[%s2785_s9 + $0x310] sm:$0xff] }
  0x52   : > { %2389 = vmatprep.subr.bf16.mxu1 %v2576_v46  ;;  %v519_v46 = vpack.c.bf16 %v311_v39, %v303_v38  ;;  %v318_v2 = vld [vmem:[%s2785_s9 + $0x300] sm:$0xff]  ;;  %v328_v5 = vld [vmem:[%s2785_s9 + $0x350] sm:$0xff]  ;;  %v2595_v16 = vld [vmem:[%s3462_s1 + $0x128] sm:$0xff]  }
  0x53   : > { %1151 = vmatmul.mubr.bf16.vlgmr.msra.gmra.mrb[0].mxu0 %v478_v40  ;;  %v305_v40 = vld [vmem:[%s2785_s9 + $0x298] sm:$0xff]  ;;  %v326_v3 = vld [vmem:[%s2785_s9 + $0x340] sm:$0xff]  ;;  %v528_v11 = vpack.c.bf16 %v328_v5, %v320_v4  ;;  %v336_v19 = vld [vmem:[%s2785_s9 + $0x390] sm:$0xff] }
  0x54   : > { %1312 = vmatmul.mubr.bf16.vlgmr.msra.gmra.mrb[0].mxu1 %v480_v43  ;;  %2278 = vmatpush3.bf16.msra.mxu0 %v2575_v45  ;;  %v510_v43 = vpack.c.bf16 %v294_v35, %v286_v34  ;;  %v512_v45 = vpack.c.bf16 %v296_v37, %v288_v36  ;;  %v521_v48 = vpack.c.bf16 %v313_v41, %v305_v40  ;;  %v342_v18 = vld [vmem:[%s2785_s9 + $0x3c0] sm:$0xff]  ;;  %v2597_v20 = vld [vmem:[%s3462_s1 + $0x1a8] sm:$0xff]   ;;  %v344_v21 = vld [vmem:[%s2785_s9 + $0x3d0] sm:$0xff] }
  0x55   : > { %2390 = vmatpush3.bf16.msra.mxu1 %v2577_v47  ;;  %1158 = vmatprep.mubr.bf16.mxu0 %v487_v52  ;;  %v2588_v47 = vld [vmem:[%s3462_s1 + $0x1d8] sm:$0xff]   ;;  %v304_v52 = vld [vmem:[%s2785_s9 + $0x290] sm:$0xff]  ;;  %v351_v22 = vld [vmem:[%s2785_s9 + $0x408] sm:$0xff] }
  0x56   : > { %1319 = vmatprep.mubr.bf16.mxu1 %v489_v53  ;;  %2279 = vmatprep.subr.bf16.mxu0 %v2578_v6  ;;  %v312_v53 = vld [vmem:[%s2785_s9 + $0x2d0] sm:$0xff]  ;;  %v335_v6 = vld [vmem:[%s2785_s9 + $0x388] sm:$0xff]  ;;  %v353_v24 = vld [vmem:[%s2785_s9 + $0x418] sm:$0xff] }
  0x57   : > { %2391 = vmatprep.subr.bf16.mxu1 %v2580_v8  ;;  %v520_v60 = vpack.c.bf16 %v312_v53, %v304_v52  ;;  %v337_v8 = vld [vmem:[%s2785_s9 + $0x398] sm:$0xff]  ;;  %v359_v23 = vld [vmem:[%s2785_s9 + $0x448] sm:$0xff]  ;;  %v360_v34 = vld [vmem:[%s2785_s9 + $0x450] sm:$0xff] }
  0x58   : > { %2280 = vmatpush3.bf16.msra.mxu0 %v2579_v7  ;;  %v343_v7 = vld [vmem:[%s2785_s9 + $0x3c8] sm:$0xff]  ;;  %v361_v25 = vld [vmem:[%s2785_s9 + $0x458] sm:$0xff]  ;;  %v2599_v36 = vld [vmem:[%s3462_s1 + $0x130] sm:$0xff]  }
  0x59   : > { %2392 = vmatpush3.bf16.msra.mxu1 %v2581_v9  ;;  %2281 = vmatprep.subr.bf16.mxu0 %v2582_v26  ;;  %v345_v9 = vld [vmem:[%s2785_s9 + $0x3d8] sm:$0xff]  ;;  %v535_v12 = vpack.c.bf16 %v343_v7, %v335_v6  ;;  %v367_v35 = vld [vmem:[%s2785_s9 + $0x488] sm:$0xff]  ;;  %v2600_v37 = vld [vmem:[%s3462_s1 + $0x1f0] sm:$0xff]  }
  0x5a   : > { %2393 = vmatprep.subr.bf16.mxu1 %v2584_v29  ;;  %v537_v13 = vpack.c.bf16 %v345_v9, %v337_v8  ;;  %v545_v29 = vpack.c.bf16 %v361_v25, %v353_v24  ;;  %v375_v38 = vld [vmem:[%s2785_s9 + $0x4c8] sm:$0xff]  ;;  %v2601_v39 = vld [vmem:[%s3462_s1 + $0x1b0] sm:$0xff]   ;;  %v369_v40 = vld [vmem:[%s2785_s9 + $0x498] sm:$0xff] }
  0x5b   : > { %1159 = vmatmul.mubr.bf16.gmra.mrb[4].mxu0 %v486_v57  ;;  %v329_v57 = vld [vmem:[%s2785_s9 + $0x358] sm:$0xff]  ;;  %v383_v50 = vld [vmem:[%s2785_s9 + $0x508] sm:$0xff]  ;;  %v416_v24 = vld [vmem:[%s2785_s9 + $0x610] sm:$0xff] }
  0x5c   : > { %1320 = vmatmul.mubr.bf16.gmra.mrb[4].mxu1 %v488_v61  ;;  %1166 = vmatprep.mubr.bf16.mxu0 %v495_v62  ;;  %v527_v61 = vpack.c.bf16 %v327_v55, %v319_v54  ;;  %v2591_v62 = vld [vmem:[%s3462_s1 + $0x120] sm:$0xff]   ;;  %v529_v63 = vpack.c.bf16 %v329_v57, %v321_v56  ;;  %v377_v41 = vld [vmem:[%s2785_s9 + $0x4d8] sm:$0xff]  ;;  %v391_v51 = vld [vmem:[%s2785_s9 + $0x548] sm:$0xff] }
  0x5d   : > { %1327 = vmatprep.mubr.bf16.mxu1 %v497_v1  ;;  %2282 = vmatpush3.bf16.msra.mxu0 %v2583_v27  ;;  %v2593_v1 = vld [vmem:[%s3462_s1 + $0x1a0] sm:$0xff]   ;;  %v536_v27 = vpack.c.bf16 %v344_v21, %v336_v19  ;;  %v2602_v52 = vld [vmem:[%s3462_s1 + $0x178] sm:$0xff]   ;;  %v424_v25 = vld [vmem:[%s2785_s9 + $0x650] sm:$0xff] }
  0x5e   : > { %2394 = vmatpush3.bf16.msra.mxu1 %v2585_v32  ;;  %2283 = vmatprep.subr.bf16.mxu0 %v2586_v42  ;;  %v2598_v32 = vld [vmem:[%s3462_s1 + $0x170] sm:$0xff]   ;;  %v385_v53 = vld [vmem:[%s2785_s9 + $0x518] sm:$0xff] }
  0x5f   : > { %2395 = vmatprep.subr.bf16.mxu1 %v2588_v47  ;;  %v374_v47 = vld [vmem:[%s2785_s9 + $0x4c0] sm:$0xff]  ;;  %v393_v54 = vld [vmem:[%s2785_s9 + $0x558] sm:$0xff] }
  0x60   : > { %v2603_v55 = vld [vmem:[%s3462_s1 + $0x138] sm:$0xff]  }
  0x61   : > { %2284 = vmatpush3.bf16.msra.mxu0 %v2587_v44  ;;  %v551_v44 = vpack.c.bf16 %v375_v38, %v367_v35  ;;  %v2604_v56 = vld [vmem:[%s3462_s1 + $0x1f8] sm:$0xff]   ;;  %v438_v35 = vld [vmem:[%s2785_s9 + $0x6c0] sm:$0xff]  ;;  %v447_v38 = vld [vmem:[%s2785_s9 + $0x708] sm:$0xff] }
  0x62   : > { %2396 = vmatpush3.bf16.msra.mxu1 %v2589_v49  ;;  %2285 = vmatprep.subr.bf16.mxu0 %v2590_v59  ;;  %v376_v49 = vld [vmem:[%s2785_s9 + $0x4d0] sm:$0xff]  ;;  %v2605_v57 = vld [vmem:[%s3462_s1 + $0x1b8] sm:$0xff]  }
  0x63   : > { %1167 = vmatmul.mubr.bf16.gmra.mrb[8].mxu0 %v494_v10  ;;  %2397 = vmatprep.subr.bf16.mxu1 %v2592_v0  ;;  %v526_v10 = vpack.c.bf16 %v326_v3, %v318_v2  ;;  %v384_v0 = vld [vmem:[%s2785_s9 + $0x510] sm:$0xff]  ;;  %v399_v2 = vld [vmem:[%s2785_s9 + $0x588] sm:$0xff]  ;;  %v401_v4 = vld [vmem:[%s2785_s9 + $0x598] sm:$0xff] }
  0x64   : > { %1328 = vmatmul.mubr.bf16.gmra.mrb[8].mxu1 %v496_v14  ;;  %1174 = vmatprep.mubr.bf16.mxu0 %v503_v15  ;;  %v2594_v14 = vld [vmem:[%s3462_s1 + $0x168] sm:$0xff]   ;;  %v334_v15 = vld [vmem:[%s2785_s9 + $0x380] sm:$0xff]  ;;  %v409_v5 = vld [vmem:[%s2785_s9 + $0x5d8] sm:$0xff] }
  0x65   : > { %1335 = vmatprep.mubr.bf16.mxu1 %v505_v17  ;;  %2286 = vmatpush3.bf16.msra.mxu0 %v2591_v62  ;;  %v2596_v17 = vld [vmem:[%s3462_s1 + $0x1e8] sm:$0xff]   ;;  %v534_v26 = vpack.c.bf16 %v342_v18, %v334_v15  ;;  %v382_v62 = vld [vmem:[%s2785_s9 + $0x500] sm:$0xff]  ;;  %v569_v9 = vpack.c.bf16 %v409_v5, %v401_v4 }
  0x66   : > { %2398 = vmatpush3.bf16.msra.mxu1 %v2593_v1  ;;  %2287 = vmatprep.subr.bf16.mxu0 %v2594_v14  ;;  %v392_v1 = vld [vmem:[%s2785_s9 + $0x550] sm:$0xff]  ;;  %v407_v3 = vld [vmem:[%s2785_s9 + $0x5c8] sm:$0xff] }
  0x67   : > { %2399 = vmatprep.subr.bf16.mxu1 %v2596_v17  ;;  %v560_v7 = vpack.c.bf16 %v392_v1, %v384_v0  ;;  %v567_v8 = vpack.c.bf16 %v407_v3, %v399_v2  ;;  %v415_v14 = vld [vmem:[%s2785_s9 + $0x608] sm:$0xff]  ;;  %v425_v17 = vld [vmem:[%s2785_s9 + $0x658] sm:$0xff] }
  0x68   : > { %v423_v15 = vld [vmem:[%s2785_s9 + $0x648] sm:$0xff]  ;;  %v229_v0 = vld [vmem:[%s2785_s9 + $0x38] sm:$0xff] }
  0x69   : > { %2288 = vmatpush3.bf16.msra.mxu0 %v2595_v16  ;;  %v417_v16 = vld [vmem:[%s2785_s9 + $0x618] sm:$0xff] }
  0x6a   : > { %2400 = vmatpush3.bf16.msra.mxu1 %v2597_v20  ;;  %2289 = vmatprep.subr.bf16.mxu0 %v2598_v32  ;;  %v575_v20 = vpack.c.bf16 %v423_v15, %v415_v14  ;;  %v577_v21 = vpack.c.bf16 %v425_v17, %v417_v16  ;;  %v237_v1 = vld [vmem:[%s2785_s9 + $0x78] sm:$0xff] }
  0x6b   : > { %1175 = vmatmul.mubr.bf16.gmra.mrb[12].mxu0 %v502_v28  ;;  %v543_v28 = vpack.c.bf16 %v359_v23, %v351_v22  ;;  %2401 = vmatprep.subr.bf16.mxu1 %v2600_v37  ;;  %v414_v22 = vld [vmem:[%s2785_s9 + $0x600] sm:$0xff]  ;;  %v440_v37 = vld [vmem:[%s2785_s9 + $0x6d0] sm:$0xff]  ;;  %v485_v5 = vpack.c.bf16 %v237_v1, %v229_v0 }
  0x6c   : > { %1336 = vmatmul.mubr.bf16.gmra.mrb[12].mxu1 %v504_v30  ;;  %1182 = vmatprep.mubr.bf16.mxu0 %v511_v31  ;;  %v350_v30 = vld [vmem:[%s2785_s9 + $0x400] sm:$0xff] }
  0x6d   : > { %1343 = vmatprep.mubr.bf16.mxu1 %v513_v33  ;;  %v358_v31 = vld [vmem:[%s2785_s9 + $0x440] sm:$0xff]  ;;  %v352_v33 = vld [vmem:[%s2785_s9 + $0x410] sm:$0xff]  ;;  %2290 = vmatpush3.bf16.msra.mxu0 %v2599_v36 }
  0x6e   : > { %v542_v42 = vpack.c.bf16 %v358_v31, %v350_v30  ;;  %2402 = vmatpush3.bf16.msra.mxu1 %v2601_v39  ;;  %2291 = vmatprep.subr.bf16.mxu0 %v2602_v52  ;;  %v422_v23 = vld [vmem:[%s2785_s9 + $0x640] sm:$0xff]  ;;  %v576_v31 = vpack.c.bf16 %v424_v25, %v416_v24  ;;  %v432_v36 = vld [vmem:[%s2785_s9 + $0x690] sm:$0xff]  ;;  %v455_v39 = vld [vmem:[%s2785_s9 + $0x748] sm:$0xff] }
  0x6f   : > { %2403 = vmatprep.subr.bf16.mxu1 %v2604_v56  ;;  %v574_v30 = vpack.c.bf16 %v422_v23, %v414_v22  ;;  %v465_v52 = vld [vmem:[%s2785_s9 + $0x798] sm:$0xff]  ;;  %v259_v22 = vld [vmem:[%s2785_s9 + $0x128] sm:$0xff] }
  0x70   : > { %v267_v23 = vld [vmem:[%s2785_s9 + $0x168] sm:$0xff]  ;;  %v261_v24 = vld [vmem:[%s2785_s9 + $0x138] sm:$0xff] }
  0x71   : > { %2292 = vmatpush3.bf16.msra.mxu0 %v2603_v55  ;;  %v269_v25 = vld [vmem:[%s2785_s9 + $0x178] sm:$0xff] }
  0x72   : > { %2404 = vmatpush3.bf16.msra.mxu1 %v2605_v57 }
  0x73   : > { %1183 = vmatmul.mubr.bf16.gmra.mrb[16].mxu0 %v510_v43  ;;  %v544_v43 = vpack.c.bf16 %v360_v34, %v352_v33  ;;  %v430_v34 = vld [vmem:[%s2785_s9 + $0x680] sm:$0xff] }
  0x74   : > { %1344 = vmatmul.mubr.bf16.gmra.mrb[16].mxu1 %v512_v45  ;;  %1190 = vmatprep.mubr.bf16.mxu0 %v519_v46  ;;  %v553_v45 = vpack.c.bf16 %v377_v41, %v369_v40  ;;  %v366_v46 = vld [vmem:[%s2785_s9 + $0x480] sm:$0xff]  ;;  %v449_v40 = vld [vmem:[%s2785_s9 + $0x718] sm:$0xff] }
  0x75   : > { %1351 = vmatprep.mubr.bf16.mxu1 %v521_v48  ;;  %v368_v48 = vld [vmem:[%s2785_s9 + $0x490] sm:$0xff]  ;;  %v457_v41 = vld [vmem:[%s2785_s9 + $0x758] sm:$0xff] }
  0x76   : > { %v552_v59 = vpack.c.bf16 %v376_v49, %v368_v48  ;;  %v448_v48 = vld [vmem:[%s2785_s9 + $0x710] sm:$0xff] }
  0x77   : > { %v456_v49 = vld [vmem:[%s2785_s9 + $0x750] sm:$0xff] }
  0x78   : > { %v592_v55 = vpack.c.bf16 %v456_v49, %v448_v48  ;;  %v293_v48 = vld [vmem:[%s2785_s9 + $0x238] sm:$0xff] }
  0x79   : > { %v301_v49 = vld [vmem:[%s2785_s9 + $0x278] sm:$0xff] }
  0x7b   : > { %1191 = vmatmul.mubr.bf16.gmra.mrb[20].mxu0 %v518_v58  ;;  %v550_v58 = vpack.c.bf16 %v374_v47, %v366_v46  ;;  %v446_v46 = vld [vmem:[%s2785_s9 + $0x700] sm:$0xff] }
  0x7c   : > { %1352 = vmatmul.mubr.bf16.gmra.mrb[20].mxu1 %v520_v60  ;;  %1198 = vmatprep.mubr.bf16.mxu0 %v527_v61  ;;  %v559_v60 = vpack.c.bf16 %v391_v51, %v383_v50  ;;  %v561_v61 = vpack.c.bf16 %v393_v54, %v385_v53  ;;  %v454_v47 = vld [vmem:[%s2785_s9 + $0x740] sm:$0xff]  ;;  %v463_v50 = vld [vmem:[%s2785_s9 + $0x788] sm:$0xff]  ;;  %v473_v53 = vld [vmem:[%s2785_s9 + $0x7d8] sm:$0xff] }
  0x7d   : > { %1359 = vmatprep.mubr.bf16.mxu1 %v529_v63  ;;  %v390_v63 = vld [vmem:[%s2785_s9 + $0x540] sm:$0xff]  ;;  %v471_v51 = vld [vmem:[%s2785_s9 + $0x7c8] sm:$0xff]  ;;  %v590_v54 = vpack.c.bf16 %v454_v47, %v446_v46  ;;  %v601_v57 = vpack.c.bf16 %v473_v53, %v465_v52  ;;  %v517_v53 = vpack.c.bf16 %v301_v49, %v293_v48 }
  0x7e   : > { %v558_v6 = vpack.c.bf16 %v390_v63, %v382_v62  ;;  %v599_v56 = vpack.c.bf16 %v471_v51, %v463_v50  ;;  %v227_v62 = vld [vmem:[%s2785_s9 + $0x28] sm:$0xff] }
  0x7f   : > { %v235_v63 = vld [vmem:[%s2785_s9 + $0x68] sm:$0xff] }
  0x80   : > { %v483_v4 = vpack.c.bf16 %v235_v63, %v227_v62  ;;  %v291_v46 = vld [vmem:[%s2785_s9 + $0x228] sm:$0xff] }
  0x81   : > { %v299_v47 = vld [vmem:[%s2785_s9 + $0x268] sm:$0xff] }
  0x82   : > { %v515_v52 = vpack.c.bf16 %v299_v47, %v291_v46 }
  0x83   : > { %1199 = vmatmul.mubr.bf16.gmra.mrb[24].mxu0 %v526_v10  ;;  %v398_v10 = vld [vmem:[%s2785_s9 + $0x580] sm:$0xff] }
  0x84   : > { %1360 = vmatmul.mubr.bf16.gmra.mrb[24].mxu1 %v528_v11  ;;  %1206 = vmatprep.mubr.bf16.mxu0 %v535_v12  ;;  %v406_v11 = vld [vmem:[%s2785_s9 + $0x5c0] sm:$0xff]  ;;  %v400_v12 = vld [vmem:[%s2785_s9 + $0x590] sm:$0xff] }
  0x85   : > { %1367 = vmatprep.mubr.bf16.mxu1 %v537_v13  ;;  %v408_v13 = vld [vmem:[%s2785_s9 + $0x5d0] sm:$0xff]  ;;  %v566_v18 = vpack.c.bf16 %v406_v11, %v398_v10  ;;  %v243_v10 = vld [vmem:[%s2785_s9 + $0xa8] sm:$0xff] }
  0x86   : > { %v568_v19 = vpack.c.bf16 %v408_v13, %v400_v12  ;;  %v251_v11 = vld [vmem:[%s2785_s9 + $0xe8] sm:$0xff]  ;;  %v245_v12 = vld [vmem:[%s2785_s9 + $0xb8] sm:$0xff] }
  0x87   : > { %v253_v13 = vld [vmem:[%s2785_s9 + $0xf8] sm:$0xff]  ;;  %v491_v16 = vpack.c.bf16 %v251_v11, %v243_v10 }
  0x88   : > { %v493_v17 = vpack.c.bf16 %v253_v13, %v245_v12 }
  0x8b   : > { %1207 = vmatmul.mubr.bf16.gmra.mrb[28].mxu0 %v534_v26  ;;  %v431_v26 = vld [vmem:[%s2785_s9 + $0x688] sm:$0xff] }
  0x8c   : > { %1368 = vmatmul.mubr.bf16.gmra.mrb[28].mxu1 %v536_v27  ;;  %1214 = vmatprep.mubr.bf16.mxu0 %v543_v28  ;;  %v439_v27 = vld [vmem:[%s2785_s9 + $0x6c8] sm:$0xff]  ;;  %v433_v28 = vld [vmem:[%s2785_s9 + $0x698] sm:$0xff] }
  0x8d   : > { %1375 = vmatprep.mubr.bf16.mxu1 %v545_v29  ;;  %v441_v29 = vld [vmem:[%s2785_s9 + $0x6d8] sm:$0xff]  ;;  %v583_v32 = vpack.c.bf16 %v439_v27, %v431_v26 }
  0x8e   : > { %v585_v33 = vpack.c.bf16 %v441_v29, %v433_v28  ;;  %v499_v28 = vpack.c.bf16 %v267_v23, %v259_v22  ;;  %v501_v29 = vpack.c.bf16 %v269_v25, %v261_v24 }
  0x93   : > { %1215 = vmatmul.mubr.bf16.gmra.mrb[32].mxu0 %v542_v42  ;;  %v582_v42 = vpack.c.bf16 %v438_v35, %v430_v34  ;;  %v275_v34 = vld [vmem:[%s2785_s9 + $0x1a8] sm:$0xff] }
  0x94   : > { %1376 = vmatmul.mubr.bf16.gmra.mrb[32].mxu1 %v544_v43  ;;  %1222 = vmatprep.mubr.bf16.mxu0 %v551_v44  ;;  %v584_v43 = vpack.c.bf16 %v440_v37, %v432_v36  ;;  %v591_v44 = vpack.c.bf16 %v455_v39, %v447_v38  ;;  %v283_v35 = vld [vmem:[%s2785_s9 + $0x1e8] sm:$0xff]  ;;  %v277_v36 = vld [vmem:[%s2785_s9 + $0x1b8] sm:$0xff] }
  0x95   : > { %1383 = vmatprep.mubr.bf16.mxu1 %v553_v45  ;;  %v593_v45 = vpack.c.bf16 %v457_v41, %v449_v40  ;;  %v285_v37 = vld [vmem:[%s2785_s9 + $0x1f8] sm:$0xff]  ;;  %v507_v40 = vpack.c.bf16 %v283_v35, %v275_v34 }
  0x96   : > { %v509_v41 = vpack.c.bf16 %v285_v37, %v277_v36 }
  0x9b   : > { %1223 = vmatmul.mubr.bf16.gmra.mrb[36].mxu0 %v550_v58  ;;  %v462_v58 = vld [vmem:[%s2785_s9 + $0x780] sm:$0xff] }
  0x9c   : > { %1384 = vmatmul.mubr.bf16.gmra.mrb[36].mxu1 %v552_v59  ;;  %1230 = vmatprep.mubr.bf16.mxu0 %v559_v60  ;;  %v470_v59 = vld [vmem:[%s2785_s9 + $0x7c0] sm:$0xff]  ;;  %v464_v60 = vld [vmem:[%s2785_s9 + $0x790] sm:$0xff] }
  0x9d   : > { %1391 = vmatprep.mubr.bf16.mxu1 %v561_v61  ;;  %v472_v61 = vld [vmem:[%s2785_s9 + $0x7d0] sm:$0xff]  ;;  %v598_v2 = vpack.c.bf16 %v470_v59, %v462_v58  ;;  %v307_v58 = vld [vmem:[%s2785_s9 + $0x2a8] sm:$0xff] }
  0x9e   : > { %v600_v3 = vpack.c.bf16 %v472_v61, %v464_v60  ;;  %v315_v59 = vld [vmem:[%s2785_s9 + $0x2e8] sm:$0xff]  ;;  %v309_v60 = vld [vmem:[%s2785_s9 + $0x2b8] sm:$0xff] }
  0x9f   : > { %v317_v61 = vld [vmem:[%s2785_s9 + $0x2f8] sm:$0xff]  ;;  %v523_v0 = vpack.c.bf16 %v315_v59, %v307_v58 }
  0xa0   : > { %v525_v1 = vpack.c.bf16 %v317_v61, %v309_v60 }
  0xa3   : > { %1231 = vmatmul.mubr.bf16.gmra.mrb[40].mxu0 %v558_v6  ;;  %v226_v6 = vld [vmem:[%s2785_s9 + $0x20] sm:$0xff] }
  0xa4   : > { %1392 = vmatmul.mubr.bf16.gmra.mrb[40].mxu1 %v560_v7  ;;  %1238 = vmatprep.mubr.bf16.mxu0 %v567_v8  ;;  %v234_v7 = vld [vmem:[%s2785_s9 + $0x60] sm:$0xff]  ;;  %v228_v8 = vld [vmem:[%s2785_s9 + $0x30] sm:$0xff] }
  0xa5   : > { %1399 = vmatprep.mubr.bf16.mxu1 %v569_v9  ;;  %v236_v9 = vld [vmem:[%s2785_s9 + $0x70] sm:$0xff]  ;;  %v482_v14 = vpack.c.bf16 %v234_v7, %v226_v6  ;;  %v323_v6 = vld [vmem:[%s2785_s9 + $0x328] sm:$0xff] }
  0xa6   : > { %v484_v15 = vpack.c.bf16 %v236_v9, %v228_v8  ;;  %v331_v7 = vld [vmem:[%s2785_s9 + $0x368] sm:$0xff]  ;;  %v325_v8 = vld [vmem:[%s2785_s9 + $0x338] sm:$0xff] }
  0xa7   : > { %v333_v9 = vld [vmem:[%s2785_s9 + $0x378] sm:$0xff]  ;;  %v531_v12 = vpack.c.bf16 %v331_v7, %v323_v6 }
  0xa8   : > { %v533_v13 = vpack.c.bf16 %v333_v9, %v325_v8 }
  0xab   : > { %1239 = vmatmul.mubr.bf16.gmra.mrb[44].mxu0 %v566_v18  ;;  %v242_v18 = vld [vmem:[%s2785_s9 + $0xa0] sm:$0xff] }
  0xac   : > { %1400 = vmatmul.mubr.bf16.gmra.mrb[44].mxu1 %v568_v19  ;;  %1246 = vmatprep.mubr.bf16.mxu0 %v575_v20  ;;  %v250_v19 = vld [vmem:[%s2785_s9 + $0xe0] sm:$0xff]  ;;  %v244_v20 = vld [vmem:[%s2785_s9 + $0xb0] sm:$0xff] }
  0xad   : > { %1407 = vmatprep.mubr.bf16.mxu1 %v577_v21  ;;  %v252_v21 = vld [vmem:[%s2785_s9 + $0xf0] sm:$0xff]  ;;  %v490_v26 = vpack.c.bf16 %v250_v19, %v242_v18  ;;  %v339_v18 = vld [vmem:[%s2785_s9 + $0x3a8] sm:$0xff] }
  0xae   : > { %v492_v27 = vpack.c.bf16 %v252_v21, %v244_v20  ;;  %v347_v19 = vld [vmem:[%s2785_s9 + $0x3e8] sm:$0xff]  ;;  %v341_v20 = vld [vmem:[%s2785_s9 + $0x3b8] sm:$0xff] }
  0xaf   : > { %v349_v21 = vld [vmem:[%s2785_s9 + $0x3f8] sm:$0xff]  ;;  %v539_v24 = vpack.c.bf16 %v347_v19, %v339_v18 }
  0xb0   : > { %v541_v25 = vpack.c.bf16 %v349_v21, %v341_v20  ;;  %v429_v18 = vld [vmem:[%s2785_s9 + $0x678] sm:$0xff] }
  0xb3   : > { %1247 = vmatmul.mubr.bf16.gmra.mrb[48].mxu0 %v574_v30  ;;  %v258_v30 = vld [vmem:[%s2785_s9 + $0x120] sm:$0xff] }
  0xb4   : > { %1408 = vmatmul.mubr.bf16.gmra.mrb[48].mxu1 %v576_v31  ;;  %1254 = vmatprep.mubr.bf16.mxu0 %v583_v32  ;;  %v266_v31 = vld [vmem:[%s2785_s9 + $0x160] sm:$0xff]  ;;  %v260_v32 = vld [vmem:[%s2785_s9 + $0x130] sm:$0xff] }
  0xb5   : > { %1415 = vmatprep.mubr.bf16.mxu1 %v585_v33  ;;  %v268_v33 = vld [vmem:[%s2785_s9 + $0x170] sm:$0xff]  ;;  %v498_v38 = vpack.c.bf16 %v266_v31, %v258_v30  ;;  %v355_v30 = vld [vmem:[%s2785_s9 + $0x428] sm:$0xff] }
  0xb6   : > { %v500_v39 = vpack.c.bf16 %v268_v33, %v260_v32  ;;  %v363_v31 = vld [vmem:[%s2785_s9 + $0x468] sm:$0xff]  ;;  %v357_v32 = vld [vmem:[%s2785_s9 + $0x438] sm:$0xff] }
  0xb7   : > { %v365_v33 = vld [vmem:[%s2785_s9 + $0x478] sm:$0xff]  ;;  %v547_v36 = vpack.c.bf16 %v363_v31, %v355_v30 }
  0xb8   : > { %v549_v37 = vpack.c.bf16 %v365_v33, %v357_v32 }
  0xbb   : > { %1255 = vmatmul.mubr.bf16.gmra.mrb[52].mxu0 %v582_v42  ;;  %v274_v42 = vld [vmem:[%s2785_s9 + $0x1a0] sm:$0xff] }
  0xbc   : > { %1416 = vmatmul.mubr.bf16.gmra.mrb[52].mxu1 %v584_v43  ;;  %1262 = vmatprep.mubr.bf16.mxu0 %v591_v44  ;;  %v282_v43 = vld [vmem:[%s2785_s9 + $0x1e0] sm:$0xff]  ;;  %v276_v44 = vld [vmem:[%s2785_s9 + $0x1b0] sm:$0xff] }
  0xbd   : > { %1423 = vmatprep.mubr.bf16.mxu1 %v593_v45  ;;  %v284_v45 = vld [vmem:[%s2785_s9 + $0x1f0] sm:$0xff]  ;;  %v506_v50 = vpack.c.bf16 %v282_v43, %v274_v42  ;;  %v371_v42 = vld [vmem:[%s2785_s9 + $0x4a8] sm:$0xff] }
  0xbe   : > { %v508_v51 = vpack.c.bf16 %v284_v45, %v276_v44  ;;  %v379_v43 = vld [vmem:[%s2785_s9 + $0x4e8] sm:$0xff]  ;;  %v373_v44 = vld [vmem:[%s2785_s9 + $0x4b8] sm:$0xff] }
  0xbf   : > { %v381_v45 = vld [vmem:[%s2785_s9 + $0x4f8] sm:$0xff]  ;;  %v555_v48 = vpack.c.bf16 %v379_v43, %v371_v42 }
  0xc0   : > { %v557_v49 = vpack.c.bf16 %v381_v45, %v373_v44  ;;  %v437_v43 = vld [vmem:[%s2785_s9 + $0x6b8] sm:$0xff] }
  0xc1   : > { %v445_v44 = vld [vmem:[%s2785_s9 + $0x6f8] sm:$0xff] }
  0xc3   : > { %1263 = vmatmul.mubr.bf16.gmra.mrb[56].mxu0 %v590_v54  ;;  %v290_v54 = vld [vmem:[%s2785_s9 + $0x220] sm:$0xff] }
  0xc4   : > { %1424 = vmatmul.mubr.bf16.gmra.mrb[56].mxu1 %v592_v55  ;;  %1270 = vmatprep.mubr.bf16.mxu0 %v599_v56  ;;  %v298_v55 = vld [vmem:[%s2785_s9 + $0x260] sm:$0xff]  ;;  %v292_v56 = vld [vmem:[%s2785_s9 + $0x230] sm:$0xff] }
  0xc5   : > { %1431 = vmatprep.mubr.bf16.mxu1 %v601_v57  ;;  %v300_v57 = vld [vmem:[%s2785_s9 + $0x270] sm:$0xff]  ;;  %v514_v62 = vpack.c.bf16 %v298_v55, %v290_v54  ;;  %v387_v54 = vld [vmem:[%s2785_s9 + $0x528] sm:$0xff] }
  0xc6   : > { %v516_v63 = vpack.c.bf16 %v300_v57, %v292_v56  ;;  %v395_v55 = vld [vmem:[%s2785_s9 + $0x568] sm:$0xff]  ;;  %v389_v56 = vld [vmem:[%s2785_s9 + $0x538] sm:$0xff] }
  0xc7   : > { %v397_v57 = vld [vmem:[%s2785_s9 + $0x578] sm:$0xff]  ;;  %v563_v60 = vpack.c.bf16 %v395_v55, %v387_v54 }
  0xc8   : > { %v565_v61 = vpack.c.bf16 %v397_v57, %v389_v56  ;;  %v589_v56 = vpack.c.bf16 %v445_v44, %v437_v43 }
  0xcb   : > { %1271 = vmatmul.mubr.bf16.gmra.mrb[60].mxu0 %v598_v2  ;;  %v306_v2 = vld [vmem:[%s2785_s9 + $0x2a0] sm:$0xff] }
  0xcc   : > { %1432 = vmatmul.mubr.bf16.gmra.mrb[60].mxu1 %v600_v3  ;;  %1472 = vmatprep.mubr.bf16.mxu0 %v483_v4  ;;  %v314_v3 = vld [vmem:[%s2785_s9 + $0x2e0] sm:$0xff]  ;;  %v308_v4 = vld [vmem:[%s2785_s9 + $0x2b0] sm:$0xff] }
  0xcd   : > { %1633 = vmatprep.mubr.bf16.mxu1 %v485_v5  ;;  %v316_v5 = vld [vmem:[%s2785_s9 + $0x2f0] sm:$0xff]  ;;  %v522_v10 = vpack.c.bf16 %v314_v3, %v306_v2  ;;  %v403_v2 = vld [vmem:[%s2785_s9 + $0x5a8] sm:$0xff] }
  0xce   : > { %v524_v11 = vpack.c.bf16 %v316_v5, %v308_v4  ;;  %v411_v3 = vld [vmem:[%s2785_s9 + $0x5e8] sm:$0xff]  ;;  %v405_v4 = vld [vmem:[%s2785_s9 + $0x5b8] sm:$0xff] }
  0xcf   : > { %v413_v5 = vld [vmem:[%s2785_s9 + $0x5f8] sm:$0xff]  ;;  %v571_v8 = vpack.c.bf16 %v411_v3, %v403_v2  ;;  %v451_v2 = vld [vmem:[%s2785_s9 + $0x728] sm:$0xff] }
  0xd0   : > { %v573_v9 = vpack.c.bf16 %v413_v5, %v405_v4  ;;  %v459_v3 = vld [vmem:[%s2785_s9 + $0x768] sm:$0xff]  ;;  %v453_v5 = vld [vmem:[%s2785_s9 + $0x738] sm:$0xff] }
  0xd3   : > { %1473 = vmatmul.mubr.bf16.vlgmr.msra.gmra.mrb[64].mxu0 %v482_v14  ;;  %v322_v14 = vld [vmem:[%s2785_s9 + $0x320] sm:$0xff] }
  0xd4   : > { %1634 = vmatmul.mubr.bf16.vlgmr.msra.gmra.mrb[64].mxu1 %v484_v15  ;;  %1480 = vmatprep.mubr.bf16.mxu0 %v491_v16  ;;  %v330_v15 = vld [vmem:[%s2785_s9 + $0x360] sm:$0xff]  ;;  %v324_v16 = vld [vmem:[%s2785_s9 + $0x330] sm:$0xff] }
  0xd5   : > { %1641 = vmatprep.mubr.bf16.mxu1 %v493_v17  ;;  %v332_v17 = vld [vmem:[%s2785_s9 + $0x370] sm:$0xff]  ;;  %v530_v22 = vpack.c.bf16 %v330_v15, %v322_v14  ;;  %v419_v14 = vld [vmem:[%s2785_s9 + $0x628] sm:$0xff] }
  0xd6   : > { %v532_v23 = vpack.c.bf16 %v332_v17, %v324_v16  ;;  %v427_v15 = vld [vmem:[%s2785_s9 + $0x668] sm:$0xff]  ;;  %v421_v17 = vld [vmem:[%s2785_s9 + $0x638] sm:$0xff] }
  0xd7   : > { %v581_v30 = vpack.c.bf16 %v429_v18, %v421_v17 }
  0xdb   : > { %1481 = vmatmul.mubr.bf16.gmra.mrb[68].mxu0 %v490_v26  ;;  %v338_v26 = vld [vmem:[%s2785_s9 + $0x3a0] sm:$0xff] }
  0xdc   : > { %1642 = vmatmul.mubr.bf16.gmra.mrb[68].mxu1 %v492_v27  ;;  %1488 = vmatprep.mubr.bf16.mxu0 %v499_v28  ;;  %v346_v27 = vld [vmem:[%s2785_s9 + $0x3e0] sm:$0xff]  ;;  %v340_v28 = vld [vmem:[%s2785_s9 + $0x3b0] sm:$0xff] }
  0xdd   : > { %1649 = vmatprep.mubr.bf16.mxu1 %v501_v29  ;;  %v348_v29 = vld [vmem:[%s2785_s9 + $0x3f0] sm:$0xff]  ;;  %v538_v34 = vpack.c.bf16 %v346_v27, %v338_v26  ;;  %v579_v26 = vpack.c.bf16 %v427_v15, %v419_v14  ;;  %v595_v14 = vpack.c.bf16 %v459_v3, %v451_v2 }
  0xde   : > { %v540_v35 = vpack.c.bf16 %v348_v29, %v340_v28 }
  0xe3   : > { %1489 = vmatmul.mubr.bf16.gmra.mrb[72].mxu0 %v498_v38  ;;  %v354_v38 = vld [vmem:[%s2785_s9 + $0x420] sm:$0xff] }
  0xe4   : > { %1650 = vmatmul.mubr.bf16.gmra.mrb[72].mxu1 %v500_v39  ;;  %1496 = vmatprep.mubr.bf16.mxu0 %v507_v40  ;;  %v362_v39 = vld [vmem:[%s2785_s9 + $0x460] sm:$0xff]  ;;  %v356_v40 = vld [vmem:[%s2785_s9 + $0x430] sm:$0xff] }
  0xe5   : > { %1657 = vmatprep.mubr.bf16.mxu1 %v509_v41  ;;  %v364_v41 = vld [vmem:[%s2785_s9 + $0x470] sm:$0xff]  ;;  %v546_v46 = vpack.c.bf16 %v362_v39, %v354_v38 }
  0xe6   : > { %v548_v47 = vpack.c.bf16 %v364_v41, %v356_v40  ;;  %v428_v39 = vld [vmem:[%s2785_s9 + $0x670] sm:$0xff]  ;;  %v435_v40 = vld [vmem:[%s2785_s9 + $0x6a8] sm:$0xff] }
  0xe7   : > { %v443_v41 = vld [vmem:[%s2785_s9 + $0x6e8] sm:$0xff] }
  0xeb   : > { %1497 = vmatmul.mubr.bf16.gmra.mrb[76].mxu0 %v506_v50  ;;  %v370_v50 = vld [vmem:[%s2785_s9 + $0x4a0] sm:$0xff] }
  0xec   : > { %1658 = vmatmul.mubr.bf16.gmra.mrb[76].mxu1 %v508_v51  ;;  %1504 = vmatprep.mubr.bf16.mxu0 %v515_v52  ;;  %v378_v51 = vld [vmem:[%s2785_s9 + $0x4e0] sm:$0xff]  ;;  %v372_v52 = vld [vmem:[%s2785_s9 + $0x4b0] sm:$0xff] }
  0xed   : > { %1665 = vmatprep.mubr.bf16.mxu1 %v517_v53  ;;  %v380_v53 = vld [vmem:[%s2785_s9 + $0x4f0] sm:$0xff]  ;;  %v554_v58 = vpack.c.bf16 %v378_v51, %v370_v50 }
  0xee   : > { %v556_v59 = vpack.c.bf16 %v380_v53, %v372_v52  ;;  %v587_v52 = vpack.c.bf16 %v443_v41, %v435_v40 }
  0xf3   : > { %1505 = vmatmul.mubr.bf16.gmra.mrb[80].mxu0 %v514_v62  ;;  %v386_v62 = vld [vmem:[%s2785_s9 + $0x520] sm:$0xff] }
  0xf4   : > { %1666 = vmatmul.mubr.bf16.gmra.mrb[80].mxu1 %v516_v63  ;;  %1512 = vmatprep.mubr.bf16.mxu0 %v523_v0  ;;  %v394_v63 = vld [vmem:[%s2785_s9 + $0x560] sm:$0xff]  ;;  %v388_v0 = vld [vmem:[%s2785_s9 + $0x530] sm:$0xff] }
  0xf5   : > { %1673 = vmatprep.mubr.bf16.mxu1 %v525_v1  ;;  %v396_v1 = vld [vmem:[%s2785_s9 + $0x570] sm:$0xff]  ;;  %v562_v6 = vpack.c.bf16 %v394_v63, %v386_v62  ;;  %v442_v62 = vld [vmem:[%s2785_s9 + $0x6e0] sm:$0xff] }
  0xf6   : > { %v564_v7 = vpack.c.bf16 %v396_v1, %v388_v0  ;;  %v436_v63 = vld [vmem:[%s2785_s9 + $0x6b0] sm:$0xff] }
  0xf7   : > { %v444_v1 = vld [vmem:[%s2785_s9 + $0x6f0] sm:$0xff] }
  0xfb   : > { %1513 = vmatmul.mubr.bf16.gmra.mrb[84].mxu0 %v522_v10  ;;  %v402_v10 = vld [vmem:[%s2785_s9 + $0x5a0] sm:$0xff] }
  0xfc   : > { %1674 = vmatmul.mubr.bf16.gmra.mrb[84].mxu1 %v524_v11  ;;  %1520 = vmatprep.mubr.bf16.mxu0 %v531_v12  ;;  %v410_v11 = vld [vmem:[%s2785_s9 + $0x5e0] sm:$0xff]  ;;  %v404_v12 = vld [vmem:[%s2785_s9 + $0x5b0] sm:$0xff] }
  0xfd   : > { %1681 = vmatprep.mubr.bf16.mxu1 %v533_v13  ;;  %v412_v13 = vld [vmem:[%s2785_s9 + $0x5f0] sm:$0xff]  ;;  %v570_v21 = vpack.c.bf16 %v410_v11, %v402_v10 }
 0x103   : > { %1521 = vmatmul.mubr.bf16.gmra.mrb[88].mxu0 %v530_v22 }
 0x104   : > { %1682 = vmatmul.mubr.bf16.gmra.mrb[88].mxu1 %v532_v23  ;;  %1528 = vmatprep.mubr.bf16.mxu0 %v539_v24 }
 0x105   : > { %1689 = vmatprep.mubr.bf16.mxu1 %v541_v25  ;;  %v572_v25 = vpack.c.bf16 %v412_v13, %v404_v12  ;;  %v588_v13 = vpack.c.bf16 %v444_v1, %v436_v63 }
 0x10b   : > { %1529 = vmatmul.mubr.bf16.gmra.mrb[92].mxu0 %v538_v34 }
 0x10c   : > { %1690 = vmatmul.mubr.bf16.gmra.mrb[92].mxu1 %v540_v35  ;;  %1536 = vmatprep.mubr.bf16.mxu0 %v547_v36  ;;  %v418_v35 = vld [vmem:[%s2785_s9 + $0x620] sm:$0xff] }
 0x10d   : > { %1697 = vmatprep.mubr.bf16.mxu1 %v549_v37  ;;  %v426_v36 = vld [vmem:[%s2785_s9 + $0x660] sm:$0xff]  ;;  %v420_v37 = vld [vmem:[%s2785_s9 + $0x630] sm:$0xff] }
 0x10e   : > { %v580_v51 = vpack.c.bf16 %v428_v39, %v420_v37 }
 0x113   : > { %1537 = vmatmul.mubr.bf16.gmra.mrb[96].mxu0 %v546_v46 }
 0x114   : > { %1698 = vmatmul.mubr.bf16.gmra.mrb[96].mxu1 %v548_v47  ;;  %1544 = vmatprep.mubr.bf16.mxu0 %v555_v48  ;;  %v578_v47 = vpack.c.bf16 %v426_v36, %v418_v35 }
 0x115   : > { %1705 = vmatprep.mubr.bf16.mxu1 %v557_v49 }
 0x11b   : > { %1545 = vmatmul.mubr.bf16.gmra.mrb[100].mxu0 %v554_v58 }
 0x11c   : > { %1706 = vmatmul.mubr.bf16.gmra.mrb[100].mxu1 %v556_v59  ;;  %1552 = vmatprep.mubr.bf16.mxu0 %v563_v60 }
 0x11d   : > { %1713 = vmatprep.mubr.bf16.mxu1 %v565_v61  ;;  %v434_v61 = vld [vmem:[%s2785_s9 + $0x6a0] sm:$0xff] }
 0x123   : > { %1553 = vmatmul.mubr.bf16.gmra.mrb[104].mxu0 %v562_v6  ;;  %v461_v6 = vld [vmem:[%s2785_s9 + $0x778] sm:$0xff] }
 0x124   : > { %1714 = vmatmul.mubr.bf16.gmra.mrb[104].mxu1 %v564_v7  ;;  %1560 = vmatprep.mubr.bf16.mxu0 %v571_v8  ;;  %v597_v18 = vpack.c.bf16 %v461_v6, %v453_v5 }
 0x125   : > { %1721 = vmatprep.mubr.bf16.mxu1 %v573_v9  ;;  %v586_v9 = vpack.c.bf16 %v442_v62, %v434_v61 }
 0x126   : > { %v2069_v16 = vpop.f32.mrb[0].mxu0 }
 0x127   : > { %v2181_v19 = vpop.f32.mrb[0].mxu1  ;;  %v2070_v20 = vpop.f32.mrb[1].mxu0 }
 0x128   : > { %v2071_v22 = vadd.f32 %v2070_v20, %v2069_v16  ;;  %v2182_v23 = vpop.f32.mrb[1].mxu1  ;;  %v2072_v24 = vpop.f32.mrb[2].mxu0 }
 0x129   : > { %v2183_v27 = vadd.f32 %v2182_v23, %v2181_v19  ;;  %v2184_v28 = vpop.f32.mrb[2].mxu1  ;;  %v2073_v29 = vpop.f32.mrb[3].mxu0  ;;  %v450_v23 = vld [vmem:[%s2785_s9 + $0x720] sm:$0xff] }
 0x12a   : > { %v2074_v31 = vadd.f32 %v2073_v29, %v2072_v24  ;;  %v2185_v32 = vpop.f32.mrb[3].mxu1  ;;  %v458_v24 = vld [vmem:[%s2785_s9 + $0x760] sm:$0xff]  ;;  %v475_v29 = vld [vmem:[%s2785_s9 + $0x7e8] sm:$0xff] }
 0x12b   : > { %v3211_v33 = vadd.f32 %v2183_v27, %v2071_v22  ;;  %v2186_v34 = vadd.f32 %v2185_v32, %v2184_v28  ;;  %1561 = vmatmul.mubr.bf16.gmra.mrb[108].mxu0 %v570_v21  ;;  %v460_v27 = vld [vmem:[%s2785_s9 + $0x770] sm:$0xff]  ;;  %v467_v28 = vld [vmem:[%s2785_s9 + $0x7a8] sm:$0xff]  ;;  %v477_v32 = vld [vmem:[%s2785_s9 + $0x7f8] sm:$0xff]  ;;  %v594_v36 = vpack.c.bf16 %v458_v24, %v450_v23 }
 0x12c   : > { %1722 = vmatmul.mubr.bf16.gmra.mrb[108].mxu1 %v572_v25  ;;  %1568 = vmatprep.mubr.bf16.mxu0 %v579_v26  ;;  %v452_v25 = vld [vmem:[%s2785_s9 + $0x730] sm:$0xff] }
 0x12d   : > { %v3216_v38 = vadd.f32 %v2186_v34, %v2074_v31  ;;  %1729 = vmatprep.mubr.bf16.mxu1 %v581_v30  ;;  %v469_v31 = vld [vmem:[%s2785_s9 + $0x7b8] sm:$0xff]  ;;  %v596_v41 = vpack.c.bf16 %v460_v27, %v452_v25 }
 0x12e   : > { %v2075_v42 = vpop.f32.mrb[4].mxu0 }
 0x12f   : > { %v2187_v45 = vpop.f32.mrb[4].mxu1  ;;  %v2076_v46 = vpop.f32.mrb[5].mxu0 }
 0x130   : > { %v2077_v48 = vadd.f32 %v2076_v46, %v2075_v42  ;;  %v2188_v49 = vpop.f32.mrb[5].mxu1  ;;  %v2078_v50 = vpop.f32.mrb[6].mxu0  ;;  %v603_v42 = vpack.c.bf16 %v475_v29, %v467_v28  ;;  %v605_v46 = vpack.c.bf16 %v477_v32, %v469_v31 }
 0x131   : > { %v2189_v53 = vadd.f32 %v2188_v49, %v2187_v45  ;;  %v2190_v54 = vpop.f32.mrb[6].mxu1  ;;  %v2079_v55 = vpop.f32.mrb[7].mxu0 }
 0x132   : > { %v2080_v57 = vadd.f32 %v2079_v55, %v2078_v50  ;;  %v2191_v58 = vpop.f32.mrb[7].mxu1  ;;  %v476_v55 = vld [vmem:[%s2785_s9 + $0x7f0] sm:$0xff] }
 0x133   : > { %v3223_v59 = vadd.f32 %v2189_v53, %v2077_v48  ;;  %v2192_v60 = vadd.f32 %v2191_v58, %v2190_v54  ;;  %1569 = vmatmul.mubr.bf16.gmra.mrb[112].mxu0 %v578_v47  ;;  %v468_v54 = vld [vmem:[%s2785_s9 + $0x7b0] sm:$0xff] }
 0x134   : > { %1730 = vmatmul.mubr.bf16.gmra.mrb[112].mxu1 %v580_v51  ;;  %1576 = vmatprep.mubr.bf16.mxu0 %v587_v52  ;;  %v466_v51 = vld [vmem:[%s2785_s9 + $0x7a0] sm:$0xff]  ;;  %v604_v1 = vpack.c.bf16 %v476_v55, %v468_v54 }
 0x135   : > { %v3228_v0 = vadd.f32 %v2192_v60, %v2080_v57  ;;  %1737 = vmatprep.mubr.bf16.mxu1 %v589_v56  ;;  %v474_v52 = vld [vmem:[%s2785_s9 + $0x7e0] sm:$0xff]  ;;  %s1981_s9 = sshll.u32 %s1971_s19, 5 }
 0x136   : > { %v2081_v4 = vpop.f32.mrb[8].mxu0  ;;  %v602_v60 = vpack.c.bf16 %v474_v52, %v466_v51  ;;  %p216_p7 = scmp.lt.s32.totalorder %s1981_s9, 63 }
 0x137   : > { %v2193_v7 = vpop.f32.mrb[8].mxu1  ;;  %v2082_v8 = vpop.f32.mrb[9].mxu0 }
 0x138   : > { %v2083_v10 = vadd.f32 %v2082_v8, %v2081_v4  ;;  %v2194_v11 = vpop.f32.mrb[9].mxu1  ;;  %v2084_v12 = vpop.f32.mrb[10].mxu0  ;;  %s3474_s9 = smov (!%p216_p7, %s1981_s9), 63 }
 0x139   : > { %v2195_v15 = vadd.f32 %v2194_v11, %v2193_v7  ;;  %v2196_v16 = vpop.f32.mrb[10].mxu1  ;;  %v2085_v17 = vpop.f32.mrb[11].mxu0  ;;  %s1982_s28 = sshll.u32 %s3474_s9, 3 }
 0x13a   : > { %v2086_v19 = vadd.f32 %v2085_v17, %v2084_v12  ;;  %v2197_v20 = vpop.f32.mrb[11].mxu1  ;;  %s3323_s10 = scalar_lea.vmem %s3465_s4, %s1982_s28 }
 0x13b   : > { %v3235_v21 = vadd.f32 %v2195_v15, %v2083_v10  ;;  %v2198_v22 = vadd.f32 %v2197_v20, %v2196_v16  ;;  %1577 = vmatmul.mubr.bf16.gmra.mrb[116].mxu0 %v586_v9 }
 0x13c   : > { %1738 = vmatmul.mubr.bf16.gmra.mrb[116].mxu1 %v588_v13  ;;  %1584 = vmatprep.mubr.bf16.mxu0 %v595_v14 }
 0x13d   : > { %v3240_v26 = vadd.f32 %v2198_v22, %v2086_v19  ;;  %1745 = vmatprep.mubr.bf16.mxu1 %v597_v18 }
 0x13e   : > { %v2087_v30 = vpop.f32.mrb[12].mxu0 }
 0x13f   : > { %v2199_v34 = vpop.f32.mrb[12].mxu1  ;;  %v2088_v35 = vpop.f32.mrb[13].mxu0 }
 0x140   : > { %v2089_v37 = vadd.f32 %v2088_v35, %v2087_v30  ;;  %v2200_v39 = vpop.f32.mrb[13].mxu1  ;;  %v2090_v40 = vpop.f32.mrb[14].mxu0 }
 0x141   : > { %v2201_v43 = vadd.f32 %v2200_v39, %v2199_v34  ;;  %v2202_v44 = vpop.f32.mrb[14].mxu1  ;;  %v2091_v45 = vpop.f32.mrb[15].mxu0 }
 0x142   : > { %v2092_v47 = vadd.f32 %v2091_v45, %v2090_v40  ;;  %v2203_v48 = vpop.f32.mrb[15].mxu1 }
 0x143   : > { %v3247_v49 = vadd.f32 %v2201_v43, %v2089_v37  ;;  %v2204_v50 = vadd.f32 %v2203_v48, %v2202_v44  ;;  %1585 = vmatmul.mubr.bf16.gmra.mrb[120].mxu0 %v594_v36 }
 0x144   : > { %1746 = vmatmul.mubr.bf16.gmra.mrb[120].mxu1 %v596_v41  ;;  %1592 = vmatprep.mubr.bf16.mxu0 %v603_v42 }
 0x145   : > { %v3251_v53 = vadd.f32 %v2204_v50, %v2092_v47  ;;  %1753 = vmatprep.mubr.bf16.mxu1 %v605_v46 }
 0x146   : > { %v2093_v56 = vpop.f32.mrb[16].mxu0 }
 0x147   : > { %v2205_v57 = vpop.f32.mrb[16].mxu1  ;;  %v2094_v58 = vpop.f32.mrb[17].mxu0 }
 0x148   : > { %v2095_v61 = vadd.f32 %v2094_v58, %v2093_v56  ;;  %v2206_v62 = vpop.f32.mrb[17].mxu1  ;;  %v2096_v63 = vpop.f32.mrb[18].mxu0 }
 0x149   : > { %v2207_v2 = vadd.f32 %v2206_v62, %v2205_v57  ;;  %v2208_v3 = vpop.f32.mrb[18].mxu1  ;;  %v2097_v4 = vpop.f32.mrb[19].mxu0 }
 0x14a   : > { %v2098_v5 = vadd.f32 %v2097_v4, %v2096_v63  ;;  %v2209_v6 = vpop.f32.mrb[19].mxu1 }
 0x14b   : > { %v3255_v7 = vadd.f32 %v2207_v2, %v2095_v61  ;;  %v2210_v8 = vadd.f32 %v2209_v6, %v2208_v3  ;;  %1593 = vmatmul.mubr.bf16.gmra.mrb[124].mxu0 %v602_v60 }
 0x14c   : > { %1754 = vmatmul.mubr.bf16.gmra.mrb[124].mxu1 %v604_v1 }
 0x14d   : > { %v3257_v9 = vadd.f32 %v2210_v8, %v2098_v5 }
 0x14e   : > { %v2099_v10 = vpop.f32.mrb[20].mxu0 }
 0x14f   : > { %v2211_v11 = vpop.f32.mrb[20].mxu1  ;;  %v2100_v12 = vpop.f32.mrb[21].mxu0 }
 0x150   : > { %v2101_v13 = vadd.f32 %v2100_v12, %v2099_v10  ;;  %v2212_v14 = vpop.f32.mrb[21].mxu1  ;;  %v2102_v15 = vpop.f32.mrb[22].mxu0 }
 0x151   : > { %v2213_v16 = vadd.f32 %v2212_v14, %v2211_v11  ;;  %v2214_v17 = vpop.f32.mrb[22].mxu1  ;;  %v2103_v18 = vpop.f32.mrb[23].mxu0 }
 0x152   : > { %v2104_v19 = vadd.f32 %v2103_v18, %v2102_v15  ;;  %v2215_v20 = vpop.f32.mrb[23].mxu1 }
 0x153   : > { %v3259_v22 = vadd.f32 %v2213_v16, %v2101_v13  ;;  %v2216_v23 = vadd.f32 %v2215_v20, %v2214_v17 }
 0x155   : > { %v3261_v24 = vadd.f32 %v2216_v23, %v2104_v19 }
 0x156   : > { %v2105_v25 = vpop.f32.mrb[24].mxu0 }
 0x157   : > { %v2217_v27 = vpop.f32.mrb[24].mxu1  ;;  %v2106_v28 = vpop.f32.mrb[25].mxu0 }
 0x158   : > { %v2107_v29 = vadd.f32 %v2106_v28, %v2105_v25  ;;  %v2218_v30 = vpop.f32.mrb[25].mxu1  ;;  %v2108_v31 = vpop.f32.mrb[26].mxu0 }
 0x159   : > { %v2219_v32 = vadd.f32 %v2218_v30, %v2217_v27  ;;  %v2220_v34 = vpop.f32.mrb[26].mxu1  ;;  %v2109_v35 = vpop.f32.mrb[27].mxu0 }
 0x15a   : > { %v2110_v36 = vadd.f32 %v2109_v35, %v2108_v31  ;;  %v2221_v37 = vpop.f32.mrb[27].mxu1 }
 0x15b   : > { %v3263_v39 = vadd.f32 %v2219_v32, %v2107_v29  ;;  %v2222_v40 = vadd.f32 %v2221_v37, %v2220_v34 }
 0x15d   : > { %v3265_v41 = vadd.f32 %v2222_v40, %v2110_v36 }
 0x15e   : > { %v2111_v42 = vpop.f32.mrb[28].mxu0 }
 0x15f   : > { %v2223_v43 = vpop.f32.mrb[28].mxu1  ;;  %v2112_v44 = vpop.f32.mrb[29].mxu0 }
 0x160   : > { %v2113_v45 = vadd.f32 %v2112_v44, %v2111_v42  ;;  %v2224_v46 = vpop.f32.mrb[29].mxu1  ;;  %v2114_v47 = vpop.f32.mrb[30].mxu0 }
 0x161   : > { %v2225_v48 = vadd.f32 %v2224_v46, %v2223_v43  ;;  %v2226_v50 = vpop.f32.mrb[30].mxu1  ;;  %v2115_v51 = vpop.f32.mrb[31].mxu0 }
 0x162   : > { %v2116_v52 = vadd.f32 %v2115_v51, %v2114_v47  ;;  %v2227_v54 = vpop.f32.mrb[31].mxu1 }
 0x163   : > { %v3267_v55 = vadd.f32 %v2225_v48, %v2113_v45  ;;  %v2228_v56 = vadd.f32 %v2227_v54, %v2226_v50 }
 0x165   : > { %v3269_v57 = vadd.f32 %v2228_v56, %v2116_v52 }
 0x166   : > { %v2117_v58 = vpop.f32.mrb[32].mxu0 }
 0x167   : > { %v2229_v60 = vpop.f32.mrb[32].mxu1  ;;  %v2118_v61 = vpop.f32.mrb[33].mxu0 }
 0x168   : > { %v2119_v62 = vadd.f32 %v2118_v61, %v2117_v58  ;;  %v2230_v63 = vpop.f32.mrb[33].mxu1  ;;  %v2120_v1 = vpop.f32.mrb[34].mxu0 }
 0x169   : > { %v2231_v2 = vadd.f32 %v2230_v63, %v2229_v60  ;;  %v2232_v3 = vpop.f32.mrb[34].mxu1  ;;  %v2121_v4 = vpop.f32.mrb[35].mxu0 }
 0x16a   : > { %v2122_v5 = vadd.f32 %v2121_v4, %v2120_v1  ;;  %v2233_v6 = vpop.f32.mrb[35].mxu1 }
 0x16b   : > { %v3271_v8 = vadd.f32 %v2231_v2, %v2119_v62  ;;  %v2234_v10 = vadd.f32 %v2233_v6, %v2232_v3 }
 0x16d   : > { %v3273_v11 = vadd.f32 %v2234_v10, %v2122_v5 }
 0x16e   : > { %v2123_v12 = vpop.f32.mrb[36].mxu0 }
 0x16f   : > { %v2235_v13 = vpop.f32.mrb[36].mxu1  ;;  %v2124_v14 = vpop.f32.mrb[37].mxu0 }
 0x170   : > { %v2125_v15 = vadd.f32 %v2124_v14, %v2123_v12  ;;  %v2236_v16 = vpop.f32.mrb[37].mxu1  ;;  %v2126_v17 = vpop.f32.mrb[38].mxu0 }
 0x171   : > { %v2237_v18 = vadd.f32 %v2236_v16, %v2235_v13  ;;  %v2238_v19 = vpop.f32.mrb[38].mxu1  ;;  %v2127_v20 = vpop.f32.mrb[39].mxu0 }
 0x172   : > { %v2128_v23 = vadd.f32 %v2127_v20, %v2126_v17  ;;  %v2239_v25 = vpop.f32.mrb[39].mxu1 }
 0x173   : > { %v3275_v27 = vadd.f32 %v2237_v18, %v2125_v15  ;;  %v2240_v28 = vadd.f32 %v2239_v25, %v2238_v19 }
 0x175   : > { %v3277_v29 = vadd.f32 %v2240_v28, %v2128_v23 }
 0x176   : > { %v2129_v30 = vpop.f32.mrb[40].mxu0 }
 0x177   : > { %v2241_v31 = vpop.f32.mrb[40].mxu1  ;;  %v2130_v32 = vpop.f32.mrb[41].mxu0 }
 0x178   : > { %v2131_v34 = vadd.f32 %v2130_v32, %v2129_v30  ;;  %v2242_v35 = vpop.f32.mrb[41].mxu1  ;;  %v2132_v36 = vpop.f32.mrb[42].mxu0 }
 0x179   : > { %v2243_v37 = vadd.f32 %v2242_v35, %v2241_v31  ;;  %v2244_v40 = vpop.f32.mrb[42].mxu1  ;;  %v2133_v42 = vpop.f32.mrb[43].mxu0 }
 0x17a   : > { %v2134_v43 = vadd.f32 %v2133_v42, %v2132_v36  ;;  %v2245_v44 = vpop.f32.mrb[43].mxu1 }
 0x17b   : > { %v3279_v45 = vadd.f32 %v2243_v37, %v2131_v34  ;;  %v2246_v46 = vadd.f32 %v2245_v44, %v2244_v40 }
 0x17d   : > { %v3281_v47 = vadd.f32 %v2246_v46, %v2134_v43 }
 0x17e   : > { %v2135_v48 = vpop.f32.mrb[44].mxu0 }
 0x17f   : > { %v2247_v50 = vpop.f32.mrb[44].mxu1  ;;  %v2136_v51 = vpop.f32.mrb[45].mxu0 }
 0x180   : > { %v2137_v52 = vadd.f32 %v2136_v51, %v2135_v48  ;;  %v2248_v54 = vpop.f32.mrb[45].mxu1  ;;  %v2138_v56 = vpop.f32.mrb[46].mxu0 }
 0x181   : > { %v2249_v58 = vadd.f32 %v2248_v54, %v2247_v50  ;;  %v2250_v60 = vpop.f32.mrb[46].mxu1  ;;  %v2139_v61 = vpop.f32.mrb[47].mxu0 }
 0x182   : > { %v2140_v62 = vadd.f32 %v2139_v61, %v2138_v56  ;;  %v2251_v63 = vpop.f32.mrb[47].mxu1 }
 0x183   : > { %v3283_v1 = vadd.f32 %v2249_v58, %v2137_v52  ;;  %v2252_v2 = vadd.f32 %v2251_v63, %v2250_v60 }
 0x185   : > { %v3285_v3 = vadd.f32 %v2252_v2, %v2140_v62 }
 0x186   : > { %v2141_v4 = vpop.f32.mrb[48].mxu0 }
 0x187   : > { %v2253_v5 = vpop.f32.mrb[48].mxu1  ;;  %v2142_v6 = vpop.f32.mrb[49].mxu0 }
 0x188   : > { %v2143_v10 = vadd.f32 %v2142_v6, %v2141_v4  ;;  %v2254_v12 = vpop.f32.mrb[49].mxu1  ;;  %v2144_v13 = vpop.f32.mrb[50].mxu0 }
 0x189   : > { %v2255_v14 = vadd.f32 %v2254_v12, %v2253_v5  ;;  %v2256_v15 = vpop.f32.mrb[50].mxu1  ;;  %v2145_v16 = vpop.f32.mrb[51].mxu0 }
 0x18a   : > { %v2146_v17 = vadd.f32 %v2145_v16, %v2144_v13  ;;  %v2257_v18 = vpop.f32.mrb[51].mxu1 }
 0x18b   : > { %v3287_v19 = vadd.f32 %v2255_v14, %v2143_v10  ;;  %v2258_v20 = vadd.f32 %v2257_v18, %v2256_v15 }
 0x18d   : > { %v3289_v23 = vadd.f32 %v2258_v20, %v2146_v17 }
 0x18e   : > { %v2147_v25 = vpop.f32.mrb[52].mxu0 }
 0x18f   : > { %v2259_v28 = vpop.f32.mrb[52].mxu1  ;;  %v2148_v30 = vpop.f32.mrb[53].mxu0 }
 0x190   : > { %v2149_v31 = vadd.f32 %v2148_v30, %v2147_v25  ;;  %v2260_v32 = vpop.f32.mrb[53].mxu1  ;;  %v2150_v34 = vpop.f32.mrb[54].mxu0 }
 0x191   : > { %v2261_v35 = vadd.f32 %v2260_v32, %v2259_v28  ;;  %v2262_v36 = vpop.f32.mrb[54].mxu1  ;;  %v2151_v37 = vpop.f32.mrb[55].mxu0 }
 0x192   : > { %v2152_v40 = vadd.f32 %v2151_v37, %v2150_v34  ;;  %v2263_v42 = vpop.f32.mrb[55].mxu1 }
 0x193   : > { %v3291_v43 = vadd.f32 %v2261_v35, %v2149_v31  ;;  %v2264_v44 = vadd.f32 %v2263_v42, %v2262_v36 }
 0x195   : > { %v3293_v46 = vadd.f32 %v2264_v44, %v2152_v40 }
 0x196   : > { %v2153_v48 = vpop.f32.mrb[56].mxu0 }
 0x197   : > { %v2265_v50 = vpop.f32.mrb[56].mxu1  ;;  %v2154_v51 = vpop.f32.mrb[57].mxu0 }
 0x198   : > { %v2155_v52 = vadd.f32 %v2154_v51, %v2153_v48  ;;  %v2266_v54 = vpop.f32.mrb[57].mxu1  ;;  %v2156_v56 = vpop.f32.mrb[58].mxu0 }
 0x199   : > { %v2267_v58 = vadd.f32 %v2266_v54, %v2265_v50  ;;  %v2268_v60 = vpop.f32.mrb[58].mxu1  ;;  %v2157_v61 = vpop.f32.mrb[59].mxu0  ;;  %v3309_v54 = vld [vmem:[%s3463_s2] ss:$0 sm:$0xff] }
 0x19a   : > { %v2158_v62 = vadd.f32 %v2157_v61, %v2156_v56  ;;  %v2269_v63 = vpop.f32.mrb[59].mxu1  ;;  %v3315_v61 = vld [vmem:[%s3464_s3] ss:$0 sm:$0xff] }
 0x19b   : > { %v3295_v2 = vadd.f32 %v2267_v58, %v2155_v52  ;;  %v2270_v4 = vadd.f32 %v2269_v63, %v2268_v60 }
 0x19d   : > { %v3297_v5 = vadd.f32 %v2270_v4, %v2158_v62 }
 0x19e   : > { %v2159_v6 = vpop.f32.mrb[60].mxu0 }
 0x19f   : > { %v2271_v10 = vpop.f32.mrb[60].mxu1  ;;  %v2160_v12 = vpop.f32.mrb[61].mxu0 }
 0x1a0   : > { %v2161_v13 = vadd.f32 %v2160_v12, %v2159_v6  ;;  %v2272_v14 = vpop.f32.mrb[61].mxu1  ;;  %v2162_v15 = vpop.f32.mrb[62].mxu0 }
 0x1a1   : > { %v2273_v16 = vadd.f32 %v2272_v14, %v2271_v10  ;;  %v2274_v17 = vpop.f32.mrb[62].mxu1  ;;  %v2163_v18 = vpop.f32.mrb[63].mxu0 }
 0x1a2   : > { %v2164_v20 = vadd.f32 %v2163_v18, %v2162_v15  ;;  %v2275_v25 = vpop.f32.mrb[63].mxu1 }
 0x1a3   : > { %v3299_v28 = vadd.f32 %v2273_v16, %v2161_v13  ;;  %v2276_v30 = vadd.f32 %v2275_v25, %v2274_v17 }
 0x1a5   : > { %v3303_v31 = vadd.f32 %v2276_v30, %v2164_v20 }
 0x1a6   : > { %v2293_v32 = vpop.f32.mrb[64].mxu0 }
 0x1a7   : > { %v2405_v34 = vpop.f32.mrb[64].mxu1  ;;  %v2294_v35 = vpop.f32.mrb[65].mxu0 }
 0x1a8   : > { %v2295_v36 = vadd.f32 %v2294_v35, %v2293_v32  ;;  %v2406_v37 = vpop.f32.mrb[65].mxu1  ;;  %v2296_v40 = vpop.f32.mrb[66].mxu0 }
 0x1a9   : > { %v2407_v42 = vadd.f32 %v2406_v37, %v2405_v34  ;;  %v2408_v44 = vpop.f32.mrb[66].mxu1  ;;  %v2297_v48 = vpop.f32.mrb[67].mxu0 }
 0x1aa   : > { %v1475_v50 = vadd.f32 %v2295_v36, %v3211_v33  ;;  %v2298_v51 = vadd.f32 %v2297_v48, %v2296_v40  ;;  %v2409_v52 = vpop.f32.mrb[67].mxu1 }
 0x1ab   : > { %v2410_v56 = vadd.f32 %v2409_v52, %v2408_v44 }
 0x1ac   : > { %v1636_v58 = vadd.f32 %v2407_v42, %v1475_v50  ;;  %v1478_v60 = vadd.f32 %v2298_v51, %v3216_v38 }
 0x1ae   : > { %v1769_v33 = vmul.f32 %v3309_v54, %v1636_v58  ;;  %v1639_v62 = vadd.f32 %v2410_v56, %v1478_v60  ;;  %v2299_v63 = vpop.f32.mrb[68].mxu0 }
 0x1af   : > { %v2411_v4 = vpop.f32.mrb[68].mxu1  ;;  %v2300_v6 = vpop.f32.mrb[69].mxu0 }
 0x1b0   : > { %v1808_v10 = vadd.f32 %v3315_v61, %v1769_v33  ;;  %v1770_v12 = vmul.f32 %v3309_v54, %v1639_v62  ;;  %v2301_v13 = vadd.f32 %v2300_v6, %v2299_v63  ;;  %v2412_v14 = vpop.f32.mrb[69].mxu1  ;;  %v2302_v15 = vpop.f32.mrb[70].mxu0 }
 0x1b1   : > { %v2413_v38 = vadd.f32 %v2412_v14, %v2411_v4  ;;  %v2414_v16 = vpop.f32.mrb[70].mxu1  ;;  %v2303_v17 = vpop.f32.mrb[71].mxu0 }
 0x1b2   : > { %v1840_v18 = vmax.f32 %v1808_v10, 0.0  ;;  %v1809_v20 = vadd.f32 %v3315_v61, %v1770_v12  ;;  %v1483_v25 = vadd.f32 %v2301_v13, %v3223_v59  ;;  %v2304_v30 = vadd.f32 %v2303_v17, %v2302_v15  ;;  %v2415_v32 = vpop.f32.mrb[71].mxu1 }
 0x1b3   : > { %v2416_v34 = vadd.f32 %v2415_v32, %v2414_v16 }
 0x1b4   : > { %1872 = vst [vmem:[%s3323_s10] sm:$0xff] %v1840_v18  ;;  %v1841_v35 = vmax.f32 %v1809_v20, 0.0  ;;  %v1644_v36 = vadd.f32 %v2413_v38, %v1483_v25  ;;  %v1486_v37 = vadd.f32 %v2304_v30, %v3228_v0 }
 0x1b6   : > { %1873 = vst [vmem:[%s3323_s10 + $0x8] sm:$0xff] %v1841_v35  ;;  %v1771_v40 = vmul.f32 %v3309_v54, %v1644_v36  ;;  %v1647_v42 = vadd.f32 %v2416_v34, %v1486_v37  ;;  %v2305_v44 = vpop.f32.mrb[72].mxu0 }
 0x1b7   : > { %v2417_v48 = vpop.f32.mrb[72].mxu1  ;;  %v2306_v50 = vpop.f32.mrb[73].mxu0 }
 0x1b8   : > { %v1810_v51 = vadd.f32 %v3315_v61, %v1771_v40  ;;  %v1772_v59 = vmul.f32 %v3309_v54, %v1647_v42  ;;  %v2307_v52 = vadd.f32 %v2306_v50, %v2305_v44  ;;  %v2418_v56 = vpop.f32.mrb[73].mxu1  ;;  %v2308_v58 = vpop.f32.mrb[74].mxu0 }
 0x1b9   : > { %v2419_v60 = vadd.f32 %v2418_v56, %v2417_v48  ;;  %v2420_v33 = vpop.f32.mrb[74].mxu1  ;;  %v2309_v62 = vpop.f32.mrb[75].mxu0 }
 0x1ba   : > { %v1842_v0 = vmax.f32 %v1810_v51, 0.0  ;;  %v1811_v63 = vadd.f32 %v3315_v61, %v1772_v59  ;;  %v1491_v4 = vadd.f32 %v2307_v52, %v3235_v21  ;;  %v2310_v6 = vadd.f32 %v2309_v62, %v2308_v58  ;;  %v2421_v10 = vpop.f32.mrb[75].mxu1 }
 0x1bb   : > { %v2422_v12 = vadd.f32 %v2421_v10, %v2420_v33 }
 0x1bc   : > { %1874 = vst [vmem:[%s3323_s10 + $0x10] sm:$0xff] %v1842_v0  ;;  %v1843_v13 = vmax.f32 %v1811_v63, 0.0  ;;  %v1652_v14 = vadd.f32 %v2419_v60, %v1491_v4  ;;  %v1494_v15 = vadd.f32 %v2310_v6, %v3240_v26 }
 0x1be   : > { %1875 = vst [vmem:[%s3323_s10 + $0x18] sm:$0xff] %v1843_v13  ;;  %v1773_v38 = vmul.f32 %v3309_v54, %v1652_v14  ;;  %v1655_v16 = vadd.f32 %v2422_v12, %v1494_v15  ;;  %v2311_v17 = vpop.f32.mrb[76].mxu0 }
 0x1bf   : > { %v2423_v18 = vpop.f32.mrb[76].mxu1  ;;  %v2312_v20 = vpop.f32.mrb[77].mxu0 }
 0x1c0   : > { %v1812_v25 = vadd.f32 %v3315_v61, %v1773_v38  ;;  %v1774_v21 = vmul.f32 %v3309_v54, %v1655_v16  ;;  %v2313_v30 = vadd.f32 %v2312_v20, %v2311_v17  ;;  %v2424_v32 = vpop.f32.mrb[77].mxu1  ;;  %v2314_v34 = vpop.f32.mrb[78].mxu0 }
 0x1c1   : > { %v2425_v35 = vadd.f32 %v2424_v32, %v2423_v18  ;;  %v2426_v36 = vpop.f32.mrb[78].mxu1  ;;  %v2315_v37 = vpop.f32.mrb[79].mxu0 }
 0x1c2   : > { %v1844_v26 = vmax.f32 %v1812_v25, 0.0  ;;  %v1813_v40 = vadd.f32 %v3315_v61, %v1774_v21  ;;  %v1499_v42 = vadd.f32 %v2313_v30, %v3247_v49  ;;  %v2316_v44 = vadd.f32 %v2315_v37, %v2314_v34  ;;  %v2427_v48 = vpop.f32.mrb[79].mxu1 }
 0x1c3   : > { %v2428_v50 = vadd.f32 %v2427_v48, %v2426_v36 }
 0x1c4   : > { %1876 = vst [vmem:[%s3323_s10 + $0x20] sm:$0xff] %v1844_v26  ;;  %v1845_v51 = vmax.f32 %v1813_v40, 0.0  ;;  %v1660_v59 = vadd.f32 %v2425_v35, %v1499_v42  ;;  %v1502_v52 = vadd.f32 %v2316_v44, %v3251_v53 }
 0x1c6   : > { %1877 = vst [vmem:[%s3323_s10 + $0x28] sm:$0xff] %v1845_v51  ;;  %v1775_v56 = vmul.f32 %v3309_v54, %v1660_v59  ;;  %v1663_v58 = vadd.f32 %v2428_v50, %v1502_v52  ;;  %v2317_v60 = vpop.f32.mrb[80].mxu0 }
 0x1c7   : > { %v2429_v33 = vpop.f32.mrb[80].mxu1  ;;  %v2318_v62 = vpop.f32.mrb[81].mxu0 }
 0x1c8   : > { %v1814_v0 = vadd.f32 %v3315_v61, %v1775_v56  ;;  %v1776_v49 = vmul.f32 %v3309_v54, %v1663_v58  ;;  %v2319_v63 = vadd.f32 %v2318_v62, %v2317_v60  ;;  %v2430_v4 = vpop.f32.mrb[81].mxu1  ;;  %v2320_v6 = vpop.f32.mrb[82].mxu0 }
 0x1c9   : > { %v2431_v10 = vadd.f32 %v2430_v4, %v2429_v33  ;;  %v2432_v12 = vpop.f32.mrb[82].mxu1  ;;  %v2321_v13 = vpop.f32.mrb[83].mxu0 }
 0x1ca   : > { %v1846_v53 = vmax.f32 %v1814_v0, 0.0  ;;  %v1815_v14 = vadd.f32 %v3315_v61, %v1776_v49  ;;  %v1507_v15 = vadd.f32 %v2319_v63, %v3255_v7  ;;  %v2322_v38 = vadd.f32 %v2321_v13, %v2320_v6  ;;  %v2433_v16 = vpop.f32.mrb[83].mxu1 }
 0x1cb   : > { %v2434_v17 = vadd.f32 %v2433_v16, %v2432_v12 }
 0x1cc   : > { %1878 = vst [vmem:[%s3323_s10 + $0x30] sm:$0xff] %v1846_v53  ;;  %v1847_v18 = vmax.f32 %v1815_v14, 0.0  ;;  %v1668_v20 = vadd.f32 %v2431_v10, %v1507_v15  ;;  %v1510_v25 = vadd.f32 %v2322_v38, %v3257_v9 }
 0x1ce   : > { %1879 = vst [vmem:[%s3323_s10 + $0x38] sm:$0xff] %v1847_v18  ;;  %v1777_v21 = vmul.f32 %v3309_v54, %v1668_v20  ;;  %v1671_v30 = vadd.f32 %v2434_v17, %v1510_v25  ;;  %v2323_v32 = vpop.f32.mrb[84].mxu0 }
 0x1cf   : > { %v2435_v34 = vpop.f32.mrb[84].mxu1  ;;  %v2324_v35 = vpop.f32.mrb[85].mxu0 }
 0x1d0   : > { %v1816_v36 = vadd.f32 %v3315_v61, %v1777_v21  ;;  %v1778_v7 = vmul.f32 %v3309_v54, %v1671_v30  ;;  %v2325_v37 = vadd.f32 %v2324_v35, %v2323_v32  ;;  %v2436_v26 = vpop.f32.mrb[85].mxu1  ;;  %v2326_v40 = vpop.f32.mrb[86].mxu0 }
 0x1d1   : > { %v2437_v42 = vadd.f32 %v2436_v26, %v2435_v34  ;;  %v2438_v44 = vpop.f32.mrb[86].mxu1  ;;  %v2327_v48 = vpop.f32.mrb[87].mxu0 }
 0x1d2   : > { %v1848_v9 = vmax.f32 %v1816_v36, 0.0  ;;  %v1817_v50 = vadd.f32 %v3315_v61, %v1778_v7  ;;  %v1515_v51 = vadd.f32 %v2325_v37, %v3259_v22  ;;  %v2328_v59 = vadd.f32 %v2327_v48, %v2326_v40  ;;  %v2439_v52 = vpop.f32.mrb[87].mxu1 }
 0x1d3   : > { %v2440_v56 = vadd.f32 %v2439_v52, %v2438_v44 }
 0x1d4   : > { %1880 = vst [vmem:[%s3323_s10 + $0x40] sm:$0xff] %v1848_v9  ;;  %v1849_v58 = vmax.f32 %v1817_v50, 0.0  ;;  %v1676_v60 = vadd.f32 %v2437_v42, %v1515_v51  ;;  %v1518_v33 = vadd.f32 %v2328_v59, %v3261_v24 }
 0x1d6   : > { %1881 = vst [vmem:[%s3323_s10 + $0x48] sm:$0xff] %v1849_v58  ;;  %v1779_v62 = vmul.f32 %v3309_v54, %v1676_v60  ;;  %v1679_v0 = vadd.f32 %v2440_v56, %v1518_v33  ;;  %v2329_v49 = vpop.f32.mrb[88].mxu0 }
 0x1d7   : > { %v2441_v63 = vpop.f32.mrb[88].mxu1  ;;  %v2330_v4 = vpop.f32.mrb[89].mxu0 }
 0x1d8   : > { %v1818_v6 = vadd.f32 %v3315_v61, %v1779_v62  ;;  %v1780_v22 = vmul.f32 %v3309_v54, %v1679_v0  ;;  %v2331_v10 = vadd.f32 %v2330_v4, %v2329_v49  ;;  %v2442_v12 = vpop.f32.mrb[89].mxu1  ;;  %v2332_v13 = vpop.f32.mrb[90].mxu0 }
 0x1d9   : > { %v2443_v53 = vadd.f32 %v2442_v12, %v2441_v63  ;;  %v2444_v14 = vpop.f32.mrb[90].mxu1  ;;  %v2333_v15 = vpop.f32.mrb[91].mxu0 }
 0x1da   : > { %v1850_v24 = vmax.f32 %v1818_v6, 0.0  ;;  %v1819_v38 = vadd.f32 %v3315_v61, %v1780_v22  ;;  %v1523_v16 = vadd.f32 %v2331_v10, %v3263_v39  ;;  %v2334_v17 = vadd.f32 %v2333_v15, %v2332_v13  ;;  %v2445_v18 = vpop.f32.mrb[91].mxu1 }
 0x1db   : > { %v2446_v20 = vadd.f32 %v2445_v18, %v2444_v14 }
 0x1dc   : > { %1882 = vst [vmem:[%s3323_s10 + $0x50] sm:$0xff] %v1850_v24  ;;  %v1851_v25 = vmax.f32 %v1819_v38, 0.0  ;;  %v1684_v21 = vadd.f32 %v2443_v53, %v1523_v16  ;;  %v1526_v30 = vadd.f32 %v2334_v17, %v3265_v41 }
 0x1de   : > { %1883 = vst [vmem:[%s3323_s10 + $0x58] sm:$0xff] %v1851_v25  ;;  %v1781_v32 = vmul.f32 %v3309_v54, %v1684_v21  ;;  %v1687_v34 = vadd.f32 %v2446_v20, %v1526_v30  ;;  %v2335_v35 = vpop.f32.mrb[92].mxu0 }
 0x1df   : > { %v2447_v36 = vpop.f32.mrb[92].mxu1  ;;  %v2336_v7 = vpop.f32.mrb[93].mxu0 }
 0x1e0   : > { %v1820_v37 = vadd.f32 %v3315_v61, %v1781_v32  ;;  %v1782_v39 = vmul.f32 %v3309_v54, %v1687_v34  ;;  %v2337_v26 = vadd.f32 %v2336_v7, %v2335_v35  ;;  %v2448_v40 = vpop.f32.mrb[93].mxu1  ;;  %v2338_v42 = vpop.f32.mrb[94].mxu0 }
 0x1e1   : > { %v2449_v44 = vadd.f32 %v2448_v40, %v2447_v36  ;;  %v2450_v48 = vpop.f32.mrb[94].mxu1  ;;  %v2339_v9 = vpop.f32.mrb[95].mxu0 }
 0x1e2   : > { %v1852_v41 = vmax.f32 %v1820_v37, 0.0  ;;  %v1821_v50 = vadd.f32 %v3315_v61, %v1782_v39  ;;  %v1531_v51 = vadd.f32 %v2337_v26, %v3267_v55  ;;  %v2340_v59 = vadd.f32 %v2339_v9, %v2338_v42  ;;  %v2451_v52 = vpop.f32.mrb[95].mxu1 }
 0x1e3   : > { %v2452_v56 = vadd.f32 %v2451_v52, %v2450_v48 }
 0x1e4   : > { %1884 = vst [vmem:[%s3323_s10 + $0x60] sm:$0xff] %v1852_v41  ;;  %v1853_v58 = vmax.f32 %v1821_v50, 0.0  ;;  %v1692_v60 = vadd.f32 %v2449_v44, %v1531_v51  ;;  %v1534_v33 = vadd.f32 %v2340_v59, %v3269_v57 }
 0x1e6   : > { %1885 = vst [vmem:[%s3323_s10 + $0x68] sm:$0xff] %v1853_v58  ;;  %v1783_v62 = vmul.f32 %v3309_v54, %v1692_v60  ;;  %v1695_v0 = vadd.f32 %v2452_v56, %v1534_v33  ;;  %v2341_v49 = vpop.f32.mrb[96].mxu0 }
 0x1e7   : > { %v2453_v63 = vpop.f32.mrb[96].mxu1  ;;  %v2342_v4 = vpop.f32.mrb[97].mxu0 }
 0x1e8   : > { %v1822_v6 = vadd.f32 %v3315_v61, %v1783_v62  ;;  %v1784_v55 = vmul.f32 %v3309_v54, %v1695_v0  ;;  %v2343_v22 = vadd.f32 %v2342_v4, %v2341_v49  ;;  %v2454_v10 = vpop.f32.mrb[97].mxu1  ;;  %v2344_v12 = vpop.f32.mrb[98].mxu0 }
 0x1e9   : > { %v2455_v13 = vadd.f32 %v2454_v10, %v2453_v63  ;;  %v2456_v53 = vpop.f32.mrb[98].mxu1  ;;  %v2345_v14 = vpop.f32.mrb[99].mxu0 }
 0x1ea   : > { %v1854_v57 = vmax.f32 %v1822_v6, 0.0  ;;  %v1823_v15 = vadd.f32 %v3315_v61, %v1784_v55  ;;  %v1539_v24 = vadd.f32 %v2343_v22, %v3271_v8  ;;  %v2346_v38 = vadd.f32 %v2345_v14, %v2344_v12  ;;  %v2457_v16 = vpop.f32.mrb[99].mxu1 }
 0x1eb   : > { %v2458_v17 = vadd.f32 %v2457_v16, %v2456_v53 }
 0x1ec   : > { %1886 = vst [vmem:[%s3323_s10 + $0x70] sm:$0xff] %v1854_v57  ;;  %v1855_v18 = vmax.f32 %v1823_v15, 0.0  ;;  %v1700_v20 = vadd.f32 %v2455_v13, %v1539_v24  ;;  %v1542_v25 = vadd.f32 %v2346_v38, %v3273_v11 }
 0x1ee   : > { %1887 = vst [vmem:[%s3323_s10 + $0x78] sm:$0xff] %v1855_v18  ;;  %v1785_v21 = vmul.f32 %v3309_v54, %v1700_v20  ;;  %v1703_v30 = vadd.f32 %v2458_v17, %v1542_v25  ;;  %v2347_v32 = vpop.f32.mrb[100].mxu0 }
 0x1ef   : > { %v2459_v34 = vpop.f32.mrb[100].mxu1  ;;  %v2348_v35 = vpop.f32.mrb[101].mxu0 }
 0x1f0   : > { %v1824_v36 = vadd.f32 %v3315_v61, %v1785_v21  ;;  %v1786_v8 = vmul.f32 %v3309_v54, %v1703_v30  ;;  %v2349_v7 = vadd.f32 %v2348_v35, %v2347_v32  ;;  %v2460_v37 = vpop.f32.mrb[101].mxu1  ;;  %v2350_v39 = vpop.f32.mrb[102].mxu0 }
 0x1f1   : > { %v2461_v26 = vadd.f32 %v2460_v37, %v2459_v34  ;;  %v2462_v40 = vpop.f32.mrb[102].mxu1  ;;  %v2351_v42 = vpop.f32.mrb[103].mxu0 }
 0x1f2   : > { %v1856_v11 = vmax.f32 %v1824_v36, 0.0  ;;  %v1825_v44 = vadd.f32 %v3315_v61, %v1786_v8  ;;  %v1547_v48 = vadd.f32 %v2349_v7, %v3275_v27  ;;  %v2352_v9 = vadd.f32 %v2351_v42, %v2350_v39  ;;  %v2463_v41 = vpop.f32.mrb[103].mxu1 }
 0x1f3   : > { %v2464_v50 = vadd.f32 %v2463_v41, %v2462_v40 }
 0x1f4   : > { %1888 = vst [vmem:[%s3323_s10 + $0x80] sm:$0xff] %v1856_v11  ;;  %v1857_v51 = vmax.f32 %v1825_v44, 0.0  ;;  %v1708_v59 = vadd.f32 %v2461_v26, %v1547_v48  ;;  %v1550_v52 = vadd.f32 %v2352_v9, %v3277_v29 }
 0x1f6   : > { %1889 = vst [vmem:[%s3323_s10 + $0x88] sm:$0xff] %v1857_v51  ;;  %v1787_v56 = vmul.f32 %v3309_v54, %v1708_v59  ;;  %v1711_v58 = vadd.f32 %v2464_v50, %v1550_v52  ;;  %v2353_v60 = vpop.f32.mrb[104].mxu0 }
 0x1f7   : > { %v2465_v33 = vpop.f32.mrb[104].mxu1  ;;  %v2354_v62 = vpop.f32.mrb[105].mxu0 }
 0x1f8   : > { %v1826_v0 = vadd.f32 %v3315_v61, %v1787_v56  ;;  %v1788_v27 = vmul.f32 %v3309_v54, %v1711_v58  ;;  %v2355_v49 = vadd.f32 %v2354_v62, %v2353_v60  ;;  %v2466_v63 = vpop.f32.mrb[105].mxu1  ;;  %v2356_v4 = vpop.f32.mrb[106].mxu0 }
 0x1f9   : > { %v2467_v6 = vadd.f32 %v2466_v63, %v2465_v33  ;;  %v2468_v55 = vpop.f32.mrb[106].mxu1  ;;  %v2357_v22 = vpop.f32.mrb[107].mxu0 }
 0x1fa   : > { %v1858_v29 = vmax.f32 %v1826_v0, 0.0  ;;  %v1827_v10 = vadd.f32 %v3315_v61, %v1788_v27  ;;  %v1555_v12 = vadd.f32 %v2355_v49, %v3279_v45  ;;  %v2358_v13 = vadd.f32 %v2357_v22, %v2356_v4  ;;  %v2469_v53 = vpop.f32.mrb[107].mxu1 }
 0x1fb   : > { %v2470_v14 = vadd.f32 %v2469_v53, %v2468_v55 }
 0x1fc   : > { %1890 = vst [vmem:[%s3323_s10 + $0x90] sm:$0xff] %v1858_v29  ;;  %v1859_v57 = vmax.f32 %v1827_v10, 0.0  ;;  %v1716_v15 = vadd.f32 %v2467_v6, %v1555_v12  ;;  %v1558_v24 = vadd.f32 %v2358_v13, %v3281_v47 }
 0x1fe   : > { %1891 = vst [vmem:[%s3323_s10 + $0x98] sm:$0xff] %v1859_v57  ;;  %v1789_v38 = vmul.f32 %v3309_v54, %v1716_v15  ;;  %v1719_v16 = vadd.f32 %v2470_v14, %v1558_v24  ;;  %v2359_v17 = vpop.f32.mrb[108].mxu0 }
 0x1ff   : > { %v2471_v18 = vpop.f32.mrb[108].mxu1  ;;  %v2360_v20 = vpop.f32.mrb[109].mxu0 }
 0x200   : > { %v1828_v25 = vadd.f32 %v3315_v61, %v1789_v38  ;;  %v1790_v45 = vmul.f32 %v3309_v54, %v1719_v16  ;;  %v2361_v21 = vadd.f32 %v2360_v20, %v2359_v17  ;;  %v2472_v30 = vpop.f32.mrb[109].mxu1  ;;  %v2362_v32 = vpop.f32.mrb[110].mxu0 }
 0x201   : > { %v2473_v34 = vadd.f32 %v2472_v30, %v2471_v18  ;;  %v2474_v35 = vpop.f32.mrb[110].mxu1  ;;  %v2363_v36 = vpop.f32.mrb[111].mxu0 }
 0x202   : > { %v1860_v47 = vmax.f32 %v1828_v25, 0.0  ;;  %v1829_v8 = vadd.f32 %v3315_v61, %v1790_v45  ;;  %v1563_v7 = vadd.f32 %v2361_v21, %v3283_v1  ;;  %v2364_v37 = vadd.f32 %v2363_v36, %v2362_v32  ;;  %v2475_v39 = vpop.f32.mrb[111].mxu1 }
 0x203   : > { %v2476_v26 = vadd.f32 %v2475_v39, %v2474_v35 }
 0x204   : > { %1892 = vst [vmem:[%s3323_s10 + $0xa0] sm:$0xff] %v1860_v47  ;;  %v1861_v40 = vmax.f32 %v1829_v8, 0.0  ;;  %v1724_v42 = vadd.f32 %v2473_v34, %v1563_v7  ;;  %v1566_v11 = vadd.f32 %v2364_v37, %v3285_v3 }
 0x206   : > { %1893 = vst [vmem:[%s3323_s10 + $0xa8] sm:$0xff] %v1861_v40  ;;  %v1791_v44 = vmul.f32 %v3309_v54, %v1724_v42  ;;  %v1727_v48 = vadd.f32 %v2476_v26, %v1566_v11  ;;  %v2365_v9 = vpop.f32.mrb[112].mxu0 }
 0x207   : > { %v2477_v41 = vpop.f32.mrb[112].mxu1  ;;  %v2366_v50 = vpop.f32.mrb[113].mxu0 }
 0x208   : > { %v1830_v51 = vadd.f32 %v3315_v61, %v1791_v44  ;;  %v1792_v1 = vmul.f32 %v3309_v54, %v1727_v48  ;;  %v2367_v59 = vadd.f32 %v2366_v50, %v2365_v9  ;;  %v2478_v52 = vpop.f32.mrb[113].mxu1  ;;  %v2368_v56 = vpop.f32.mrb[114].mxu0 }
 0x209   : > { %v2479_v58 = vadd.f32 %v2478_v52, %v2477_v41  ;;  %v2480_v60 = vpop.f32.mrb[114].mxu1  ;;  %v2369_v33 = vpop.f32.mrb[115].mxu0 }
 0x20a   : > { %v1862_v3 = vmax.f32 %v1830_v51, 0.0  ;;  %v1831_v62 = vadd.f32 %v3315_v61, %v1792_v1  ;;  %v1571_v0 = vadd.f32 %v2367_v59, %v3287_v19  ;;  %v2370_v27 = vadd.f32 %v2369_v33, %v2368_v56  ;;  %v2481_v49 = vpop.f32.mrb[115].mxu1 }
 0x20b   : > { %v2482_v63 = vadd.f32 %v2481_v49, %v2480_v60 }
 0x20c   : > { %1894 = vst [vmem:[%s3323_s10 + $0xb0] sm:$0xff] %v1862_v3  ;;  %v1863_v4 = vmax.f32 %v1831_v62, 0.0  ;;  %v1732_v6 = vadd.f32 %v2479_v58, %v1571_v0  ;;  %v1574_v55 = vadd.f32 %v2370_v27, %v3289_v23 }
 0x20e   : > { %1895 = vst [vmem:[%s3323_s10 + $0xb8] sm:$0xff] %v1863_v4  ;;  %v1793_v22 = vmul.f32 %v3309_v54, %v1732_v6  ;;  %v1735_v29 = vadd.f32 %v2482_v63, %v1574_v55  ;;  %v2371_v10 = vpop.f32.mrb[116].mxu0 }
 0x20f   : > { %v2483_v12 = vpop.f32.mrb[116].mxu1  ;;  %v2372_v13 = vpop.f32.mrb[117].mxu0 }
 0x210   : > { %v1832_v53 = vadd.f32 %v3315_v61, %v1793_v22  ;;  %v1794_v19 = vmul.f32 %v3309_v54, %v1735_v29  ;;  %v2373_v14 = vadd.f32 %v2372_v13, %v2371_v10  ;;  %v2484_v57 = vpop.f32.mrb[117].mxu1  ;;  %v2374_v15 = vpop.f32.mrb[118].mxu0 }
 0x211   : > { %v2485_v24 = vadd.f32 %v2484_v57, %v2483_v12  ;;  %v2486_v38 = vpop.f32.mrb[118].mxu1  ;;  %v2375_v16 = vpop.f32.mrb[119].mxu0 }
 0x212   : > { %v1864_v23 = vmax.f32 %v1832_v53, 0.0  ;;  %v1833_v17 = vadd.f32 %v3315_v61, %v1794_v19  ;;  %v1579_v18 = vadd.f32 %v2373_v14, %v3291_v43  ;;  %v2376_v20 = vadd.f32 %v2375_v16, %v2374_v15  ;;  %v2487_v25 = vpop.f32.mrb[119].mxu1 }
 0x213   : > { %v2488_v45 = vadd.f32 %v2487_v25, %v2486_v38 }
 0x214   : > { %1896 = vst [vmem:[%s3323_s10 + $0xc0] sm:$0xff] %v1864_v23  ;;  %v1865_v21 = vmax.f32 %v1833_v17, 0.0  ;;  %v1740_v30 = vadd.f32 %v2485_v24, %v1579_v18  ;;  %v1582_v32 = vadd.f32 %v2376_v20, %v3293_v46 }
 0x216   : > { %1897 = vst [vmem:[%s3323_s10 + $0xc8] sm:$0xff] %v1865_v21  ;;  %v1795_v34 = vmul.f32 %v3309_v54, %v1740_v30  ;;  %v1743_v35 = vadd.f32 %v2488_v45, %v1582_v32  ;;  %v2377_v36 = vpop.f32.mrb[120].mxu0 }
 0x217   : > { %v2489_v47 = vpop.f32.mrb[120].mxu1  ;;  %v2378_v8 = vpop.f32.mrb[121].mxu0 }
 0x218   : > { %v1834_v7 = vadd.f32 %v3315_v61, %v1795_v34  ;;  %v1796_v43 = vmul.f32 %v3309_v54, %v1743_v35  ;;  %v2379_v37 = vadd.f32 %v2378_v8, %v2377_v36  ;;  %v2490_v39 = vpop.f32.mrb[121].mxu1  ;;  %v2380_v26 = vpop.f32.mrb[122].mxu0 }
 0x219   : > { %v2491_v40 = vadd.f32 %v2490_v39, %v2489_v47  ;;  %v2492_v42 = vpop.f32.mrb[122].mxu1  ;;  %v2381_v11 = vpop.f32.mrb[123].mxu0 }
 0x21a   : > { %v1866_v46 = vmax.f32 %v1834_v7, 0.0  ;;  %v1835_v44 = vadd.f32 %v3315_v61, %v1796_v43  ;;  %v1587_v48 = vadd.f32 %v2379_v37, %v3295_v2  ;;  %v2382_v9 = vadd.f32 %v2381_v11, %v2380_v26  ;;  %v2493_v41 = vpop.f32.mrb[123].mxu1 }
 0x21b   : > { %v2494_v50 = vadd.f32 %v2493_v41, %v2492_v42 }
 0x21c   : > { %1898 = vst [vmem:[%s3323_s10 + $0xd0] sm:$0xff] %v1866_v46  ;;  %v1867_v51 = vmax.f32 %v1835_v44, 0.0  ;;  %v1748_v1 = vadd.f32 %v2491_v40, %v1587_v48  ;;  %v1590_v59 = vadd.f32 %v2382_v9, %v3297_v5 }
 0x21e   : > { %1899 = vst [vmem:[%s3323_s10 + $0xd8] sm:$0xff] %v1867_v51  ;;  %v1797_v52 = vmul.f32 %v3309_v54, %v1748_v1  ;;  %v1751_v56 = vadd.f32 %v2494_v50, %v1590_v59  ;;  %v2383_v58 = vpop.f32.mrb[124].mxu0 }
 0x21f   : > { %v2495_v60 = vpop.f32.mrb[124].mxu1  ;;  %v2384_v33 = vpop.f32.mrb[125].mxu0 }
 0x220   : > { %v1836_v3 = vadd.f32 %v3315_v61, %v1797_v52  ;;  %v1798_v2 = vmul.f32 %v3309_v54, %v1751_v56  ;;  %v2385_v62 = vadd.f32 %v2384_v33, %v2383_v58  ;;  %v2496_v0 = vpop.f32.mrb[125].mxu1  ;;  %v2386_v27 = vpop.f32.mrb[126].mxu0 }
 0x221   : > { %v2497_v49 = vadd.f32 %v2496_v0, %v2495_v60  ;;  %v2498_v63 = vpop.f32.mrb[126].mxu1  ;;  %v2387_v4 = vpop.f32.mrb[127].mxu0 }
 0x222   : > { %v1868_v5 = vmax.f32 %v1836_v3, 0.0  ;;  %v1837_v6 = vadd.f32 %v3315_v61, %v1798_v2  ;;  %v1595_v55 = vadd.f32 %v2385_v62, %v3299_v28  ;;  %v2388_v22 = vadd.f32 %v2387_v4, %v2386_v27  ;;  %v2499_v29 = vpop.f32.mrb[127].mxu1 }
 0x223   : > { %v2500_v10 = vadd.f32 %v2499_v29, %v2498_v63 }
 0x224   : > { %1900 = vst [vmem:[%s3323_s10 + $0xe0] sm:$0xff] %v1868_v5  ;;  %v1869_v12 = vmax.f32 %v1837_v6, 0.0  ;;  %v1756_v13 = vadd.f32 %v2497_v49, %v1595_v55  ;;  %v1598_v53 = vadd.f32 %v2388_v22, %v3303_v31 }
 0x226   : > { %1901 = vst [vmem:[%s3323_s10 + $0xe8] sm:$0xff] %v1869_v12  ;;  %v1799_v19 = vmul.f32 %v3309_v54, %v1756_v13  ;;  %v1759_v14 = vadd.f32 %v2500_v10, %v1598_v53 }
 0x228   : > { %v1838_v57 = vadd.f32 %v3315_v61, %v1799_v19  ;;  %v1800_v15 = vmul.f32 %v3309_v54, %v1759_v14 }
 0x22a   : > { %v1870_v24 = vmax.f32 %v1838_v57, 0.0  ;;  %v1839_v28 = vadd.f32 %v3315_v61, %v1800_v15 }
 0x22c   : > { %1902 = vst [vmem:[%s3323_s10 + $0xf0] sm:$0xff] %v1870_v24  ;;  %v1871_v38 = vmax.f32 %v1839_v28, 0.0 }
 0x22e   : > { %1903 = vst [vmem:[%s3323_s10 + $0xf8] sm:$0xff] %v1871_v38 }
 0x22f PF: > { %p14_p8 = scmp.ge.s32.totalorder %s2720_s20, 4   ;;  %s3469_s15 = smov %s2662_s16 }
 0x230   : > { %s3470_s16 = smov %s2666_s17  ;;  %s3471_s17 = smov %s2730_s23 }
 0x231   : > { %s3472_s18 = smov %s2720_s20  ;;  %16 = sbr.rel (!%p14_p8) target bundleno = 3 (0x3), region = 76 }
 0x238   :  { %1926 = vsyncpa [#allocation3], 1 }
 0x239   :  { %1928 = vsyncpa [#allocation3 + $0x1], 1 }

// kernel: pen_forward.3
= control target key start
LH: loop header
LB: loop body
LE: loop exit
PB: predicated region body
PF: predicated region fallthrough
CT: control target
= control target key end

     0   :  { %s10369_s27 = smov 0   ;;  %s12032_s0 = inlined_call_operand.vmem [shape: f32[2,256,128], index: 0, kind: input, shape index: {}]   ;;  %s12033_s1 = inlined_call_operand.vmem [shape: bf16[9,128,64], index: 1, kind: input, shape index: {}]   ;;  %s12034_s2 = inlined_call_operand.vmem [shape: bf16[9,64,64], index: 2, kind: input, shape index: {}]   ;;  %s12035_s3 = inlined_call_operand.vmem [shape: bf16[9,64,128], index: 3, kind: input, shape index: {}]   ;;  %s12036_s4 = inlined_call_operand.vmem [shape: f32[1,64], index: 4, kind: input, shape index: {}]   ;;  %s12037_s5 = inlined_call_operand.vmem [shape: f32[1,64], index: 5, kind: input, shape index: {}]   ;;  %s12038_s6 = inlined_call_operand.vmem [shape: f32[1,64], index: 6, kind: input, shape index: {}]   ;;  %s12039_s7 = inlined_call_operand.vmem [shape: f32[1,64], index: 7, kind: input, shape index: {}]   ;;  %s12040_s8 = inlined_call_operand.vmem [shape: f32[2,154,128], index: 8, kind: output, shape index: {}]  }
   0x1 LB: > { %s7470_s28 = sadd.s32 4294967295, %s10322_s27   ;;  %p7474_p0 = scmp.ge.s32.totalorder %s10322_s27, 1  ;;  %s10322_s27 = sphi %s10369_s27, %s18_s27  }
   0x2   : > { %p262_p1 = scmp.lt.s32.totalorder %s10322_s27, 3 }
   0x4   : > { %p263_p2 = pnand %p7474_p0, %p262_p1 }
   0x5   : > { %v10092_v0 = vld [vmem:[%s12033_s1 + $0x40] sm:$0xff] (!%p263_p2)   ;;  %p296_p3 = scmp.lt.s32.totalorder (!%p263_p2), %s7470_s28, 1  ;;  %v10093_v1 = vld [vmem:[%s12033_s1 + $0x48] sm:$0xff] (!%p263_p2)   ;;  %v10094_v2 = vld [vmem:[%s12033_s1 + $0x50] sm:$0xff] (!%p263_p2)   ;;  %vm2868_vm0 = vcmask (!%p263_p2), 523264   ;;  %vm2896_vm1 = vcmask (!%p263_p2), 521216  }
   0x6   : > { %266 = sbr.rel (%p263_p2) target bundleno = 1805 (0x70d), region = 52  ;;  %8571 = vmatprep.subr.bf16.mxu0 (!%p263_p2), %v10092_v0  ;;  %v10095_v3 = vld [vmem:[%s12033_s1 + $0x58] sm:$0xff] (!%p263_p2)   ;;  %v10096_v7 = vld [vmem:[%s12033_s1 + $0x60] sm:$0xff] (!%p263_p2)   ;;  %v10097_v8 = vld [vmem:[%s12033_s1 + $0x68] sm:$0xff] (!%p263_p2)   ;;  %vm5280_vm2 = vcmask (!%p263_p2), 519168  }
   0x7   : > { %8572 = vmatpush3.bf16.msra.mxu0 (!%p263_p2), %v10092_v0  ;;  %v10098_v9 = vld [vmem:[%s12033_s1 + $0x70] sm:$0xff] (!%p263_p2)   ;;  %v10099_v10 = vld [vmem:[%s12033_s1 + $0x78] sm:$0xff] (!%p263_p2)   ;;  %v10100_v13 = vld [vmem:[%s12033_s1] sm:$0xff] (!%p263_p2)  }
   0x8   : > { %8573 = vmatprep.subr.bf16.mxu0 (!%p263_p2), %v10093_v1  ;;  %v10101_v18 = vld [vmem:[%s12033_s1 + $0x8] sm:$0xff] (!%p263_p2)   ;;  %v10102_v21 = vld [vmem:[%s12033_s1 + $0x10] sm:$0xff] (!%p263_p2)   ;;  %v10103_v26 = vld [vmem:[%s12033_s1 + $0x18] sm:$0xff] (!%p263_p2)  }
   0x9   : > { %v10104_v31 = vld [vmem:[%s12033_s1 + $0x20] sm:$0xff] (!%p263_p2)   ;;  %v10105_v34 = vld [vmem:[%s12033_s1 + $0x28] sm:$0xff] (!%p263_p2)   ;;  %v10106_v39 = vld [vmem:[%s12033_s1 + $0x30] sm:$0xff] (!%p263_p2)  }
   0xa   : > { %v10107_v42 = vld [vmem:[%s12033_s1 + $0x38] sm:$0xff] (!%p263_p2)   ;;  %v10108_v47 = vld [vmem:[%s12033_s1 + $0x80] sm:$0xff] (!%p263_p2)  }
   0xb   : > { %8574 = vmatpush3.bf16.msra.mxu0 (!%p263_p2), %v10093_v1 }
   0xc   : > { %8575 = vmatprep.subr.bf16.mxu0 (!%p263_p2), %v10094_v2 }
   0xd   : > { %s12042_s28 = smov (!%p296_p3, %s7470_s28), 1 }
   0xe   : > { %s8102_s13 = sshll.u32 %s12042_s28, 8 }
   0xf   : > { %s10392_s16 = scalar_lea.vmem %s12032_s0, %s8102_s13  ;;  %8576 = vmatpush3.bf16.msra.mxu0 %v10094_v2  ;;  %s10083_s13 = smul.u32 160, %s12042_s28 }
  0x10   : > { %v365_v4 = vld [vmem:[%s10392_s16 + $0x1] sm:$0xff]  ;;  %v366_v5 = vld [vmem:[%s10392_s16 + $0x9] sm:$0xff]  ;;  %8577 = vmatprep.subr.bf16.mxu0 %v10095_v3  ;;  %v367_v11 = vld [vmem:[%s10392_s16 + $0x11] sm:$0xff] }
  0x11   : > { %v393_v6 = vpack.c.bf16 %v366_v5, %v365_v4  ;;  %v368_v12 = vld [vmem:[%s10392_s16 + $0x19] sm:$0xff]  ;;  %v369_v14 = vld [vmem:[%s10392_s16 + $0x21] sm:$0xff]  ;;  %v370_v15 = vld [vmem:[%s10392_s16 + $0x29] sm:$0xff]  ;;  %s12000_s17 = scalar_lea.vmem %s12040_s8, %s10083_s13 }
  0x12   : > { %v10418_v16 = vpack.c.bf16 %v368_v12, %v367_v11  ;;  %v10420_v17 = vpack.c.bf16 %v370_v15, %v369_v14  ;;  %v371_v19 = vld [vmem:[%s10392_s16 + $0x31] sm:$0xff]  ;;  %v372_v20 = vld [vmem:[%s10392_s16 + $0x39] sm:$0xff]  ;;  %v373_v22 = vld [vmem:[%s10392_s16 + $0x41] sm:$0xff] }
  0x13   : > { %8587 = vmatprep.mubr.bf16.mxu0 %v393_v6  ;;  %8578 = vmatpush3.bf16.msra.mxu0 %v10095_v3  ;;  %v374_v23 = vld [vmem:[%s10392_s16 + $0x49] sm:$0xff]  ;;  %v10434_v24 = vpack.c.bf16 %v372_v20, %v371_v19  ;;  %v375_v27 = vld [vmem:[%s10392_s16 + $0x51] sm:$0xff]  ;;  %v376_v28 = vld [vmem:[%s10392_s16 + $0x59] sm:$0xff] }
  0x14   : > { %8579 = vmatprep.subr.bf16.mxu0 %v10096_v7  ;;  %v10436_v25 = vpack.c.bf16 %v374_v23, %v373_v22  ;;  %v377_v29 = vld [vmem:[%s10392_s16 + $0x61] sm:$0xff]  ;;  %v378_v30 = vld [vmem:[%s10392_s16 + $0x69] sm:$0xff]  ;;  %v10450_v32 = vpack.c.bf16 %v376_v28, %v375_v27  ;;  %v379_v35 = vld [vmem:[%s10392_s16 + $0x71] sm:$0xff] }
  0x15   : > { %v10452_v33 = vpack.c.bf16 %v378_v30, %v377_v29  ;;  %v380_v36 = vld [vmem:[%s10392_s16 + $0x79] sm:$0xff]  ;;  %v381_v37 = vld [vmem:[%s10392_s16 + $0x81] sm:$0xff]  ;;  %v382_v38 = vld [vmem:[%s10392_s16 + $0x89] sm:$0xff] }
  0x16   : > { %v10466_v40 = vpack.c.bf16 %v380_v36, %v379_v35  ;;  %v10468_v41 = vpack.c.bf16 %v382_v38, %v381_v37  ;;  %v383_v43 = vld [vmem:[%s10392_s16 + $0x91] sm:$0xff]  ;;  %v384_v44 = vld [vmem:[%s10392_s16 + $0x99] sm:$0xff]  ;;  %v385_v45 = vld [vmem:[%s10392_s16 + $0xa1] sm:$0xff] }
  0x17   : > { %8580 = vmatpush3.bf16.msra.mxu0 %v10096_v7  ;;  %v386_v46 = vld [vmem:[%s10392_s16 + $0xa9] sm:$0xff]  ;;  %v10482_v48 = vpack.c.bf16 %v384_v44, %v383_v43  ;;  %v387_v50 = vld [vmem:[%s10392_s16 + $0xb1] sm:$0xff]  ;;  %v388_v51 = vld [vmem:[%s10392_s16 + $0xb9] sm:$0xff] }
  0x18   : > { %8581 = vmatprep.subr.bf16.mxu0 %v10097_v8  ;;  %v10484_v49 = vpack.c.bf16 %v386_v46, %v385_v45  ;;  %v389_v52 = vld [vmem:[%s10392_s16 + $0xc1] sm:$0xff]  ;;  %v390_v53 = vld [vmem:[%s10392_s16 + $0xc9] sm:$0xff]  ;;  %v10492_v54 = vpack.c.bf16 %v388_v51, %v387_v50  ;;  %v10497_v56 = vld [vmem:[%s10392_s16 + $0xd1] sm:$0xff] }
  0x19   : > { %v10494_v55 = vpack.c.bf16 %v390_v53, %v389_v52  ;;  %v392_v57 = vld [vmem:[%s10392_s16 + $0xd9] sm:$0x3f]  ;;  %v307_v58 = vld [vmem:[%s10392_s16] sm:$0xff]  ;;  %v308_v59 = vld [vmem:[%s10392_s16 + $0x8] sm:$0xff] }
  0x1a   : > { %v406_v60 = vpack.c.bf16 %v392_v57, %v10497_v56  ;;  %v335_v61 = vpack.c.bf16 %v308_v59, %v307_v58  ;;  %v309_v62 = vld [vmem:[%s10392_s16 + $0x10] sm:$0xff]  ;;  %v310_v63 = vld [vmem:[%s10392_s16 + $0x18] sm:$0xff]  ;;  %v311_v0 = vld [vmem:[%s10392_s16 + $0x20] sm:$0xff] }
  0x1b   : > { %8582 = vmatpush3.bf16.msra.mxu0 %v10097_v8  ;;  %v312_v1 = vld [vmem:[%s10392_s16 + $0x28] sm:$0xff]  ;;  %v10509_v2 = vpack.c.bf16 %v310_v63, %v309_v62  ;;  %v313_v5 = vld [vmem:[%s10392_s16 + $0x30] sm:$0xff]  ;;  %v314_v6 = vld [vmem:[%s10392_s16 + $0x38] sm:$0xff] }
  0x1c   : > { %8583 = vmatprep.subr.bf16.mxu0 %v10098_v9  ;;  %v10109_v3 = vld [vmem:[%s12033_s1 + $0x88] sm:$0xff]   ;;  %v10514_v4 = vpack.c.bf16 %v312_v1, %v311_v0  ;;  %v10110_v7 = vld [vmem:[%s12033_s1 + $0x90] sm:$0xff]   ;;  %v315_v8 = vld [vmem:[%s10392_s16 + $0x40] sm:$0xff] }
  0x1d   : > { %v10111_v11 = vld [vmem:[%s12033_s1 + $0x98] sm:$0xff]   ;;  %v319_v15 = vld [vmem:[%s10392_s16 + $0x60] sm:$0xff]  ;;  %v321_v23 = vld [vmem:[%s10392_s16 + $0x70] sm:$0xff] }
  0x1e   : > { %v318_v14 = vld [vmem:[%s10392_s16 + $0x58] sm:$0xff]  ;;  %v10112_v19 = vld [vmem:[%s12033_s1 + $0xa0] sm:$0xff]   ;;  %v324_v28 = vld [vmem:[%s10392_s16 + $0x88] sm:$0xff] }
  0x1f   : > { %8584 = vmatpush3.bf16.msra.mxu0 %v10098_v9  ;;  %v316_v9 = vld [vmem:[%s10392_s16 + $0x48] sm:$0xff]  ;;  %v323_v27 = vld [vmem:[%s10392_s16 + $0x80] sm:$0xff]  ;;  %v10114_v29 = vld [vmem:[%s12033_s1 + $0xb0] sm:$0xff]  }
  0x20   : > { %8585 = vmatprep.subr.bf16.mxu0 %v10099_v10  ;;  %v10530_v12 = vpack.c.bf16 %v316_v9, %v315_v8  ;;  %v325_v35 = vld [vmem:[%s10392_s16 + $0x90] sm:$0xff]  ;;  %v326_v36 = vld [vmem:[%s10392_s16 + $0x98] sm:$0xff]  ;;  %v327_v37 = vld [vmem:[%s10392_s16 + $0xa0] sm:$0xff] }
  0x21   : > { %v328_v38 = vld [vmem:[%s10392_s16 + $0xa8] sm:$0xff]  ;;  %v329_v44 = vld [vmem:[%s10392_s16 + $0xb0] sm:$0xff]  ;;  %v330_v45 = vld [vmem:[%s10392_s16 + $0xb8] sm:$0xff] }
  0x22   : > { %v10575_v43 = vpack.c.bf16 %v328_v38, %v327_v37  ;;  %v331_v46 = vld [vmem:[%s10392_s16 + $0xc0] sm:$0xff]  ;;  %v10583_v50 = vpack.c.bf16 %v330_v45, %v329_v44  ;;  %v10588_v52 = vld [vmem:[%s10392_s16 + $0xd0] sm:$0xff]  ;;  %v334_v53 = vld [vmem:[%s10392_s16 + $0xd8] sm:$0x3f] }
  0x23   : > { %8586 = vmatpush3.bf16.msra.mxu0 %v10099_v10  ;;  %v10525_v10 = vpack.c.bf16 %v314_v6, %v313_v5  ;;  %v810_v57 = vld [vmem:[%s10392_s16 + $0x2] sm:$0xff]  ;;  %v811_v58 = vld [vmem:[%s10392_s16 + $0xa] sm:$0xff]  ;;  %v348_v59 = vpack.c.bf16 %v334_v53, %v10588_v52  ;;  %v813_v62 = vld [vmem:[%s10392_s16 + $0x1a] sm:$0xff] }
  0x24   : > { %8615 = vmatprep.subr.bf16.mxu0 %v10100_v13  ;;  %v814_v63 = vld [vmem:[%s10392_s16 + $0x22] sm:$0xff]  ;;  %v815_v0 = vld [vmem:[%s10392_s16 + $0x2a] sm:$0xff]  ;;  %v816_v6 = vld [vmem:[%s10392_s16 + $0x32] sm:$0xff] }
  0x25   : > { %v10117_v5 = vld [vmem:[%s12033_s1 + $0xc8] sm:$0xff]   ;;  %v10118_v8 = vld [vmem:[%s12033_s1 + $0xd0] sm:$0xff]   ;;  %v10123_v45 = vld [vmem:[%s12033_s1 + $0xf8] sm:$0xff]  }
  0x26   : > { %8588 = vmatmul.mubr.bf16.vlgmr.msra.gmra.mrb[0].mxu0 %v10418_v16  ;;  %v818_v9 = vld [vmem:[%s10392_s16 + $0x42] sm:$0xff]  ;;  %v827_v37 = vld [vmem:[%s10392_s16 + $0x8a] sm:$0xff] }
  0x27   : > { %8616 = vmatpush3.bf16.msra.mxu0 %v10100_v13  ;;  %8591 = vmatprep.mubr.bf16.mxu0 %v10420_v17  ;;  %v317_v13 = vld [vmem:[%s10392_s16 + $0x50] sm:$0xff]  ;;  %v830_v53 = vld [vmem:[%s10392_s16 + $0xa2] sm:$0xff] }
  0x28   : > { %8617 = vmatprep.subr.bf16.mxu0 %v10101_v18  ;;  %v10541_v20 = vpack.c.bf16 %v318_v14, %v317_v13  ;;  %v10122_v38 = vld [vmem:[%s12033_s1 + $0xf0] sm:$0xff]  }
  0x2b   : > { %8618 = vmatpush3.bf16.msra.mxu0 %v10101_v18  ;;  %v320_v18 = vld [vmem:[%s10392_s16 + $0x68] sm:$0xff] }
  0x2c   : > { %8619 = vmatprep.subr.bf16.mxu0 %v10102_v21  ;;  %v10546_v22 = vpack.c.bf16 %v320_v18, %v319_v15  ;;  %v10119_v15 = vld [vmem:[%s12033_s1 + $0xd8] sm:$0xff]  }
  0x2d   : > { %v820_v18 = vld [vmem:[%s10392_s16 + $0x52] sm:$0xff] }
  0x2e   : > { %8592 = vmatmul.mubr.bf16.gmra.mrb[4].mxu0 %v10434_v24 }
  0x2f   : > { %8595 = vmatprep.mubr.bf16.mxu0 %v10436_v25  ;;  %8620 = vmatpush3.bf16.msra.mxu0 %v10102_v21  ;;  %v10113_v21 = vld [vmem:[%s12033_s1 + $0xa8] sm:$0xff]  }
  0x30   : > { %8621 = vmatprep.subr.bf16.mxu0 %v10103_v26 }
  0x33   : > { %8622 = vmatpush3.bf16.msra.mxu0 %v10103_v26  ;;  %v322_v26 = vld [vmem:[%s10392_s16 + $0x78] sm:$0xff] }
  0x34   : > { %8623 = vmatprep.subr.bf16.mxu0 %v10104_v31  ;;  %v10557_v30 = vpack.c.bf16 %v322_v26, %v321_v23  ;;  %v823_v23 = vld [vmem:[%s10392_s16 + $0x6a] sm:$0xff]  ;;  %v10120_v26 = vld [vmem:[%s12033_s1 + $0xe0] sm:$0xff]  }
  0x36   : > { %8596 = vmatmul.mubr.bf16.gmra.mrb[8].mxu0 %v10450_v32 }
  0x37   : > { %8599 = vmatprep.mubr.bf16.mxu0 %v10452_v33  ;;  %8624 = vmatpush3.bf16.msra.mxu0 %v10104_v31  ;;  %v10115_v31 = vld [vmem:[%s12033_s1 + $0xb8] sm:$0xff]  }
  0x38   : > { %8625 = vmatprep.subr.bf16.mxu0 %v10105_v34 }
  0x3b   : > { %8626 = vmatpush3.bf16.msra.mxu0 %v10105_v34  ;;  %v10562_v34 = vpack.c.bf16 %v324_v28, %v323_v27 }
  0x3c   : > { %8627 = vmatprep.subr.bf16.mxu0 %v10106_v39 }
  0x3e   : > { %8600 = vmatmul.mubr.bf16.gmra.mrb[12].mxu0 %v10466_v40 }
  0x3f   : > { %8603 = vmatprep.mubr.bf16.mxu0 %v10468_v41  ;;  %8628 = vmatpush3.bf16.msra.mxu0 %v10106_v39  ;;  %v10116_v39 = vld [vmem:[%s12033_s1 + $0xc0] sm:$0xff]  }
  0x40   : > { %8629 = vmatprep.subr.bf16.mxu0 %v10107_v42 }
  0x43   : > { %8630 = vmatpush3.bf16.msra.mxu0 %v10107_v42  ;;  %v10573_v42 = vpack.c.bf16 %v326_v36, %v325_v35  ;;  %v825_v35 = vld [vmem:[%s10392_s16 + $0x7a] sm:$0xff]  ;;  %v826_v36 = vld [vmem:[%s10392_s16 + $0x82] sm:$0xff] }
  0x44   : > { %8659 = vmatprep.subr.bf16.mxu0 %v10108_v47  ;;  %v10650_v44 = vpack.c.bf16 %v827_v37, %v826_v36  ;;  %v1117_v36 = vld [vmem:[%s10392_s16 + $0xe8] sm:$0x3f] }
  0x46   : > { %8604 = vmatmul.mubr.bf16.gmra.mrb[16].mxu0 %v10482_v48 }
  0x47   : > { %8607 = vmatprep.mubr.bf16.mxu0 %v10484_v49 }
  0x4e   : > { %8608 = vmatmul.mubr.bf16.gmra.mrb[20].mxu0 %v10492_v54 }
  0x4f   : > { %8611 = vmatprep.mubr.bf16.mxu0 %v10494_v55 }
  0x56   : > { %8612 = vmatmul.mubr.bf16.gmra.mrb[24].mxu0 %v406_v60  ;;  %v838_v60 = vpack.c.bf16 %v811_v58, %v810_v57  ;;  %v831_v57 = vld [vmem:[%s10392_s16 + $0xaa] sm:$0xff]  ;;  %v10124_v58 = vld [vmem:[%s12033_s1 + $0x100] sm:$0xff]  }
  0x57   : > { %8631 = vmatprep.mubr.bf16.mxu0 %v335_v61  ;;  %v812_v61 = vld [vmem:[%s10392_s16 + $0x12] sm:$0xff] }
  0x58   : > { %v10600_v1 = vpack.c.bf16 %v813_v62, %v812_v61  ;;  %v832_v61 = vld [vmem:[%s10392_s16 + $0xb2] sm:$0xff]  ;;  %v833_v62 = vld [vmem:[%s10392_s16 + $0xba] sm:$0xff] }
  0x5e   : > { %8632 = vmatmul.mubr.bf16.vlgmr.msra.gmra.mrb[0].mxu0 %v10509_v2 }
  0x5f   : > { %8660 = vmatpush3.bf16.msra.mxu0 %v10108_v47  ;;  %8635 = vmatprep.mubr.bf16.mxu0 %v10514_v4  ;;  %v332_v47 = vld [vmem:[%s10392_s16 + $0xc8] sm:$0xff] }
  0x60   : > { %8661 = vmatprep.subr.bf16.mxu0 %v10109_v3  ;;  %v10585_v51 = vpack.c.bf16 %v332_v47, %v331_v46  ;;  %v828_v46 = vld [vmem:[%s10392_s16 + $0x92] sm:$0xff]  ;;  %v829_v47 = vld [vmem:[%s10392_s16 + $0x9a] sm:$0xff] }
  0x63   : > { %8662 = vmatpush3.bf16.msra.mxu0 %v10109_v3  ;;  %v10602_v3 = vpack.c.bf16 %v815_v0, %v814_v63  ;;  %v834_v63 = vld [vmem:[%s10392_s16 + $0xc2] sm:$0xff]  ;;  %v835_v0 = vld [vmem:[%s10392_s16 + $0xca] sm:$0xff] }
  0x64   : > { %8663 = vmatprep.subr.bf16.mxu0 %v10110_v7 }
  0x66   : > { %8636 = vmatmul.mubr.bf16.gmra.mrb[4].mxu0 %v10525_v10 }
  0x67   : > { %8639 = vmatprep.mubr.bf16.mxu0 %v10530_v12  ;;  %8664 = vmatpush3.bf16.msra.mxu0 %v10110_v7  ;;  %v817_v7 = vld [vmem:[%s10392_s16 + $0x3a] sm:$0xff] }
  0x68   : > { %8665 = vmatprep.subr.bf16.mxu0 %v10111_v11  ;;  %v10616_v13 = vpack.c.bf16 %v817_v7, %v816_v6  ;;  %v10676_v6 = vpack.c.bf16 %v835_v0, %v834_v63  ;;  %v10681_v7 = vld [vmem:[%s10392_s16 + $0xd2] sm:$0xff]  ;;  %v2214_v63 = vld [vmem:[%s10392_s16 + $0x41] sm:$0xff]  ;;  %v2215_v0 = vld [vmem:[%s10392_s16 + $0x49] sm:$0xff] }
  0x6b   : > { %8666 = vmatpush3.bf16.msra.mxu0 %v10111_v11  ;;  %v819_v11 = vld [vmem:[%s10392_s16 + $0x4a] sm:$0xff] }
  0x6c   : > { %8667 = vmatprep.subr.bf16.mxu0 %v10112_v19  ;;  %v10618_v14 = vpack.c.bf16 %v819_v11, %v818_v9  ;;  %v10125_v11 = vld [vmem:[%s12033_s1 + $0x108] sm:$0xff]  }
  0x6e   : > { %8640 = vmatmul.mubr.bf16.gmra.mrb[8].mxu0 %v10541_v20 }
  0x6f   : > { %8643 = vmatprep.mubr.bf16.mxu0 %v10546_v22  ;;  %8668 = vmatpush3.bf16.msra.mxu0 %v10112_v19  ;;  %v821_v19 = vld [vmem:[%s10392_s16 + $0x5a] sm:$0xff] }
  0x70   : > { %8669 = vmatprep.subr.bf16.mxu0 %v10113_v21  ;;  %v10632_v27 = vpack.c.bf16 %v821_v19, %v820_v18  ;;  %v10128_v18 = vld [vmem:[%s12033_s1 + $0x120] sm:$0xff]   ;;  %v10129_v19 = vld [vmem:[%s12033_s1 + $0x128] sm:$0xff]  }
  0x73   : > { %8670 = vmatpush3.bf16.msra.mxu0 %v10113_v21  ;;  %v822_v21 = vld [vmem:[%s10392_s16 + $0x62] sm:$0xff] }
  0x74   : > { %8671 = vmatprep.subr.bf16.mxu0 %v10114_v29  ;;  %v10634_v28 = vpack.c.bf16 %v823_v23, %v822_v21  ;;  %v10130_v21 = vld [vmem:[%s12033_s1 + $0x130] sm:$0xff]   ;;  %v10131_v23 = vld [vmem:[%s12033_s1 + $0x138] sm:$0xff]  }
  0x76   : > { %8644 = vmatmul.mubr.bf16.gmra.mrb[12].mxu0 %v10557_v30 }
  0x77   : > { %8647 = vmatprep.mubr.bf16.mxu0 %v10562_v34  ;;  %8672 = vmatpush3.bf16.msra.mxu0 %v10114_v29  ;;  %v10121_v29 = vld [vmem:[%s12033_s1 + $0xe8] sm:$0xff]  }
  0x78   : > { %8673 = vmatprep.subr.bf16.mxu0 %v10115_v31 }
  0x7b   : > { %8674 = vmatpush3.bf16.msra.mxu0 %v10115_v31  ;;  %v824_v31 = vld [vmem:[%s10392_s16 + $0x72] sm:$0xff] }
  0x7c   : > { %8703 = vmatprep.subr.bf16.mxu0 %v10116_v39 }
  0x7e   : > { %8648 = vmatmul.mubr.bf16.gmra.mrb[16].mxu0 %v10573_v42 }
  0x7f   : > { %8651 = vmatprep.mubr.bf16.mxu0 %v10575_v43 }
  0x86   : > { %8652 = vmatmul.mubr.bf16.gmra.mrb[20].mxu0 %v10583_v50 }
  0x87   : > { %8655 = vmatprep.mubr.bf16.mxu0 %v10585_v51 }
  0x8e   : > { %8656 = vmatmul.mubr.bf16.gmra.mrb[24].mxu0 %v348_v59  ;;  %v10664_v59 = vpack.c.bf16 %v829_v47, %v828_v46 }
  0x8f   : > { %8675 = vmatprep.mubr.bf16.mxu0 %v838_v60  ;;  %v10666_v60 = vpack.c.bf16 %v831_v57, %v830_v53  ;;  %v10149_v53 = vld [vmem:[%s12033_s1 + $0x1c8] sm:$0xff]   ;;  %v10150_v57 = vld [vmem:[%s12033_s1 + $0x1d0] sm:$0xff]  }
  0x96   : > { %8676 = vmatmul.mubr.bf16.vlgmr.msra.gmra.mrb[0].mxu0 %v10600_v1 }
  0x97   : > { %8704 = vmatpush3.bf16.msra.mxu0 %v10116_v39  ;;  %8679 = vmatprep.mubr.bf16.mxu0 %v10602_v3  ;;  %v10648_v39 = vpack.c.bf16 %v825_v35, %v824_v31  ;;  %v10727_v35 = vld [vmem:[%s10392_s16 + $0xe0] sm:$0xff] }
  0x98   : > { %8705 = vmatprep.subr.bf16.mxu0 %v10117_v5  ;;  %v1131_v37 = vpack.c.bf16 %v1117_v36, %v10727_v35 }
  0x9b   : > { %8706 = vmatpush3.bf16.msra.mxu0 %v10117_v5  ;;  %v10674_v5 = vpack.c.bf16 %v833_v62, %v832_v61 }
  0x9c   : > { %8707 = vmatprep.subr.bf16.mxu0 %v10118_v8 }
  0x9e   : > { %8680 = vmatmul.mubr.bf16.gmra.mrb[4].mxu0 %v10616_v13 }
  0x9f   : > { %8683 = vmatprep.mubr.bf16.mxu0 %v10618_v14  ;;  %8708 = vmatpush3.bf16.msra.mxu0 %v10118_v8  ;;  %v837_v8 = vld [vmem:[%s10392_s16 + $0xda] sm:$0x3f] }
  0xa0   : > { %8709 = vmatprep.subr.bf16.mxu0 %v10119_v15  ;;  %v851_v9 = vpack.c.bf16 %v837_v8, %v10681_v7  ;;  %v2216_v8 = vld [vmem:[%s10392_s16 + $0x51] sm:$0xff] }
  0xa3   : > { %8710 = vmatpush3.bf16.msra.mxu0 %v10119_v15  ;;  %v10126_v15 = vld [vmem:[%s12033_s1 + $0x110] sm:$0xff]  }
  0xa4   : > { %8711 = vmatprep.subr.bf16.mxu0 %v10120_v26 }
  0xa6   : > { %8684 = vmatmul.mubr.bf16.gmra.mrb[8].mxu0 %v10632_v27 }
  0xa7   : > { %8687 = vmatprep.mubr.bf16.mxu0 %v10634_v28  ;;  %8712 = vmatpush3.bf16.msra.mxu0 %v10120_v26  ;;  %v10132_v26 = vld [vmem:[%s12033_s1 + $0x140] sm:$0xff]  }
  0xa8   : > { %8713 = vmatprep.subr.bf16.mxu0 %v10121_v29 }
  0xab   : > { %8714 = vmatpush3.bf16.msra.mxu0 %v10121_v29  ;;  %v1115_v29 = vld [vmem:[%s10392_s16 + $0xd8] sm:$0xff] }
  0xac   : > { %8715 = vmatprep.subr.bf16.mxu0 %v10122_v38  ;;  %v10722_v31 = vpack.c.bf16 %v1115_v29, %v10588_v52  ;;  %v10134_v52 = vld [vmem:[%s12033_s1 + $0x150] sm:$0xff]   ;;  %v2222_v29 = vld [vmem:[%s10392_s16 + $0x81] sm:$0xff] }
  0xae   : > { %8688 = vmatmul.mubr.bf16.gmra.mrb[12].mxu0 %v10648_v39 }
  0xaf   : > { %8691 = vmatprep.mubr.bf16.mxu0 %v10650_v44  ;;  %8716 = vmatpush3.bf16.msra.mxu0 %v10122_v38  ;;  %v10133_v38 = vld [vmem:[%s12033_s1 + $0x148] sm:$0xff]  }
  0xb0   : > { %8717 = vmatprep.subr.bf16.mxu0 %v10123_v45 }
  0xb3   : > { %8718 = vmatpush3.bf16.msra.mxu0 %v10123_v45 }
  0xb4   : > { %8747 = vmatprep.subr.bf16.mxu0 %v10124_v58 }
  0xb6   : > { %8692 = vmatmul.mubr.bf16.gmra.mrb[16].mxu0 %v10664_v59 }
  0xb7   : > { %8695 = vmatprep.mubr.bf16.mxu0 %v10666_v60 }
  0xbe   : > { %8696 = vmatmul.mubr.bf16.gmra.mrb[20].mxu0 %v10674_v5 }
  0xbf   : > { %8699 = vmatprep.mubr.bf16.mxu0 %v10676_v6 }
  0xc6   : > { %8700 = vmatmul.mubr.bf16.gmra.mrb[24].mxu0 %v851_v9  ;;  %v2217_v9 = vld [vmem:[%s10392_s16 + $0x59] sm:$0xff] }
  0xc7   : > { %8719 = vmatprep.mubr.bf16.mxu0 %v10509_v2  ;;  %v10127_v2 = vld [vmem:[%s12033_s1 + $0x118] sm:$0xff]  }
  0xce   : > { %8720 = vmatmul.mubr.bf16.vlgmr.msra.gmra.mrb[0].mxu0 %v10514_v4 }
  0xcf   : > { %8748 = vmatpush3.bf16.msra.mxu0 %v10124_v58  ;;  %8723 = vmatprep.mubr.bf16.mxu0 %v10525_v10  ;;  %v1957_v58 = vld [vmem:[%s10392_s16 + $0xf8] sm:$0x3f] }
  0xd0   : > { %8749 = vmatprep.subr.bf16.mxu0 %v10125_v11 }
  0xd3   : > { %8750 = vmatpush3.bf16.msra.mxu0 %v10125_v11  ;;  %v10158_v11 = vld [vmem:[%s12033_s1 + $0x210] sm:$0xff]  }
  0xd4   : > { %8751 = vmatprep.subr.bf16.mxu0 %v10126_v15 }
  0xd6   : > { %8724 = vmatmul.mubr.bf16.gmra.mrb[4].mxu0 %v10530_v12 }
  0xd7   : > { %8727 = vmatprep.mubr.bf16.mxu0 %v10541_v20  ;;  %8752 = vmatpush3.bf16.msra.mxu0 %v10126_v15  ;;  %v2218_v15 = vld [vmem:[%s10392_s16 + $0x61] sm:$0xff] }
  0xd8   : > { %8753 = vmatprep.subr.bf16.mxu0 %v10127_v2 }
  0xdb   : > { %8754 = vmatpush3.bf16.msra.mxu0 %v10127_v2  ;;  %v2219_v2 = vld [vmem:[%s10392_s16 + $0x69] sm:$0xff] }
  0xdc   : > { %8755 = vmatprep.subr.bf16.mxu0 %v10128_v18 }
  0xde   : > { %8728 = vmatmul.mubr.bf16.gmra.mrb[8].mxu0 %v10546_v22 }
  0xdf   : > { %8731 = vmatprep.mubr.bf16.mxu0 %v10557_v30  ;;  %8756 = vmatpush3.bf16.msra.mxu0 %v10128_v18  ;;  %v2241_v18 = vpack.c.bf16 %v2217_v9, %v2216_v8 }
  0xe0   : > { %8757 = vmatprep.subr.bf16.mxu0 %v10129_v19 }
  0xe3   : > { %8758 = vmatpush3.bf16.msra.mxu0 %v10129_v19  ;;  %v2242_v19 = vpack.c.bf16 %v2219_v2, %v2218_v15  ;;  %v2509_v15 = vld [vmem:[%s10392_s16 + $0xba] sm:$0xff]  ;;  %v2510_v2 = vld [vmem:[%s10392_s16 + $0xc2] sm:$0xff] }
  0xe4   : > { %8759 = vmatprep.subr.bf16.mxu0 %v10130_v21 }
  0xe6   : > { %8732 = vmatmul.mubr.bf16.gmra.mrb[12].mxu0 %v10562_v34 }
  0xe7   : > { %8735 = vmatprep.mubr.bf16.mxu0 %v10573_v42  ;;  %8760 = vmatpush3.bf16.msra.mxu0 %v10130_v21  ;;  %v10159_v21 = vld [vmem:[%s12033_s1 + $0x218] sm:$0xff]  }
  0xe8   : > { %8761 = vmatprep.subr.bf16.mxu0 %v10131_v23 }
  0xeb   : > { %8762 = vmatpush3.bf16.msra.mxu0 %v10131_v23  ;;  %v2220_v23 = vld [vmem:[%s10392_s16 + $0x71] sm:$0xff] }
  0xec   : > { %8791 = vmatprep.subr.bf16.mxu0 %v10132_v26 }
  0xee   : > { %8736 = vmatmul.mubr.bf16.gmra.mrb[16].mxu0 %v10575_v43 }
  0xef   : > { %8739 = vmatprep.mubr.bf16.mxu0 %v10583_v50 }
  0xf6   : > { %8740 = vmatmul.mubr.bf16.gmra.mrb[20].mxu0 %v10585_v51 }
  0xf7   : > { %8743 = vmatprep.mubr.bf16.mxu0 %v10722_v31 }
  0xfe   : > { %8744 = vmatmul.mubr.bf16.gmra.mrb[24].mxu0 %v1131_v37 }
  0xff   : > { %8763 = vmatprep.mubr.bf16.mxu0 %v10418_v16  ;;  %v10135_v16 = vld [vmem:[%s12033_s1 + $0x158] sm:$0xff]  }
 0x106   : > { %8764 = vmatmul.mubr.bf16.vlgmr.msra.gmra.mrb[0].mxu0 %v10420_v17  ;;  %v10136_v17 = vld [vmem:[%s12033_s1 + $0x160] sm:$0xff]  }
 0x107   : > { %8792 = vmatpush3.bf16.msra.mxu0 %v10132_v26  ;;  %8767 = vmatprep.mubr.bf16.mxu0 %v10434_v24  ;;  %v10137_v24 = vld [vmem:[%s12033_s1 + $0x168] sm:$0xff]   ;;  %v2221_v26 = vld [vmem:[%s10392_s16 + $0x79] sm:$0xff] }
 0x108   : > { %8793 = vmatprep.subr.bf16.mxu0 %v10133_v38  ;;  %v2243_v36 = vpack.c.bf16 %v2221_v26, %v2220_v23  ;;  %v2512_v23 = vld [vmem:[%s10392_s16 + $0xd2] sm:$0xff]  ;;  %v2515_v26 = vld [vmem:[%s10392_s16 + $0xea] sm:$0xff] }
 0x10b   : > { %8794 = vmatpush3.bf16.msra.mxu0 %v10133_v38  ;;  %v10161_v38 = vld [vmem:[%s12033_s1 + $0x228] sm:$0xff]  }
 0x10c   : > { %8795 = vmatprep.subr.bf16.mxu0 %v10134_v52 }
 0x10e   : > { %8768 = vmatmul.mubr.bf16.gmra.mrb[4].mxu0 %v10436_v25  ;;  %v10138_v25 = vld [vmem:[%s12033_s1 + $0x170] sm:$0xff]  }
 0x10f   : > { %8771 = vmatprep.mubr.bf16.mxu0 %v10450_v32  ;;  %8796 = vmatpush3.bf16.msra.mxu0 %v10134_v52  ;;  %v10139_v32 = vld [vmem:[%s12033_s1 + $0x178] sm:$0xff]  }
 0x110   : > { %8797 = vmatprep.subr.bf16.mxu0 %v10135_v16  ;;  %v2224_v52 = vld [vmem:[%s10392_s16 + $0x91] sm:$0xff] }
 0x113   : > { %8798 = vmatpush3.bf16.msra.mxu0 %v10135_v16  ;;  %v2225_v16 = vld [vmem:[%s10392_s16 + $0x99] sm:$0xff] }
 0x114   : > { %8799 = vmatprep.subr.bf16.mxu0 %v10136_v17 }
 0x116   : > { %8772 = vmatmul.mubr.bf16.gmra.mrb[8].mxu0 %v10452_v33  ;;  %v10140_v33 = vld [vmem:[%s12033_s1 + $0x180] sm:$0xff]  }
 0x117   : > { %8775 = vmatprep.mubr.bf16.mxu0 %v10466_v40  ;;  %8800 = vmatpush3.bf16.msra.mxu0 %v10136_v17  ;;  %v10767_v40 = vld [vmem:[%s10392_s16 + $0xd9] sm:$0xff]  ;;  %v2226_v17 = vld [vmem:[%s10392_s16 + $0xa1] sm:$0xff] }
 0x118   : > { %8801 = vmatprep.subr.bf16.mxu0 %v10137_v24  ;;  %v1410_v45 = vpack.c.bf16 %v10767_v40, %v10497_v56  ;;  %v10144_v56 = vld [vmem:[%s12033_s1 + $0x1a0] sm:$0xff]  }
 0x11b   : > { %8802 = vmatpush3.bf16.msra.mxu0 %v10137_v24  ;;  %v2227_v24 = vld [vmem:[%s10392_s16 + $0xa9] sm:$0xff] }
 0x11c   : > { %8803 = vmatprep.subr.bf16.mxu0 %v10138_v25 }
 0x11e   : > { %8776 = vmatmul.mubr.bf16.gmra.mrb[12].mxu0 %v10468_v41  ;;  %v10773_v41 = vld [vmem:[%s10392_s16 + $0xe1] sm:$0xff] }
 0x11f   : > { %8779 = vmatprep.mubr.bf16.mxu0 %v10482_v48  ;;  %8804 = vmatpush3.bf16.msra.mxu0 %v10138_v25  ;;  %v1397_v48 = vld [vmem:[%s10392_s16 + $0xe9] sm:$0x3f]  ;;  %v10162_v25 = vld [vmem:[%s12033_s1 + $0x230] sm:$0xff]  }
 0x120   : > { %8805 = vmatprep.subr.bf16.mxu0 %v10139_v32  ;;  %v1411_v46 = vpack.c.bf16 %v1397_v48, %v10773_v41  ;;  %v2228_v48 = vld [vmem:[%s10392_s16 + $0xb1] sm:$0xff] }
 0x123   : > { %8806 = vmatpush3.bf16.msra.mxu0 %v10139_v32  ;;  %v2245_v32 = vpack.c.bf16 %v2225_v16, %v2224_v52  ;;  %v10165_v52 = vld [vmem:[%s12034_s2 + $0x40] sm:$0xff]   ;;  %v10168_v16 = vld [vmem:[%s12034_s2 + $0x30] sm:$0xff]  }
 0x124   : > { %8835 = vmatprep.subr.bf16.mxu0 %v10140_v33  ;;  %9031 = vmatprep.subr.bf16.mxu1 %v10165_v52 }
 0x125   : > { %9032 = vmatpush3.bf16.msra.mxu1 %v10165_v52 }
 0x126   : > { %8780 = vmatmul.mubr.bf16.gmra.mrb[16].mxu0 %v10484_v49  ;;  %v10141_v49 = vld [vmem:[%s12033_s1 + $0x188] sm:$0xff]  }
 0x127   : > { %8783 = vmatprep.mubr.bf16.mxu0 %v10492_v54  ;;  %v10142_v54 = vld [vmem:[%s12033_s1 + $0x190] sm:$0xff]  }
 0x12e   : > { %8784 = vmatmul.mubr.bf16.gmra.mrb[20].mxu0 %v10494_v55  ;;  %v10143_v55 = vld [vmem:[%s12033_s1 + $0x198] sm:$0xff]  }
 0x12f   : > { %8787 = vmatprep.mubr.bf16.mxu0 %v1410_v45  ;;  %v10163_v45 = vld [vmem:[%s12033_s1 + $0x238] sm:$0xff]  }
 0x136   : > { %8788 = vmatmul.mubr.bf16.gmra.mrb[24].mxu0 %v1411_v46  ;;  %v2229_v46 = vld [vmem:[%s10392_s16 + $0xb9] sm:$0xff] }
 0x137   : > { %8807 = vmatprep.mubr.bf16.mxu0 %v10600_v1  ;;  %v10145_v1 = vld [vmem:[%s12033_s1 + $0x1a8] sm:$0xff]  }
 0x13e   : > { %8808 = vmatmul.mubr.bf16.vlgmr.msra.gmra.mrb[0].mxu0 %v10602_v3  ;;  %v10146_v3 = vld [vmem:[%s12033_s1 + $0x1b0] sm:$0xff]  }
 0x13f   : > { %8836 = vmatpush3.bf16.msra.mxu0 %v10140_v33  ;;  %8811 = vmatprep.mubr.bf16.mxu0 %v10616_v13  ;;  %v10147_v13 = vld [vmem:[%s12033_s1 + $0x1b8] sm:$0xff]   ;;  %v2246_v33 = vpack.c.bf16 %v2227_v24, %v2226_v17  ;;  %v10169_v17 = vld [vmem:[%s12034_s2 + $0x50] sm:$0xff]  }
 0x140   : > { %8837 = vmatprep.subr.bf16.mxu0 %v10141_v49  ;;  %v10170_v24 = vld [vmem:[%s12034_s2 + $0x38] sm:$0xff]  }
 0x143   : > { %8838 = vmatpush3.bf16.msra.mxu0 %v10141_v49  ;;  %v2230_v49 = vld [vmem:[%s10392_s16 + $0xc1] sm:$0xff] }
 0x144   : > { %8839 = vmatprep.subr.bf16.mxu0 %v10142_v54 }
 0x146   : > { %8812 = vmatmul.mubr.bf16.gmra.mrb[4].mxu0 %v10618_v14  ;;  %v10148_v14 = vld [vmem:[%s12033_s1 + $0x1c0] sm:$0xff]  }
 0x147   : > { %8815 = vmatprep.mubr.bf16.mxu0 %v10632_v27  ;;  %8840 = vmatpush3.bf16.msra.mxu0 %v10142_v54  ;;  %v10813_v27 = vld [vmem:[%s10392_s16 + $0xda] sm:$0xff]  ;;  %v2231_v54 = vld [vmem:[%s10392_s16 + $0xc9] sm:$0xff] }
 0x148   : > { %8841 = vmatprep.subr.bf16.mxu0 %v10143_v55 }
 0x14b   : > { %8842 = vmatpush3.bf16.msra.mxu0 %v10143_v55  ;;  %v2247_v55 = vpack.c.bf16 %v2229_v46, %v2228_v48  ;;  %v10984_v46 = vld [vmem:[%s12037_s5] ss:$0 sm:$0xff] }
 0x14c   : > { %8843 = vmatprep.subr.bf16.mxu0 %v10144_v56 }
 0x14e   : > { %8816 = vmatmul.mubr.bf16.gmra.mrb[8].mxu0 %v10634_v28  ;;  %v1690_v28 = vpack.c.bf16 %v10813_v27, %v10681_v7  ;;  %v10157_v7 = vld [vmem:[%s12033_s1 + $0x208] sm:$0xff]  }
 0x14f   : > { %8819 = vmatprep.mubr.bf16.mxu0 %v10648_v39  ;;  %8844 = vmatpush3.bf16.msra.mxu0 %v10144_v56  ;;  %v10819_v39 = vld [vmem:[%s10392_s16 + $0xe2] sm:$0xff]  ;;  %v2248_v56 = vpack.c.bf16 %v2231_v54, %v2230_v49 }
 0x150   : > { %8845 = vmatprep.subr.bf16.mxu0 %v10145_v1 }
 0x153   : > { %8846 = vmatpush3.bf16.msra.mxu0 %v10145_v1  ;;  %v2232_v1 = vld [vmem:[%s10392_s16 + $0xd1] sm:$0xff] }
 0x154   : > { %8847 = vmatprep.subr.bf16.mxu0 %v10146_v3 }
 0x156   : > { %8820 = vmatmul.mubr.bf16.gmra.mrb[12].mxu0 %v10650_v44  ;;  %v1677_v44 = vld [vmem:[%s10392_s16 + $0xea] sm:$0x3f] }
 0x157   : > { %8823 = vmatprep.mubr.bf16.mxu0 %v10664_v59  ;;  %8848 = vmatpush3.bf16.msra.mxu0 %v10146_v3  ;;  %v1691_v47 = vpack.c.bf16 %v1677_v44, %v10819_v39  ;;  %v2210_v59 = vld [vmem:[%s10392_s16 + $0x21] sm:$0xff]  ;;  %v2235_v3 = vld [vmem:[%s10392_s16 + $0xe9] sm:$0xff]  ;;  %v2237_v44 = vld [vmem:[%s10392_s16 + $0xf9] sm:$0x3f] }
 0x158   : > { %8849 = vmatprep.subr.bf16.mxu0 %v10147_v13 }
 0x15b   : > { %8850 = vmatpush3.bf16.msra.mxu0 %v10147_v13  ;;  %v2249_v13 = vpack.c.bf16 %v10767_v40, %v2232_v1  ;;  %v2494_v40 = vld [vmem:[%s10392_s16 + $0x42] sm:$0xff] }
 0x15c   : > { %8879 = vmatprep.subr.bf16.mxu0 %v10148_v14 }
 0x15e   : > { %8824 = vmatmul.mubr.bf16.gmra.mrb[16].mxu0 %v10666_v60  ;;  %v2211_v60 = vld [vmem:[%s10392_s16 + $0x29] sm:$0xff] }
 0x15f   : > { %8827 = vmatprep.mubr.bf16.mxu0 %v10674_v5  ;;  %v2238_v62 = vpack.c.bf16 %v2211_v60, %v2210_v59  ;;  %v2500_v60 = vld [vmem:[%s10392_s16 + $0x72] sm:$0xff] }
 0x166   : > { %8828 = vmatmul.mubr.bf16.gmra.mrb[20].mxu0 %v10676_v6  ;;  %v2240_v6 = vpack.c.bf16 %v2215_v0, %v2214_v63  ;;  %v2504_v0 = vld [vmem:[%s10392_s16 + $0x92] sm:$0xff] }
 0x167   : > { %8831 = vmatprep.mubr.bf16.mxu0 %v1690_v28  ;;  %v2236_v28 = vld [vmem:[%s10392_s16 + $0xf1] sm:$0xff] }
 0x16e   : > { %8832 = vmatmul.mubr.bf16.gmra.mrb[24].mxu0 %v1691_v47  ;;  %v2490_v47 = vld [vmem:[%s10392_s16 + $0x22] sm:$0xff] }
 0x16f   : > { %8851 = vmatprep.mubr.bf16.mxu0 %v10514_v4  ;;  %v10151_v4 = vld [vmem:[%s12033_s1 + $0x1d8] sm:$0xff]  }
 0x176   : > { %8852 = vmatmul.mubr.bf16.vlgmr.msra.gmra.mrb[0].mxu0 %v10525_v10  ;;  %v10152_v10 = vld [vmem:[%s12033_s1 + $0x1e0] sm:$0xff]  }
 0x177   : > { %8880 = vmatpush3.bf16.msra.mxu0 %v10148_v14  ;;  %8855 = vmatprep.mubr.bf16.mxu0 %v10530_v12  ;;  %v10153_v12 = vld [vmem:[%s12033_s1 + $0x1e8] sm:$0xff]   ;;  %v2250_v14 = vpack.c.bf16 %v2235_v3, %v10773_v41 }
 0x178   : > { %8881 = vmatprep.subr.bf16.mxu0 %v10149_v53  ;;  %v2495_v41 = vld [vmem:[%s10392_s16 + $0x4a] sm:$0xff] }
 0x17b   : > { %8882 = vmatpush3.bf16.msra.mxu0 %v10149_v53  ;;  %v2491_v53 = vld [vmem:[%s10392_s16 + $0x2a] sm:$0xff] }
 0x17c   : > { %8883 = vmatprep.subr.bf16.mxu0 %v10150_v57 }
 0x17e   : > { %8856 = vmatmul.mubr.bf16.gmra.mrb[4].mxu0 %v10541_v20  ;;  %v10154_v20 = vld [vmem:[%s12033_s1 + $0x1f0] sm:$0xff]  }
 0x17f   : > { %8859 = vmatprep.mubr.bf16.mxu0 %v10546_v22  ;;  %8884 = vmatpush3.bf16.msra.mxu0 %v10150_v57  ;;  %v10155_v22 = vld [vmem:[%s12033_s1 + $0x1f8] sm:$0xff]   ;;  %v2251_v57 = vpack.c.bf16 %v2237_v44, %v2236_v28 }
 0x180   : > { %8885 = vmatprep.subr.bf16.mxu0 %v10151_v4 }
 0x183   : > { %8886 = vmatpush3.bf16.msra.mxu0 %v10151_v4  ;;  %v2518_v4 = vpack.c.bf16 %v2491_v53, %v2490_v47 }
 0x184   : > { %8887 = vmatprep.subr.bf16.mxu0 %v10152_v10 }
 0x186   : > { %8860 = vmatmul.mubr.bf16.gmra.mrb[8].mxu0 %v10557_v30  ;;  %v10156_v30 = vld [vmem:[%s12033_s1 + $0x200] sm:$0xff]  }
 0x187   : > { %8863 = vmatprep.mubr.bf16.mxu0 %v10562_v34  ;;  %8888 = vmatpush3.bf16.msra.mxu0 %v10152_v10  ;;  %v1955_v34 = vld [vmem:[%s10392_s16 + $0xe8] sm:$0xff]  ;;  %v2492_v10 = vld [vmem:[%s10392_s16 + $0x32] sm:$0xff] }
 0x188   : > { %8889 = vmatprep.subr.bf16.mxu0 %v10153_v12 }
 0x18b   : > { %8890 = vmatpush3.bf16.msra.mxu0 %v10153_v12  ;;  %v2493_v12 = vld [vmem:[%s10392_s16 + $0x3a] sm:$0xff] }
 0x18c   : > { %8891 = vmatprep.subr.bf16.mxu0 %v10154_v20 }
 0x18e   : > { %8864 = vmatmul.mubr.bf16.gmra.mrb[12].mxu0 %v10573_v42  ;;  %v1970_v42 = vpack.c.bf16 %v1955_v34, %v10727_v35  ;;  %v10160_v35 = vld [vmem:[%s12033_s1 + $0x220] sm:$0xff]  }
 0x18f   : > { %8867 = vmatprep.mubr.bf16.mxu0 %v10575_v43  ;;  %8892 = vmatpush3.bf16.msra.mxu0 %v10154_v20  ;;  %v1956_v43 = vld [vmem:[%s10392_s16 + $0xf0] sm:$0xff]  ;;  %v2519_v20 = vpack.c.bf16 %v2493_v12, %v2492_v10  ;;  %v2497_v34 = vld [vmem:[%s10392_s16 + $0x5a] sm:$0xff] }
 0x190   : > { %8893 = vmatprep.subr.bf16.mxu0 %v10155_v22  ;;  %v1971_v61 = vpack.c.bf16 %v1957_v58, %v1956_v43  ;;  %v2499_v43 = vld [vmem:[%s10392_s16 + $0x6a] sm:$0xff] }
 0x193   : > { %8894 = vmatpush3.bf16.msra.mxu0 %v10155_v22  ;;  %v2520_v22 = vpack.c.bf16 %v2495_v41, %v2494_v40 }
 0x194   : > { %8923 = vmatprep.subr.bf16.mxu0 %v10156_v30 }
 0x196   : > { %8868 = vmatmul.mubr.bf16.gmra.mrb[16].mxu0 %v10583_v50  ;;  %v2212_v50 = vld [vmem:[%s10392_s16 + $0x31] sm:$0xff] }
 0x197   : > { %8871 = vmatprep.mubr.bf16.mxu0 %v10585_v51  ;;  %v2213_v51 = vld [vmem:[%s10392_s16 + $0x39] sm:$0xff] }
 0x198   : > { %v2239_v5 = vpack.c.bf16 %v2213_v51, %v2212_v50  ;;  %v2503_v50 = vld [vmem:[%s10392_s16 + $0x8a] sm:$0xff] }
 0x19e   : > { %8872 = vmatmul.mubr.bf16.gmra.mrb[20].mxu0 %v10722_v31  ;;  %v2223_v31 = vld [vmem:[%s10392_s16 + $0x89] sm:$0xff] }
 0x19f   : > { %8875 = vmatprep.mubr.bf16.mxu0 %v1970_v42  ;;  %v2244_v37 = vpack.c.bf16 %v2223_v31, %v2222_v29  ;;  %v2498_v42 = vld [vmem:[%s10392_s16 + $0x62] sm:$0xff]  ;;  %v2529_v29 = vpack.c.bf16 %v10813_v27, %v2512_v23  ;;  %v2530_v31 = vpack.c.bf16 %v2515_v26, %v10819_v39 }
 0x1a0   : > { %v2522_v59 = vpack.c.bf16 %v2499_v43, %v2498_v42  ;;  %v10166_v27 = vld [vmem:[%s12034_s2 + $0x28] sm:$0xff]  }
 0x1a1   : > { %v10167_v39 = vld [vmem:[%s12034_s2 + $0x48] sm:$0xff]  }
 0x1a2   : > { %9033 = vmatprep.subr.bf16.mxu1 %v10167_v39 }
 0x1a3   : > { %9034 = vmatpush3.bf16.msra.mxu1 %v10167_v39 }
 0x1a4   : > { %9035 = vmatprep.subr.bf16.mxu1 %v10169_v17 }
 0x1a6   : > { %8876 = vmatmul.mubr.bf16.gmra.mrb[24].mxu0 %v1971_v61  ;;  %v2501_v61 = vld [vmem:[%s10392_s16 + $0x7a] sm:$0xff] }
 0x1a7   : > { %8895 = vmatprep.mubr.bf16.mxu0 %v2238_v62  ;;  %v2502_v62 = vld [vmem:[%s10392_s16 + $0x82] sm:$0xff]  ;;  %v2523_v51 = vpack.c.bf16 %v2501_v61, %v2500_v60  ;;  %9036 = vmatpush3.bf16.msra.mxu1 %v10169_v17 }
 0x1a8   : > { %v2524_v63 = vpack.c.bf16 %v2503_v50, %v2502_v62 }
 0x1ae   : > { %8896 = vmatmul.mubr.bf16.vlgmr.msra.gmra.mrb[0].mxu0 %v2239_v5  ;;  %v2505_v5 = vld [vmem:[%s10392_s16 + $0x9a] sm:$0xff] }
 0x1af   : > { %8924 = vmatpush3.bf16.msra.mxu0 %v10156_v30  ;;  %8899 = vmatprep.mubr.bf16.mxu0 %v2240_v6  ;;  %v2496_v30 = vld [vmem:[%s10392_s16 + $0x52] sm:$0xff]  ;;  %v2506_v6 = vld [vmem:[%s10392_s16 + $0xa2] sm:$0xff]  ;;  %v2525_v8 = vpack.c.bf16 %v2505_v5, %v2504_v0 }
 0x1b0   : > { %8925 = vmatprep.subr.bf16.mxu0 %v10157_v7  ;;  %v2521_v58 = vpack.c.bf16 %v2497_v34, %v2496_v30 }
 0x1b3   : > { %8926 = vmatpush3.bf16.msra.mxu0 %v10157_v7  ;;  %v2507_v7 = vld [vmem:[%s10392_s16 + $0xaa] sm:$0xff] }
 0x1b4   : > { %8927 = vmatprep.subr.bf16.mxu0 %v10158_v11  ;;  %v2526_v9 = vpack.c.bf16 %v2507_v7, %v2506_v6 }
 0x1b6   : > { %8900 = vmatmul.mubr.bf16.gmra.mrb[4].mxu0 %v2241_v18  ;;  %v2511_v18 = vld [vmem:[%s10392_s16 + $0xca] sm:$0xff] }
 0x1b7   : > { %8903 = vmatprep.mubr.bf16.mxu0 %v2242_v19  ;;  %8928 = vmatpush3.bf16.msra.mxu0 %v10158_v11  ;;  %v2508_v11 = vld [vmem:[%s10392_s16 + $0xb2] sm:$0xff] }
 0x1b8   : > { %8929 = vmatprep.subr.bf16.mxu0 %v10159_v21  ;;  %v2527_v19 = vpack.c.bf16 %v2509_v15, %v2508_v11 }
 0x1bb   : > { %8930 = vmatpush3.bf16.msra.mxu0 %v10159_v21  ;;  %v2528_v21 = vpack.c.bf16 %v2511_v18, %v2510_v2 }
 0x1bc   : > { %8931 = vmatprep.subr.bf16.mxu0 %v10160_v35 }
 0x1be   : > { %8904 = vmatmul.mubr.bf16.gmra.mrb[8].mxu0 %v2243_v36  ;;  %v2517_v36 = vld [vmem:[%s10392_s16 + $0xfa] sm:$0x3f] }
 0x1bf   : > { %8907 = vmatprep.mubr.bf16.mxu0 %v2244_v37  ;;  %8932 = vmatpush3.bf16.msra.mxu0 %v10160_v35  ;;  %v2516_v35 = vld [vmem:[%s10392_s16 + $0xf2] sm:$0xff] }
 0x1c0   : > { %8933 = vmatprep.subr.bf16.mxu0 %v10161_v38  ;;  %v2531_v37 = vpack.c.bf16 %v2517_v36, %v2516_v35 }
 0x1c3   : > { %8934 = vmatpush3.bf16.msra.mxu0 %v10161_v38  ;;  %v10164_v38 = vld [vmem:[%s12034_s2 + $0x20] sm:$0xff]  }
 0x1c4   : > { %8935 = vmatprep.subr.bf16.mxu0 %v10162_v25 }
 0x1c6   : > { %8908 = vmatmul.mubr.bf16.gmra.mrb[12].mxu0 %v2245_v32  ;;  %v10967_v32 = vld [vmem:[%s12034_s2 + $0x60] sm:$0xff]  }
 0x1c7   : > { %8911 = vmatprep.mubr.bf16.mxu0 %v2246_v33  ;;  %8936 = vmatpush3.bf16.msra.mxu0 %v10162_v25  ;;  %v10171_v25 = vld [vmem:[%s12034_s2 + $0x58] sm:$0xff]   ;;  %v10973_v33 = vld [vmem:[%s12034_s2] sm:$0xff]  }
 0x1c8   : > { %8937 = vmatprep.subr.bf16.mxu0 %v10163_v45  ;;  %9037 = vmatprep.subr.bf16.mxu1 %v10171_v25 }
 0x1c9   : > { %9038 = vmatpush3.bf16.msra.mxu1 %v10171_v25 }
 0x1ca   : > { %9063 = vmatprep.subr.bf16.mxu1 %v10967_v32 }
 0x1cb   : > { %8938 = vmatpush3.bf16.msra.mxu0 %v10163_v45  ;;  %v10979_v45 = vld [vmem:[%s12036_s4] ss:$0 sm:$0xff] }
 0x1cc   : > { %8967 = vmatprep.subr.bf16.mxu0 %v10164_v38 }
 0x1ce   : > { %8912 = vmatmul.mubr.bf16.gmra.mrb[16].mxu0 %v2247_v55 }
 0x1cf   : > { %8915 = vmatprep.mubr.bf16.mxu0 %v2248_v56 }
 0x1d6   : > { %8916 = vmatmul.mubr.bf16.gmra.mrb[20].mxu0 %v2249_v13 }
 0x1d7   : > { %8919 = vmatprep.mubr.bf16.mxu0 %v2250_v14 }
 0x1de   : > { %8920 = vmatmul.mubr.bf16.gmra.mrb[24].mxu0 %v2251_v57 }
 0x1df   : > { %8939 = vmatprep.mubr.bf16.mxu0 %v2518_v4 }
 0x1e6   : > { %8940 = vmatmul.mubr.bf16.vlgmr.msra.gmra.mrb[0].mxu0 %v2519_v20 }
 0x1e7   : > { %8943 = vmatprep.mubr.bf16.mxu0 %v2520_v22  ;;  %8968 = vmatpush3.bf16.msra.mxu0 %v10164_v38 }
 0x1e8   : > { %8969 = vmatprep.subr.bf16.mxu0 %v10166_v27 }
 0x1eb   : > { %8970 = vmatpush3.bf16.msra.mxu0 %v10166_v27 }
 0x1ec   : > { %8971 = vmatprep.subr.bf16.mxu0 %v10168_v16 }
 0x1ee   : > { %8944 = vmatmul.mubr.bf16.gmra.mrb[4].mxu0 %v2521_v58 }
 0x1ef   : > { %8947 = vmatprep.mubr.bf16.mxu0 %v2522_v59  ;;  %8972 = vmatpush3.bf16.msra.mxu0 %v10168_v16 }
 0x1f0   : > { %8973 = vmatprep.subr.bf16.mxu0 %v10170_v24 }
 0x1f3   : > { %8974 = vmatpush3.bf16.msra.mxu0 %v10170_v24 }
 0x1f4   : > { %8999 = vmatprep.subr.bf16.mxu0 %v10973_v33 }
 0x1f6   : > { %8948 = vmatmul.mubr.bf16.gmra.mrb[8].mxu0 %v2523_v51 }
 0x1f7   : > { %8951 = vmatprep.mubr.bf16.mxu0 %v2524_v63 }
 0x1fe   : > { %8952 = vmatmul.mubr.bf16.gmra.mrb[12].mxu0 %v2525_v8 }
 0x1ff   : > { %8955 = vmatprep.mubr.bf16.mxu0 %v2526_v9 }
 0x206   : > { %8956 = vmatmul.mubr.bf16.gmra.mrb[16].mxu0 %v2527_v19 }
 0x207   : > { %8959 = vmatprep.mubr.bf16.mxu0 %v2528_v21 }
 0x20e   : > { %8960 = vmatmul.mubr.bf16.gmra.mrb[20].mxu0 %v2529_v29 }
 0x20f   : > { %8963 = vmatprep.mubr.bf16.mxu0 %v2530_v31 }
 0x216   : > { %8964 = vmatmul.mubr.bf16.gmra.mrb[24].mxu0 %v2531_v37 }
 0x2b9   : > { %v8941_v48 = vpop.f32.mrb[0].mxu0 }
 0x2ba   : > { %v2779_v49 = vmul.f32 %v8941_v48, %v10979_v45  ;;  %v2631_v54 = vpop.f32.mrb[1].mxu0 }
 0x2bb   : > { %v2777_v55 = vmul.f32 %v10979_v45, %v2631_v54  ;;  %v8942_v56 = vpop.f32.mrb[2].mxu0  ;;  %v10176_v54 = vld [vmem:[%s12034_s2 + $0x8] sm:$0xff]  }
 0x2bc   : > { %v2814_v1 = vadd.f32 %v10984_v46, %v2779_v49  ;;  %v2780_v3 = vmul.f32 %v8942_v56, %v10979_v45  ;;  %v2634_v13 = vpop.f32.mrb[3].mxu0  ;;  %v10173_v49 = vld [vmem:[%s12034_s2 + $0x68] sm:$0xff]  }
 0x2bd   : > { %v2812_v14 = vadd.f32 %v10984_v46, %v2777_v55  ;;  %v2778_v28 = vmul.f32 %v10979_v45, %v2634_v13 }
 0x2be   : > { %v2842_v44 = vmax.f32 %v2814_v1, 0.0  ;;  %v2815_v47 = vadd.f32 %v10984_v46, %v2780_v3 }
 0x2bf   : > { %v2840_v53 = vmax.f32 %v2812_v14, 0.0  ;;  %v2813_v57 = vadd.f32 %v10984_v46, %v2778_v28 }
 0x2c0   : > { %2871 = vst.msk [vmem:[#allocation2 + $0x10] sm:$0xff] %vm2868_vm0, %v2842_v44  ;;  %v2843_v4 = vmax.f32 %v2815_v47, 0.0 }
 0x2c1   : > { %2869 = vst.msk [vmem:[#allocation2] sm:$0xff] %vm2868_vm0, %v2840_v53  ;;  %v2841_v10 = vmax.f32 %v2813_v57, 0.0  ;;  %v8945_v12 = vpop.f32.mrb[4].mxu0 }
 0x2c2   : > { %2872 = vst.msk [vmem:[#allocation2 + $0x18] sm:$0xff] %vm2868_vm0, %v2843_v4  ;;  %v2783_v40 = vmul.f32 %v8945_v12, %v10979_v45  ;;  %v2647_v41 = vpop.f32.mrb[5].mxu0 }
 0x2c3   : > { %2870 = vst.msk [vmem:[#allocation2 + $0x8] sm:$0xff] %vm2868_vm0, %v2841_v10  ;;  %v2781_v20 = vmul.f32 %v10979_v45, %v2647_v41  ;;  %v8946_v22 = vpop.f32.mrb[6].mxu0  ;;  %v10174_v41 = vld [vmem:[%s12034_s2 + $0x70] sm:$0xff]  }
 0x2c4   : > { %v2818_v30 = vadd.f32 %v10984_v46, %v2783_v40  ;;  %v2784_v34 = vmul.f32 %v8946_v22, %v10979_v45  ;;  %v2650_v42 = vpop.f32.mrb[7].mxu0 }
 0x2c5   : > { %v2816_v43 = vadd.f32 %v10984_v46, %v2781_v20  ;;  %v2782_v58 = vmul.f32 %v10979_v45, %v2650_v42 }
 0x2c6   : > { %v2846_v59 = vmax.f32 %v2818_v30, 0.0  ;;  %v2819_v60 = vadd.f32 %v10984_v46, %v2784_v34 }
 0x2c7   : > { %v2844_v61 = vmax.f32 %v2816_v43, 0.0  ;;  %v2817_v62 = vadd.f32 %v10984_v46, %v2782_v58 }
 0x2c8   : > { %2875 = vst.msk [vmem:[#allocation2 + $0x30] sm:$0xff] %vm2868_vm0, %v2846_v59  ;;  %v2847_v50 = vmax.f32 %v2819_v60, 0.0 }
 0x2c9   : > { %2873 = vst.msk [vmem:[#allocation2 + $0x20] sm:$0xff] %vm2868_vm0, %v2844_v61  ;;  %v2845_v51 = vmax.f32 %v2817_v62, 0.0  ;;  %v8949_v63 = vpop.f32.mrb[8].mxu0  ;;  %v2944_v38 = vld [vmem:[#allocation2 + $0x11] sm:$0xff] }
 0x2ca   : > { %2876 = vst.msk [vmem:[#allocation2 + $0x38] sm:$0xff] %vm2868_vm0, %v2847_v50  ;;  %v2787_v0 = vmul.f32 %v8949_v63, %v10979_v45  ;;  %v2663_v5 = vpop.f32.mrb[9].mxu0  ;;  %v2942_v6 = vld [vmem:[#allocation2 + $0x1] sm:$0xff]  ;;  %v2943_v7 = vld [vmem:[#allocation2 + $0x9] sm:$0xff]  ;;  %v3367_v39 = vld [vmem:[#allocation2 + $0x12] sm:$0xff] }
 0x2cb   : > { %v3365_v8 = vld [vmem:[#allocation2 + $0x2] sm:$0xff]  ;;  %2874 = vst.msk [vmem:[#allocation2 + $0x28] sm:$0xff] %vm2868_vm0, %v2845_v51  ;;  %v2785_v9 = vmul.f32 %v10979_v45, %v2663_v5  ;;  %v8950_v11 = vpop.f32.mrb[10].mxu0  ;;  %v2966_v15 = vpack.c.bf16 %v2943_v7, %v2942_v6  ;;  %v3366_v2 = vld [vmem:[#allocation2 + $0xa] sm:$0xff]  ;;  %v10177_v51 = vld [vmem:[%s12034_s2 + $0x78] sm:$0xff]  }
 0x2cc   : > { %v2822_v18 = vadd.f32 %v10984_v46, %v2787_v0  ;;  %v2788_v19 = vmul.f32 %v8950_v11, %v10979_v45  ;;  %v2666_v21 = vpop.f32.mrb[11].mxu0  ;;  %v3389_v23 = vpack.c.bf16 %v3366_v2, %v3365_v8  ;;  %v10179_v63 = vld [vmem:[%s12034_s2 + $0x18] sm:$0xff]  }
 0x2cd   : > { %v2820_v26 = vadd.f32 %v10984_v46, %v2785_v9  ;;  %v2786_v29 = vmul.f32 %v10979_v45, %v2666_v21  ;;  %8975 = vmatprep.mubr.msk.bf16.mxu0 %vm2868_vm0, %v2966_v15 }
 0x2ce   : > { %v2850_v31 = vmax.f32 %v2822_v18, 0.0  ;;  %v2823_v35 = vadd.f32 %v10984_v46, %v2788_v19  ;;  %9039 = vmatprep.mubr.msk.bf16.mxu1 %vm2868_vm0, %v3389_v23 }
 0x2cf   : > { %v2848_v36 = vmax.f32 %v2820_v26, 0.0  ;;  %v2821_v37 = vadd.f32 %v10984_v46, %v2786_v29 }
 0x2d0   : > { %2879 = vst.msk [vmem:[#allocation2 + $0x50] sm:$0xff] %vm2868_vm0, %v2850_v31  ;;  %v2851_v52 = vmax.f32 %v2823_v35, 0.0  ;;  %v2945_v27 = vld [vmem:[#allocation2 + $0x19] sm:$0xff] }
 0x2d1   : > { %v3368_v16 = vld [vmem:[#allocation2 + $0x1a] sm:$0xff]  ;;  %2877 = vst.msk [vmem:[#allocation2 + $0x40] sm:$0xff] %vm2868_vm0, %v2848_v36  ;;  %v2849_v17 = vmax.f32 %v2821_v37, 0.0  ;;  %v8953_v24 = vpop.f32.mrb[12].mxu0  ;;  %v11022_v25 = vpack.c.bf16 %v2945_v27, %v2944_v38  ;;  %v2948_v34 = vld [vmem:[#allocation2 + $0x31] sm:$0xff] }
 0x2d2   : > { %v11024_v48 = vpack.c.bf16 %v3368_v16, %v3367_v39  ;;  %2880 = vst.msk [vmem:[#allocation2 + $0x58] sm:$0xff] %vm2868_vm0, %v2851_v52  ;;  %v2791_v55 = vmul.f32 %v8953_v24, %v10979_v45  ;;  %v2679_v56 = vpop.f32.mrb[13].mxu0  ;;  %v2946_v1 = vld [vmem:[#allocation2 + $0x21] sm:$0xff]  ;;  %v2947_v3 = vld [vmem:[#allocation2 + $0x29] sm:$0xff]  ;;  %v3371_v58 = vld [vmem:[#allocation2 + $0x32] sm:$0xff] }
 0x2d3   : > { %v3369_v13 = vld [vmem:[#allocation2 + $0x22] sm:$0xff]  ;;  %2878 = vst.msk [vmem:[#allocation2 + $0x48] sm:$0xff] %vm2868_vm0, %v2849_v17  ;;  %v2789_v14 = vmul.f32 %v10979_v45, %v2679_v56  ;;  %v8954_v28 = vpop.f32.mrb[14].mxu0  ;;  %8976 = vmatmul.mubr.msk.bf16.vlgmr.msra.gmra.mrb[28].mxu0 %vm2868_vm0, %v11022_v25  ;;  %v11040_v44 = vpack.c.bf16 %v2947_v3, %v2946_v1  ;;  %v3370_v47 = vld [vmem:[#allocation2 + $0x2a] sm:$0xff] }
 0x2d4   : > { %9040 = vmatmul.mubr.msk.bf16.vlgmr.msra.gmra.mrb[0].mxu1 %vm2868_vm0, %v11024_v48  ;;  %v2826_v53 = vadd.f32 %v10984_v46, %v2791_v55  ;;  %v2792_v57 = vmul.f32 %v8954_v28, %v10979_v45  ;;  %v2682_v4 = vpop.f32.mrb[15].mxu0  ;;  %v11045_v10 = vpack.c.bf16 %v3370_v47, %v3369_v13  ;;  %9000 = vmatpush3.bf16.msra.mxu0 %v10973_v33  ;;  %v11095_v31 = vld [vmem:[%s12034_s2 + $0x80] sm:$0xff]  }
 0x2d5   : > { %9064 = vmatpush3.bf16.msra.mxu1 %v10967_v32  ;;  %v2824_v12 = vadd.f32 %v10984_v46, %v2789_v14  ;;  %v2790_v40 = vmul.f32 %v10979_v45, %v2682_v4  ;;  %8979 = vmatprep.mubr.msk.bf16.mxu0 %vm2868_vm0, %v11040_v44  ;;  %v10178_v32 = vld [vmem:[%s12034_s2 + $0x10] sm:$0xff]  }
 0x2d6   : > { %9065 = vmatprep.subr.bf16.mxu1 %v10173_v49  ;;  %v2854_v20 = vmax.f32 %v2826_v53, 0.0  ;;  %v2827_v22 = vadd.f32 %v10984_v46, %v2792_v57  ;;  %9043 = vmatprep.mubr.msk.bf16.mxu1 %vm2868_vm0, %v11045_v10 }
 0x2d7   : > { %9001 = vmatprep.subr.bf16.mxu0 %v10176_v54  ;;  %v2852_v33 = vmax.f32 %v2824_v12, 0.0  ;;  %v2825_v30 = vadd.f32 %v10984_v46, %v2790_v40 }
 0x2d8   : > { %2883 = vst.msk [vmem:[#allocation2 + $0x70] sm:$0xff] %vm2868_vm0, %v2854_v20  ;;  %v2855_v42 = vmax.f32 %v2827_v22, 0.0  ;;  %v2949_v43 = vld [vmem:[#allocation2 + $0x39] sm:$0xff]  ;;  %9002 = vmatpush3.bf16.msra.mxu0 %v10176_v54 }
 0x2d9   : > { %v3372_v59 = vld [vmem:[#allocation2 + $0x3a] sm:$0xff]  ;;  %9066 = vmatpush3.bf16.msra.mxu1 %v10173_v49  ;;  %2881 = vst.msk [vmem:[#allocation2 + $0x60] sm:$0xff] %vm2868_vm0, %v2852_v33  ;;  %v2853_v60 = vmax.f32 %v2825_v30, 0.0  ;;  %v8957_v61 = vpop.f32.mrb[16].mxu0  ;;  %v11064_v62 = vpack.c.bf16 %v2949_v43, %v2948_v34  ;;  %9003 = vmatprep.subr.bf16.mxu0 %v10178_v32  ;;  %v2952_v52 = vld [vmem:[#allocation2 + $0x51] sm:$0xff] }
 0x2da   : > { %v11066_v50 = vpack.c.bf16 %v3372_v59, %v3371_v58  ;;  %9067 = vmatprep.subr.bf16.mxu1 %v10174_v41  ;;  %2884 = vst.msk [vmem:[#allocation2 + $0x78] sm:$0xff] %vm2868_vm0, %v2855_v42  ;;  %v2795_v0 = vmul.f32 %v8957_v61, %v10979_v45  ;;  %v2695_v5 = vpop.f32.mrb[17].mxu0  ;;  %v2950_v6 = vld [vmem:[#allocation2 + $0x41] sm:$0xff]  ;;  %v2951_v7 = vld [vmem:[#allocation2 + $0x49] sm:$0xff]  ;;  %v3375_v16 = vld [vmem:[#allocation2 + $0x52] sm:$0xff] }
 0x2db   : > { %v3373_v8 = vld [vmem:[#allocation2 + $0x42] sm:$0xff]  ;;  %2882 = vst.msk [vmem:[#allocation2 + $0x68] sm:$0xff] %vm2868_vm0, %v2853_v60  ;;  %v2793_v9 = vmul.f32 %v10979_v45, %v2695_v5  ;;  %v8958_v11 = vpop.f32.mrb[18].mxu0  ;;  %8980 = vmatmul.mubr.msk.bf16.gmra.mrb[32].mxu0 %vm2868_vm0, %v11064_v62  ;;  %v11082_v15 = vpack.c.bf16 %v2951_v7, %v2950_v6  ;;  %v3374_v2 = vld [vmem:[#allocation2 + $0x4a] sm:$0xff] }
 0x2dc   : > { %9044 = vmatmul.mubr.msk.bf16.gmra.mrb[4].mxu1 %vm2868_vm0, %v11066_v50  ;;  %v2830_v18 = vadd.f32 %v10984_v46, %v2795_v0  ;;  %v2796_v19 = vmul.f32 %v8958_v11, %v10979_v45  ;;  %v2698_v21 = vpop.f32.mrb[19].mxu0  ;;  %v11086_v23 = vpack.c.bf16 %v3374_v2, %v3373_v8  ;;  %9004 = vmatpush3.bf16.msra.mxu0 %v10178_v32 }
 0x2dd   : > { %9068 = vmatpush3.bf16.msra.mxu1 %v10174_v41  ;;  %v2828_v26 = vadd.f32 %v10984_v46, %v2793_v9  ;;  %v2794_v29 = vmul.f32 %v10979_v45, %v2698_v21  ;;  %8983 = vmatprep.mubr.msk.bf16.mxu0 %vm2868_vm0, %v11082_v15 }
 0x2de   : > { %9069 = vmatprep.subr.bf16.mxu1 %v10177_v51  ;;  %v2858_v35 = vmax.f32 %v2830_v18, 0.0  ;;  %v2831_v36 = vadd.f32 %v10984_v46, %v2796_v19  ;;  %9047 = vmatprep.mubr.msk.bf16.mxu1 %vm2868_vm0, %v11086_v23 }
 0x2df   : > { %9005 = vmatprep.subr.bf16.mxu0 %v10179_v63  ;;  %v2856_v37 = vmax.f32 %v2828_v26, 0.0  ;;  %v2829_v38 = vadd.f32 %v10984_v46, %v2794_v29 }
 0x2e0   : > { %2887 = vst.msk [vmem:[#allocation2 + $0x90] sm:$0xff] %vm2868_vm0, %v2858_v35  ;;  %v2859_v27 = vmax.f32 %v2831_v36, 0.0  ;;  %v2953_v39 = vld [vmem:[#allocation2 + $0x59] sm:$0xff]  ;;  %9006 = vmatpush3.bf16.msra.mxu0 %v10179_v63 }
 0x2e1   : > { %v3376_v17 = vld [vmem:[#allocation2 + $0x5a] sm:$0xff]  ;;  %9070 = vmatpush3.bf16.msra.mxu1 %v10177_v51  ;;  %2885 = vst.msk [vmem:[#allocation2 + $0x80] sm:$0xff] %vm2868_vm0, %v2856_v37  ;;  %v2857_v24 = vmax.f32 %v2829_v38, 0.0  ;;  %v8961_v49 = vpop.f32.mrb[20].mxu0  ;;  %v11103_v54 = vpack.c.bf16 %v2953_v39, %v2952_v52  ;;  %v2956_v42 = vld [vmem:[#allocation2 + $0x71] sm:$0xff] }
 0x2e2   : > { %v11105_v55 = vpack.c.bf16 %v3376_v17, %v3375_v16  ;;  %9095 = vmatprep.subr.bf16.mxu1 %v11095_v31  ;;  %2888 = vst.msk [vmem:[#allocation2 + $0x98] sm:$0xff] %vm2868_vm0, %v2859_v27  ;;  %v2799_v56 = vmul.f32 %v8961_v49, %v10979_v45  ;;  %v2711_v1 = vpop.f32.mrb[21].mxu0  ;;  %v2954_v3 = vld [vmem:[#allocation2 + $0x61] sm:$0xff]  ;;  %v2955_v13 = vld [vmem:[#allocation2 + $0x69] sm:$0xff]  ;;  %v3379_v59 = vld [vmem:[#allocation2 + $0x72] sm:$0xff] }
 0x2e3   : > { %v3377_v14 = vld [vmem:[#allocation2 + $0x62] sm:$0xff]  ;;  %2886 = vst.msk [vmem:[#allocation2 + $0x88] sm:$0xff] %vm2868_vm0, %v2857_v24  ;;  %v2797_v28 = vmul.f32 %v10979_v45, %v2711_v1  ;;  %v8962_v47 = vpop.f32.mrb[22].mxu0  ;;  %8984 = vmatmul.mubr.msk.bf16.gmra.mrb[36].mxu0 %vm2868_vm0, %v11103_v54  ;;  %v11116_v53 = vpack.c.bf16 %v2955_v13, %v2954_v3  ;;  %v3378_v57 = vld [vmem:[#allocation2 + $0x6a] sm:$0xff] }
 0x2e4   : > { %9048 = vmatmul.mubr.msk.bf16.gmra.mrb[8].mxu1 %vm2868_vm0, %v11105_v55  ;;  %v2834_v4 = vadd.f32 %v10984_v46, %v2799_v56  ;;  %v2800_v12 = vmul.f32 %v8962_v47, %v10979_v45  ;;  %v2714_v40 = vpop.f32.mrb[23].mxu0  ;;  %v11120_v41 = vpack.c.bf16 %v3378_v57, %v3377_v14 }
 0x2e5   : > { %v2832_v32 = vadd.f32 %v10984_v46, %v2797_v28  ;;  %v2798_v20 = vmul.f32 %v10979_v45, %v2714_v40  ;;  %8987 = vmatprep.mubr.msk.bf16.mxu0 %vm2868_vm0, %v11116_v53 }
 0x2e6   : > { %v2862_v22 = vmax.f32 %v2834_v4, 0.0  ;;  %v2835_v33 = vadd.f32 %v10984_v46, %v2800_v12  ;;  %9051 = vmatprep.mubr.msk.bf16.mxu1 %vm2868_vm0, %v11120_v41 }
 0x2e7   : > { %v2860_v30 = vmax.f32 %v2832_v32, 0.0  ;;  %v2833_v34 = vadd.f32 %v10984_v46, %v2798_v20  ;;  %v2899_v20 = vld [vmem:[#allocation2 + $0x8] sm:$0xff] }
 0x2e8   : > { %2891 = vst.msk [vmem:[#allocation2 + $0xb0] sm:$0xff] %vm2868_vm0, %v2862_v22  ;;  %v2863_v43 = vmax.f32 %v2835_v33, 0.0  ;;  %v2957_v58 = vld [vmem:[#allocation2 + $0x79] sm:$0xff] }
 0x2e9   : > { %v3380_v60 = vld [vmem:[#allocation2 + $0x7a] sm:$0xff]  ;;  %2889 = vst.msk [vmem:[#allocation2 + $0xa0] sm:$0xff] %vm2868_vm0, %v2860_v30  ;;  %v2861_v61 = vmax.f32 %v2833_v34, 0.0  ;;  %v8965_v51 = vpop.f32.mrb[24].mxu0  ;;  %v11132_v63 = vpack.c.bf16 %v2957_v58, %v2956_v42  ;;  %v2960_v16 = vld [vmem:[#allocation2 + $0x91] sm:$0xff] }
 0x2ea   : > { %v11134_v0 = vpack.c.bf16 %v3380_v60, %v3379_v59  ;;  %2892 = vst.msk [vmem:[#allocation2 + $0xb8] sm:$0xff] %vm2868_vm0, %v2863_v43  ;;  %v2803_v5 = vmul.f32 %v8965_v51, %v10979_v45  ;;  %v2727_v6 = vpop.f32.mrb[25].mxu0  ;;  %v2958_v7 = vld [vmem:[#allocation2 + $0x81] sm:$0xff]  ;;  %v2959_v8 = vld [vmem:[#allocation2 + $0x89] sm:$0xff]  ;;  %v3383_v49 = vld [vmem:[#allocation2 + $0x92] sm:$0xff] }
 0x2eb   : > { %v3381_v9 = vld [vmem:[#allocation2 + $0x82] sm:$0xff]  ;;  %2890 = vst.msk [vmem:[#allocation2 + $0xa8] sm:$0xff] %vm2868_vm0, %v2861_v61  ;;  %v2801_v11 = vmul.f32 %v10979_v45, %v2727_v6  ;;  %v8966_v2 = vpop.f32.mrb[26].mxu0  ;;  %8988 = vmatmul.mubr.msk.bf16.gmra.mrb[40].mxu0 %vm2868_vm0, %v11132_v63  ;;  %v11144_v18 = vpack.c.bf16 %v2959_v8, %v2958_v7  ;;  %v3382_v19 = vld [vmem:[#allocation2 + $0x8a] sm:$0xff]  ;;  %v3624_v22 = vld [vmem:[#allocation2 + $0x18] sm:$0xff] }
 0x2ec   : > { %9052 = vmatmul.mubr.msk.bf16.gmra.mrb[12].mxu1 %vm2868_vm0, %v11134_v0  ;;  %v2838_v21 = vadd.f32 %v10984_v46, %v2803_v5  ;;  %v2804_v26 = vmul.f32 %v8966_v2, %v10979_v45  ;;  %v2730_v29 = vpop.f32.mrb[27].mxu0  ;;  %v11148_v35 = vpack.c.bf16 %v3382_v19, %v3381_v9  ;;  %v2898_v34 = vld [vmem:[#allocation2] sm:$0xff]  ;;  %v3623_v42 = vld [vmem:[#allocation2 + $0x10] sm:$0xff]  ;;  %v3626_v59 = vld [vmem:[#allocation2 + $0x28] sm:$0xff] }
 0x2ed   : > { %v2836_v36 = vadd.f32 %v10984_v46, %v2801_v11  ;;  %v2802_v37 = vmul.f32 %v10979_v45, %v2730_v29  ;;  %8991 = vmatprep.mubr.msk.bf16.mxu0 %vm2868_vm0, %v11144_v18  ;;  %v2922_v43 = vpack.c.bf16 %v2899_v20, %v2898_v34  ;;  %v3647_v58 = vpack.c.bf16 %v3624_v22, %v3623_v42  ;;  %v3628_v60 = vld [vmem:[#allocation2 + $0x38] sm:$0xff]  ;;  %v3625_v61 = vld [vmem:[#allocation2 + $0x20] sm:$0xff]  ;;  %v3627_v5 = vld [vmem:[#allocation2 + $0x30] sm:$0xff] }
 0x2ee   : > { %v2866_v38 = vmax.f32 %v2838_v21, 0.0  ;;  %v2839_v52 = vadd.f32 %v10984_v46, %v2804_v26  ;;  %9055 = vmatprep.mubr.msk.bf16.mxu1 %vm2868_vm0, %v11148_v35  ;;  %v11187_v51 = vpack.c.bf16 %v3626_v59, %v3625_v61  ;;  %v11189_v6 = vpack.c.bf16 %v3628_v60, %v3627_v5  ;;  %v10181_v7 = vld [vmem:[%s12034_s2 + $0x88] sm:$0xff]   ;;  %v10182_v9 = vld [vmem:[%s12034_s2 + $0x90] sm:$0xff]   ;;  %v3632_v11 = vld [vmem:[#allocation2 + $0x58] sm:$0xff] }
 0x2ef   : > { %v2864_v27 = vmax.f32 %v2836_v36, 0.0  ;;  %v2837_v39 = vadd.f32 %v10984_v46, %v2802_v37  ;;  %v3630_v8 = vld [vmem:[#allocation2 + $0x48] sm:$0xff]  ;;  %v3629_v2 = vld [vmem:[#allocation2 + $0x40] sm:$0xff]  ;;  %v3631_v21 = vld [vmem:[#allocation2 + $0x50] sm:$0xff] }
 0x2f0   : > { %2895 = vst.msk [vmem:[#allocation2 + $0xd0] sm:$0xff] %vm2868_vm0, %v2866_v38  ;;  %v2867_v17 = vmax.f32 %v2839_v52, 0.0  ;;  %v2961_v24 = vld [vmem:[#allocation2 + $0x99] sm:$0xff]  ;;  %v11205_v19 = vpack.c.bf16 %v3630_v8, %v3629_v2  ;;  %v11207_v26 = vpack.c.bf16 %v3632_v11, %v3631_v21  ;;  %v10185_v42 = vld [vmem:[%s12034_s2 + $0xa8] sm:$0xff]   ;;  %v10190_v8 = vld [vmem:[%s12034_s2 + $0xd0] sm:$0xff]  }
 0x2f1   : > { %v3384_v45 = vld [vmem:[#allocation2 + $0x9a] sm:$0xff]  ;;  %2893 = vst.msk [vmem:[#allocation2 + $0xc0] sm:$0xff] %vm2868_vm0, %v2864_v27  ;;  %v2865_v56 = vmax.f32 %v2837_v39, 0.0  ;;  %v11160_v1 = vpack.c.bf16 %v2961_v24, %v2960_v16  ;;  %v11175_v4 = vld [vmem:[#allocation2 + $0xb1] sm:$0xff]  ;;  %v3638_v16 = vld [vmem:[#allocation2 + $0x88] sm:$0xff] }
 0x2f2   : > { %v11162_v3 = vpack.c.bf16 %v3384_v45, %v3383_v49  ;;  %2897 = vst.msk [vmem:[#allocation2 + $0xd8] sm:$0x3f] %vm2896_vm1, %v2867_v17  ;;  %v2962_v13 = vld [vmem:[#allocation2 + $0xa1] sm:$0xff]  ;;  %v2963_v14 = vld [vmem:[#allocation2 + $0xa9] sm:$0xff]  ;;  %v2965_v12 = vld [vmem:[#allocation2 + $0xb9] sm:$0xf] }
 0x2f3   : > { %v3385_v28 = vld [vmem:[#allocation2 + $0xa2] sm:$0xff]  ;;  %2894 = vst.msk [vmem:[#allocation2 + $0xc8] sm:$0xff] %vm2868_vm0, %v2865_v56  ;;  %8992 = vmatmul.mubr.msk.bf16.gmra.mrb[44].mxu0 %vm2868_vm0, %v11160_v1  ;;  %v11169_v46 = vpack.c.bf16 %v2963_v14, %v2962_v13  ;;  %v3386_v47 = vld [vmem:[#allocation2 + $0xaa] sm:$0xff]  ;;  %v11179_v40 = vld [vmem:[#allocation2 + $0xb2] sm:$0xff]  ;;  %v2977_v33 = vpack.c.bf16 %v2965_v12, %v11175_v4 }
 0x2f4   : > { %9056 = vmatmul.mubr.msk.bf16.gmra.mrb[16].mxu1 %vm2868_vm0, %v11162_v3  ;;  %v11171_v57 = vpack.c.bf16 %v3386_v47, %v3385_v28  ;;  %v3388_v32 = vld [vmem:[#allocation2 + $0xba] sm:$0xf]  ;;  %v10184_v36 = vld [vmem:[%s12034_s2 + $0xa0] sm:$0xff]   ;;  %v3635_v27 = vld [vmem:[#allocation2 + $0x70] sm:$0xff] }
 0x2f5   : > { %8995 = vmatprep.mubr.msk.bf16.mxu0 %vm2868_vm0, %v11169_v46  ;;  %v3400_v30 = vpack.c.bf16 %v3388_v32, %v11179_v40  ;;  %v10183_v29 = vld [vmem:[%s12034_s2 + $0x98] sm:$0xff]   ;;  %v3633_v38 = vld [vmem:[#allocation2 + $0x60] sm:$0xff]  ;;  %v3639_v45 = vld [vmem:[#allocation2 + $0x90] sm:$0xff] }
 0x2f6   : > { %9059 = vmatprep.mubr.msk.bf16.mxu1 %vm2868_vm0, %v11171_v57  ;;  %v3636_v37 = vld [vmem:[#allocation2 + $0x78] sm:$0xff]  ;;  %v3637_v24 = vld [vmem:[#allocation2 + $0x80] sm:$0xff]  ;;  %v3642_v13 = vld [vmem:[#allocation2 + $0xa8] sm:$0xff] }
 0x2f7   : > { %v11225_v39 = vpack.c.bf16 %v3636_v37, %v3635_v27  ;;  %v3640_v17 = vld [vmem:[#allocation2 + $0x98] sm:$0xff]  ;;  %v11235_v49 = vpack.c.bf16 %v3638_v16, %v3637_v24  ;;  %v3641_v28 = vld [vmem:[#allocation2 + $0xa0] sm:$0xff]  ;;  %v3643_v12 = vld [vmem:[#allocation2 + $0xb0] sm:$0xff] }
 0x2f8   : > { %v11237_v56 = vpack.c.bf16 %v3640_v17, %v3639_v45  ;;  %v3644_v14 = vld [vmem:[#allocation2 + $0xb8] sm:$0xff]  ;;  %v11247_v47 = vpack.c.bf16 %v3642_v13, %v3641_v28  ;;  %v10194_v11 = vld [vmem:[%s12034_s2 + $0xf0] sm:$0xff]   ;;  %v4913_v24 = vld [vmem:[#allocation2 + $0x22] sm:$0xff] }
 0x2f9   : > { %v11249_v32 = vpack.c.bf16 %v3644_v14, %v3643_v12  ;;  %v2921_v20 = vld [vmem:[#allocation2 + $0xb8] sm:$0xf] }
 0x2fa   : > { %v3646_v22 = vld [vmem:[#allocation2 + $0xc8] sm:$0xf]  ;;  %v3902_v59 = vld [vmem:[#allocation2 + $0xb9] sm:$0xff]  ;;  %v4677_v16 = vld [vmem:[#allocation2 + $0xd1] sm:$0xff] }
 0x2fb   : > { %8996 = vmatmul.mubr.msk.bf16.gmra.mrb[48].mxu0 %vm2868_vm0, %v2977_v33  ;;  %v11259_v33 = vld [vmem:[#allocation2 + $0xc0] sm:$0xff]  ;;  %v11295_v60 = vpack.c.bf16 %v3902_v59, %v11175_v4  ;;  %v3904_v5 = vld [vmem:[#allocation2 + $0xc9] sm:$0xf]  ;;  %v4420_v21 = vld [vmem:[#allocation2 + $0xd8] sm:$0xf] }
 0x2fc   : > { %9060 = vmatmul.mubr.msk.bf16.gmra.mrb[20].mxu1 %vm2868_vm0, %v3400_v30  ;;  %9007 = vmatprep.mubr.msk.bf16.mxu0 %vm2868_vm0, %v2922_v43  ;;  %v2933_v30 = vpack.c.bf16 %v2921_v20, %v3643_v12  ;;  %v3658_v34 = vpack.c.bf16 %v3646_v22, %v11259_v33  ;;  %v10186_v43 = vld [vmem:[%s12034_s2 + $0xb0] sm:$0xff]   ;;  %v11301_v61 = vld [vmem:[#allocation2 + $0xc1] sm:$0xff] }
 0x2fd   : > { %9071 = vmatprep.mubr.msk.bf16.mxu1 %vm2868_vm0, %v3647_v58  ;;  %v10189_v4 = vld [vmem:[%s12034_s2 + $0xc8] sm:$0xff]   ;;  %v4920_v59 = vld [vmem:[#allocation2 + $0x5a] sm:$0xff] }
 0x2fe   : > { %v4418_v2 = vld [vmem:[#allocation2 + $0xc8] sm:$0xff] }
 0x2ff   : > { %v4918_v20 = vld [vmem:[#allocation2 + $0x4a] sm:$0xff] }
 0x303   : > { %9008 = vmatmul.mubr.msk.bf16.vlgmr.msra.gmra.mrb[28].mxu0 %vm2868_vm0, %v3647_v58  ;;  %v10188_v58 = vld [vmem:[%s12034_s2 + $0xc0] sm:$0xff]  }
 0x304   : > { %9072 = vmatmul.mubr.msk.bf16.vlgmr.msra.gmra.mrb[0].mxu1 %vm2868_vm0, %v11187_v51  ;;  %9011 = vmatprep.mubr.msk.bf16.mxu0 %vm2868_vm0, %v11187_v51 }
 0x305   : > { %9075 = vmatprep.mubr.msk.bf16.mxu1 %vm2868_vm0, %v11189_v6  ;;  %9096 = vmatpush3.bf16.msra.mxu1 %v11095_v31  ;;  %v3634_v31 = vld [vmem:[#allocation2 + $0x68] sm:$0xff] }
 0x306   : > { %9097 = vmatprep.subr.bf16.mxu1 %v10181_v7  ;;  %v11223_v52 = vpack.c.bf16 %v3634_v31, %v3633_v38  ;;  %v10197_v31 = vld [vmem:[%s12034_s2 + $0x108] sm:$0xff]  }
 0x309   : > { %9098 = vmatpush3.bf16.msra.mxu1 %v10181_v7  ;;  %v3916_v7 = vpack.c.bf16 %v3904_v5, %v11301_v61  ;;  %v4922_v5 = vld [vmem:[#allocation2 + $0x6a] sm:$0xff] }
 0x30a   : > { %9099 = vmatprep.subr.bf16.mxu1 %v10182_v9 }
 0x30b   : > { %9012 = vmatmul.mubr.msk.bf16.gmra.mrb[32].mxu0 %vm2868_vm0, %v11189_v6 }
 0x30c   : > { %9076 = vmatmul.mubr.msk.bf16.gmra.mrb[4].mxu1 %vm2868_vm0, %v11205_v19  ;;  %9015 = vmatprep.mubr.msk.bf16.mxu0 %vm2868_vm0, %v11205_v19 }
 0x30d   : > { %9079 = vmatprep.mubr.msk.bf16.mxu1 %vm2868_vm0, %v11207_v26  ;;  %9100 = vmatpush3.bf16.msra.mxu1 %v10182_v9 }
 0x30e   : > { %9101 = vmatprep.subr.bf16.mxu1 %v10183_v29 }
 0x311   : > { %9102 = vmatpush3.bf16.msra.mxu1 %v10183_v29 }
 0x312   : > { %9127 = vmatprep.subr.bf16.mxu1 %v10184_v36 }
 0x313   : > { %9016 = vmatmul.mubr.msk.bf16.gmra.mrb[36].mxu0 %vm2868_vm0, %v11207_v26 }
 0x314   : > { %9080 = vmatmul.mubr.msk.bf16.gmra.mrb[8].mxu1 %vm2868_vm0, %v11223_v52  ;;  %9019 = vmatprep.mubr.msk.bf16.mxu0 %vm2868_vm0, %v11223_v52 }
 0x315   : > { %9083 = vmatprep.mubr.msk.bf16.mxu1 %vm2868_vm0, %v11225_v39 }
 0x31b   : > { %9020 = vmatmul.mubr.msk.bf16.gmra.mrb[40].mxu0 %vm2868_vm0, %v11225_v39 }
 0x31c   : > { %9084 = vmatmul.mubr.msk.bf16.gmra.mrb[12].mxu1 %vm2868_vm0, %v11235_v49  ;;  %9023 = vmatprep.mubr.msk.bf16.mxu0 %vm2868_vm0, %v11235_v49 }
 0x31d   : > { %9087 = vmatprep.mubr.msk.bf16.mxu1 %vm2868_vm0, %v11237_v56 }
 0x323   : > { %9024 = vmatmul.mubr.msk.bf16.gmra.mrb[44].mxu0 %vm2868_vm0, %v11237_v56 }
 0x324   : > { %9088 = vmatmul.mubr.msk.bf16.gmra.mrb[16].mxu1 %vm2868_vm0, %v11247_v47  ;;  %9027 = vmatprep.mubr.msk.bf16.mxu0 %vm2868_vm0, %v11247_v47 }
 0x325   : > { %9091 = vmatprep.mubr.msk.bf16.mxu1 %vm2868_vm0, %v11249_v32 }
 0x32b   : > { %9028 = vmatmul.mubr.msk.bf16.gmra.mrb[48].mxu0 %vm2868_vm0, %v2933_v30 }
 0x32c   : > { %9092 = vmatmul.mubr.msk.bf16.gmra.mrb[20].mxu1 %vm2868_vm0, %v3658_v34 }
 0x32d   : > { %9103 = vmatprep.mubr.msk.bf16.mxu1 %vm2868_vm0, %v11022_v25  ;;  %v10187_v25 = vld [vmem:[%s12034_s2 + $0xb8] sm:$0xff]  }
 0x334   : > { %9104 = vmatmul.mubr.msk.bf16.vlgmr.msra.gmra.mrb[0].mxu1 %vm2868_vm0, %v11040_v44 }
 0x335   : > { %9107 = vmatprep.mubr.msk.bf16.mxu1 %vm2868_vm0, %v11064_v62  ;;  %9128 = vmatpush3.bf16.msra.mxu1 %v10184_v36  ;;  %v10198_v36 = vld [vmem:[%s12034_s2 + $0x110] sm:$0xff]  }
 0x336   : > { %9129 = vmatprep.subr.bf16.mxu1 %v10185_v42 }
 0x339   : > { %9130 = vmatpush3.bf16.msra.mxu1 %v10185_v42  ;;  %v10201_v42 = vld [vmem:[%s12035_s3 + $0x8] sm:$0xff]  }
 0x33a   : > { %9131 = vmatprep.subr.bf16.mxu1 %v10186_v43 }
 0x33c   : > { %9108 = vmatmul.mubr.msk.bf16.gmra.mrb[4].mxu1 %vm2868_vm0, %v11082_v15 }
 0x33d   : > { %9111 = vmatprep.mubr.msk.bf16.mxu1 %vm2868_vm0, %v11103_v54  ;;  %9132 = vmatpush3.bf16.msra.mxu1 %v10186_v43 }
 0x33e   : > { %9133 = vmatprep.subr.bf16.mxu1 %v10187_v25 }
 0x341   : > { %9134 = vmatpush3.bf16.msra.mxu1 %v10187_v25  ;;  %v10202_v25 = vld [vmem:[%s12035_s3 + $0x10] sm:$0xff]  }
 0x342   : > { %9159 = vmatprep.subr.bf16.mxu1 %v10188_v58 }
 0x344   : > { %9112 = vmatmul.mubr.msk.bf16.gmra.mrb[8].mxu1 %vm2868_vm0, %v11116_v53 }
 0x345   : > { %9115 = vmatprep.mubr.msk.bf16.mxu1 %vm2868_vm0, %v11132_v63 }
 0x34c   : > { %9116 = vmatmul.mubr.msk.bf16.gmra.mrb[12].mxu1 %vm2868_vm0, %v11144_v18 }
 0x34d   : > { %9119 = vmatprep.mubr.msk.bf16.mxu1 %vm2868_vm0, %v11160_v1 }
 0x354   : > { %9120 = vmatmul.mubr.msk.bf16.gmra.mrb[16].mxu1 %vm2868_vm0, %v11169_v46 }
 0x355   : > { %9123 = vmatprep.mubr.msk.bf16.mxu1 %vm2868_vm0, %v11295_v60 }
 0x35c   : > { %9124 = vmatmul.mubr.msk.bf16.gmra.mrb[20].mxu1 %vm2868_vm0, %v3916_v7 }
 0x35d   : > { %9135 = vmatprep.mubr.msk.bf16.mxu1 %vm2868_vm0, %v11024_v48  ;;  %v10191_v48 = vld [vmem:[%s12034_s2 + $0xd8] sm:$0xff]  }
 0x364   : > { %9136 = vmatmul.mubr.msk.bf16.vlgmr.msra.gmra.mrb[0].mxu1 %vm2868_vm0, %v11045_v10  ;;  %v10192_v10 = vld [vmem:[%s12034_s2 + $0xe0] sm:$0xff]  }
 0x365   : > { %9139 = vmatprep.mubr.msk.bf16.mxu1 %vm2868_vm0, %v11066_v50  ;;  %9160 = vmatpush3.bf16.msra.mxu1 %v10188_v58  ;;  %v4160_v50 = vld [vmem:[#allocation2 + $0xba] sm:$0xff] }
 0x366   : > { %9161 = vmatprep.subr.bf16.mxu1 %v10189_v4 }
 0x369   : > { %9162 = vmatpush3.bf16.msra.mxu1 %v10189_v4  ;;  %v4919_v4 = vld [vmem:[#allocation2 + $0x52] sm:$0xff] }
 0x36a   : > { %9163 = vmatprep.subr.bf16.mxu1 %v10190_v8 }
 0x36c   : > { %9140 = vmatmul.mubr.msk.bf16.gmra.mrb[4].mxu1 %vm2868_vm0, %v11086_v23  ;;  %v11336_v23 = vpack.c.bf16 %v4160_v50, %v11179_v40  ;;  %v10193_v40 = vld [vmem:[%s12034_s2 + $0xe8] sm:$0xff]  }
 0x36d   : > { %9143 = vmatprep.mubr.msk.bf16.mxu1 %vm2868_vm0, %v11105_v55  ;;  %9164 = vmatpush3.bf16.msra.mxu1 %v10190_v8  ;;  %v11342_v55 = vld [vmem:[#allocation2 + $0xc2] sm:$0xff] }
 0x36e   : > { %9165 = vmatprep.subr.bf16.mxu1 %v10191_v48 }
 0x371   : > { %9166 = vmatpush3.bf16.msra.mxu1 %v10191_v48  ;;  %v4940_v48 = vpack.c.bf16 %v4920_v59, %v4919_v4 }
 0x372   : > { %9191 = vmatprep.subr.bf16.mxu1 %v10192_v10 }
 0x374   : > { %9144 = vmatmul.mubr.msk.bf16.gmra.mrb[8].mxu1 %vm2868_vm0, %v11120_v41  ;;  %v4162_v41 = vld [vmem:[#allocation2 + $0xca] sm:$0xf] }
 0x375   : > { %9147 = vmatprep.mubr.msk.bf16.mxu1 %vm2868_vm0, %v11134_v0  ;;  %v4174_v9 = vpack.c.bf16 %v4162_v41, %v11342_v55 }
 0x37c   : > { %9148 = vmatmul.mubr.msk.bf16.gmra.mrb[12].mxu1 %vm2868_vm0, %v11148_v35 }
 0x37d   : > { %9151 = vmatprep.mubr.msk.bf16.mxu1 %vm2868_vm0, %v11162_v3 }
 0x384   : > { %9152 = vmatmul.mubr.msk.bf16.gmra.mrb[16].mxu1 %vm2868_vm0, %v11171_v57 }
 0x385   : > { %9155 = vmatprep.mubr.msk.bf16.mxu1 %vm2868_vm0, %v11336_v23 }
 0x38c   : > { %9156 = vmatmul.mubr.msk.bf16.gmra.mrb[20].mxu1 %vm2868_vm0, %v4174_v9 }
 0x38d   : > { %9167 = vmatprep.mubr.msk.bf16.mxu1 %vm2868_vm0, %v11187_v51  ;;  %v10195_v51 = vld [vmem:[%s12034_s2 + $0xf8] sm:$0xff]  }
 0x394   : > { %9168 = vmatmul.mubr.msk.bf16.vlgmr.msra.gmra.mrb[0].mxu1 %vm2868_vm0, %v11189_v6  ;;  %v10196_v6 = vld [vmem:[%s12034_s2 + $0x100] sm:$0xff]  }
 0x395   : > { %9171 = vmatprep.mubr.msk.bf16.mxu1 %vm2868_vm0, %v11205_v19  ;;  %9192 = vmatpush3.bf16.msra.mxu1 %v10192_v10  ;;  %v4431_v19 = vpack.c.bf16 %v4418_v2, %v11259_v33  ;;  %v4915_v33 = vld [vmem:[#allocation2 + $0x32] sm:$0xff]  ;;  %v4936_v2 = vld [vmem:[#allocation2 + $0xda] sm:$0xf] }
 0x396   : > { %9193 = vmatprep.subr.bf16.mxu1 %v10193_v40 }
 0x399   : > { %9194 = vmatpush3.bf16.msra.mxu1 %v10193_v40 }
 0x39a   : > { %9195 = vmatprep.subr.bf16.mxu1 %v10194_v11 }
 0x39c   : > { %9172 = vmatmul.mubr.msk.bf16.gmra.mrb[4].mxu1 %vm2868_vm0, %v11207_v26  ;;  %v4419_v26 = vld [vmem:[#allocation2 + $0xd0] sm:$0xff] }
 0x39d   : > { %9175 = vmatprep.mubr.msk.bf16.mxu1 %vm2868_vm0, %v11223_v52  ;;  %9196 = vmatpush3.bf16.msra.mxu1 %v10194_v11  ;;  %v4432_v29 = vpack.c.bf16 %v4420_v21, %v4419_v26  ;;  %v4676_v52 = vld [vmem:[#allocation2 + $0xc9] sm:$0xff]  ;;  %v11512_v26 = vld [vmem:[%s12038_s6] ss:$0 sm:$0xff] }
 0x39e   : > { %9197 = vmatprep.subr.bf16.mxu1 %v10195_v51  ;;  %v4934_v11 = vld [vmem:[#allocation2 + $0xca] sm:$0xff] }
 0x3a1   : > { %9198 = vmatpush3.bf16.msra.mxu1 %v10195_v51  ;;  %v4947_v51 = vpack.c.bf16 %v4934_v11, %v11342_v55  ;;  %v10208_v55 = vld [vmem:[%s12035_s3 + $0x38] sm:$0xff]  }
 0x3a2   : > { %9223 = vmatprep.subr.bf16.mxu1 %v10196_v6 }
 0x3a4   : > { %9176 = vmatmul.mubr.msk.bf16.gmra.mrb[8].mxu1 %vm2868_vm0, %v11225_v39  ;;  %v4689_v39 = vpack.c.bf16 %v4676_v52, %v11301_v61  ;;  %v4921_v61 = vld [vmem:[#allocation2 + $0x62] sm:$0xff] }
 0x3a5   : > { %9179 = vmatprep.mubr.msk.bf16.mxu1 %vm2868_vm0, %v11235_v49  ;;  %v4914_v49 = vld [vmem:[#allocation2 + $0x2a] sm:$0xff]  ;;  %v4941_v10 = vpack.c.bf16 %v4922_v5, %v4921_v61 }
 0x3a6   : > { %v4937_v14 = vpack.c.bf16 %v4914_v49, %v4913_v24 }
 0x3ac   : > { %9180 = vmatmul.mubr.msk.bf16.gmra.mrb[12].mxu1 %vm2868_vm0, %v11237_v56 }
 0x3ad   : > { %9183 = vmatprep.mubr.msk.bf16.mxu1 %vm2868_vm0, %v11247_v47  ;;  %v4916_v47 = vld [vmem:[#allocation2 + $0x3a] sm:$0xff] }
 0x3ae   : > { %v4938_v34 = vpack.c.bf16 %v4916_v47, %v4915_v33 }
 0x3b4   : > { %9184 = vmatmul.mubr.msk.bf16.gmra.mrb[16].mxu1 %vm2868_vm0, %v11249_v32  ;;  %v4917_v32 = vld [vmem:[#allocation2 + $0x42] sm:$0xff] }
 0x3b5   : > { %9187 = vmatprep.mubr.msk.bf16.mxu1 %vm2868_vm0, %v4431_v19  ;;  %v4939_v43 = vpack.c.bf16 %v4918_v20, %v4917_v32  ;;  %v11506_v19 = vld [vmem:[%s12035_s3 + $0x40] sm:$0xff]  }
 0x3bc   : > { %9188 = vmatmul.mubr.msk.bf16.gmra.mrb[20].mxu1 %vm2868_vm0, %v4432_v29 }
 0x3bd   : > { %9199 = vmatprep.mubr.msk.bf16.mxu1 %vm2868_vm0, %v11040_v44  ;;  %v10199_v44 = vld [vmem:[%s12034_s2 + $0x118] sm:$0xff]  }
 0x3c4   : > { %9200 = vmatmul.mubr.msk.bf16.vlgmr.msra.gmra.mrb[0].mxu1 %vm2868_vm0, %v11064_v62  ;;  %v10200_v62 = vld [vmem:[%s12035_s3] sm:$0xff]  }
 0x3c5   : > { %9203 = vmatprep.mubr.msk.bf16.mxu1 %vm2868_vm0, %v11082_v15  ;;  %9224 = vmatpush3.bf16.msra.mxu1 %v10196_v6  ;;  %v4935_v6 = vld [vmem:[#allocation2 + $0xd2] sm:$0xff] }
 0x3c6   : > { %9225 = vmatprep.subr.bf16.mxu1 %v10197_v31 }
 0x3c9   : > { %9226 = vmatpush3.bf16.msra.mxu1 %v10197_v31 }
 0x3ca   : > { %9227 = vmatprep.subr.bf16.mxu1 %v10198_v36 }
 0x3cc   : > { %9204 = vmatmul.mubr.msk.bf16.gmra.mrb[4].mxu1 %vm2868_vm0, %v11103_v54 }
 0x3cd   : > { %9207 = vmatprep.mubr.msk.bf16.mxu1 %vm2868_vm0, %v11116_v53  ;;  %9228 = vmatpush3.bf16.msra.mxu1 %v10198_v36  ;;  %v11518_v36 = vld [vmem:[%s12039_s7] ss:$0 sm:$0xff] }
 0x3ce   : > { %9229 = vmatprep.subr.bf16.mxu1 %v10199_v44 }
 0x3d1   : > { %9230 = vmatpush3.bf16.msra.mxu1 %v10199_v44 }
 0x3d2   : > { %9283 = vmatprep.subr.bf16.mxu1 %v10200_v62 }
 0x3d4   : > { %9208 = vmatmul.mubr.msk.bf16.gmra.mrb[8].mxu1 %vm2868_vm0, %v11132_v63 }
 0x3d5   : > { %9211 = vmatprep.mubr.msk.bf16.mxu1 %vm2868_vm0, %v11144_v18 }
 0x3d6   : > { %v11407_v15 = vpop.f32.mrb[28].mxu0 }
 0x3d7   : > { %v11409_v54 = vpop.f32.mrb[29].mxu0 }
 0x3d8   : > { %v11411_v37 = vpop.f32.mrb[30].mxu0 }
 0x3d9   : > { %v11413_v53 = vpop.f32.mrb[31].mxu0 }
 0x3dc   : > { %9212 = vmatmul.mubr.msk.bf16.gmra.mrb[12].mxu1 %vm2868_vm0, %v11160_v1 }
 0x3dd   : > { %9215 = vmatprep.mubr.msk.bf16.mxu1 %vm2868_vm0, %v11169_v46  ;;  %v4678_v46 = vld [vmem:[#allocation2 + $0xd9] sm:$0xf] }
 0x3de   : > { %v11419_v38 = vpop.f32.mrb[32].mxu0  ;;  %v4690_v13 = vpack.c.bf16 %v4678_v46, %v4677_v16 }
 0x3df   : > { %v11421_v63 = vpop.f32.mrb[33].mxu0 }
 0x3e0   : > { %v11423_v18 = vpop.f32.mrb[34].mxu0 }
 0x3e1   : > { %v11425_v27 = vpop.f32.mrb[35].mxu0 }
 0x3e4   : > { %9216 = vmatmul.mubr.msk.bf16.gmra.mrb[16].mxu1 %vm2868_vm0, %v11295_v60 }
 0x3e5   : > { %9219 = vmatprep.mubr.msk.bf16.mxu1 %vm2868_vm0, %v4689_v39 }
 0x3e6   : > { %v11431_v1 = vpop.f32.mrb[36].mxu0 }
 0x3e7   : > { %v11433_v17 = vpop.f32.mrb[37].mxu0 }
 0x3e8   : > { %v11435_v45 = vpop.f32.mrb[38].mxu0 }
 0x3e9   : > { %v11437_v56 = vpop.f32.mrb[39].mxu0 }
 0x3ec   : > { %9220 = vmatmul.mubr.msk.bf16.gmra.mrb[20].mxu1 %vm2868_vm0, %v4690_v13 }
 0x3ed   : > { %9231 = vmatprep.mubr.msk.bf16.mxu1 %vm2868_vm0, %v4937_v14 }
 0x3ee   : > { %v11441_v28 = vpop.f32.mrb[40].mxu0 }
 0x3ef   : > { %v11443_v12 = vpop.f32.mrb[41].mxu0 }
 0x3f0   : > { %v11445_v22 = vpop.f32.mrb[42].mxu0 }
 0x3f1   : > { %v11447_v30 = vpop.f32.mrb[43].mxu0 }
 0x3f4   : > { %9232 = vmatmul.mubr.msk.bf16.vlgmr.msra.gmra.mrb[0].mxu1 %vm2868_vm0, %v4938_v34 }
 0x3f5   : > { %9235 = vmatprep.mubr.msk.bf16.mxu1 %vm2868_vm0, %v4939_v43  ;;  %9284 = vmatpush3.bf16.msra.mxu1 %v10200_v62 }
 0x3f6   : > { %9285 = vmatprep.subr.bf16.mxu1 %v10201_v42  ;;  %v11457_v58 = vpop.f32.mrb[44].mxu0 }
 0x3f7   : > { %v11459_v60 = vpop.f32.mrb[45].mxu0 }
 0x3f8   : > { %v11461_v7 = vpop.f32.mrb[46].mxu0 }
 0x3f9   : > { %9286 = vmatpush3.bf16.msra.mxu1 %v10201_v42  ;;  %v11463_v8 = vpop.f32.mrb[47].mxu0 }
 0x3fa   : > { %9287 = vmatprep.subr.bf16.mxu1 %v10202_v25 }
 0x3fc   : > { %9236 = vmatmul.mubr.msk.bf16.gmra.mrb[4].mxu1 %vm2868_vm0, %v4940_v48 }
 0x3fd   : > { %9239 = vmatprep.mubr.msk.bf16.mxu1 %vm2868_vm0, %v4941_v10  ;;  %9288 = vmatpush3.bf16.msra.mxu1 %v10202_v25 }
 0x3fe   : > { %v11467_v50 = vpop.f32.mrb[48].mxu0 }
 0x3ff   : > { %v11469_v41 = vpop.f32.mrb[49].mxu0 }
 0x400   : > { %v11471_v9 = vpop.f32.mrb[50].mxu0 }
 0x401   : > { %v11473_v40 = vpop.f32.mrb[51].mxu0 }
 0x404   : > { %9240 = vmatmul.mubr.msk.bf16.gmra.mrb[8].mxu1 %vm2868_vm0, %v11134_v0  ;;  %v4948_v0 = vpack.c.bf16 %v4936_v2, %v4935_v6 }
 0x405   : > { %9243 = vmatprep.mubr.msk.bf16.mxu1 %vm2868_vm0, %v11148_v35  ;;  %v10204_v35 = vld [vmem:[%s12035_s3 + $0x20] sm:$0xff]  }
 0x406   : > { %9255 = vmatprep.subr.bf16.mxu0 %v10204_v35 }
 0x407   : > { %9256 = vmatpush3.bf16.msra.mxu0 %v10204_v35 }
 0x40c   : > { %9244 = vmatmul.mubr.msk.bf16.gmra.mrb[12].mxu1 %vm2868_vm0, %v11162_v3  ;;  %v10205_v3 = vld [vmem:[%s12035_s3 + $0x28] sm:$0xff]  }
 0x40d   : > { %9247 = vmatprep.mubr.msk.bf16.mxu1 %vm2868_vm0, %v11171_v57  ;;  %v10203_v57 = vld [vmem:[%s12035_s3 + $0x18] sm:$0xff]   ;;  %9257 = vmatprep.subr.bf16.mxu0 %v10205_v3 }
 0x40e   : > { %9289 = vmatprep.subr.bf16.mxu1 %v10203_v57  ;;  %9258 = vmatpush3.bf16.msra.mxu0 %v10205_v3 }
 0x40f   : > { %9290 = vmatpush3.bf16.msra.mxu1 %v10203_v57 }
 0x410   : > { %9311 = vmatprep.subr.bf16.mxu1 %v11506_v19 }
 0x414   : > { %9248 = vmatmul.mubr.msk.bf16.gmra.mrb[16].mxu1 %vm2868_vm0, %v11336_v23  ;;  %v10206_v23 = vld [vmem:[%s12035_s3 + $0x30] sm:$0xff]  }
 0x415   : > { %9251 = vmatprep.mubr.msk.bf16.mxu1 %vm2868_vm0, %v4947_v51  ;;  %9259 = vmatprep.subr.bf16.mxu0 %v10206_v23 }
 0x416   : > { %9260 = vmatpush3.bf16.msra.mxu0 %v10206_v23 }
 0x417   : > { %9261 = vmatprep.subr.bf16.mxu0 %v10208_v55 }
 0x41a   : > { %9262 = vmatpush3.bf16.msra.mxu0 %v10208_v55 }
 0x41c   : > { %9252 = vmatmul.mubr.msk.bf16.gmra.mrb[20].mxu1 %vm2868_vm0, %v4948_v0 }
 0x4c7   : > { %v9233_v21 = vpop.f32.mrb[0].mxu1 }
 0x4c8   : > { %v9507_v29 = vadd.f32 %v9233_v21, %v11407_v15  ;;  %v5052_v31 = vpop.f32.mrb[1].mxu1 }
 0x4c9   : > { %v9508_v44 = vadd.f32 %v5052_v31, %v11409_v54  ;;  %v9234_v62 = vpop.f32.mrb[2].mxu1 }
 0x4ca   : > { %v5180_v52 = vmul.f32 %v9507_v29, %v11512_v26  ;;  %v9509_v39 = vadd.f32 %v9234_v62, %v11411_v37  ;;  %v5055_v16 = vpop.f32.mrb[3].mxu1 }
 0x4cb   : > { %v5178_v46 = vmul.f32 %v9508_v44, %v11512_v26  ;;  %v9510_v24 = vadd.f32 %v5055_v16, %v11413_v53 }
 0x4cc   : > { %v5211_v15 = vadd.f32 %v11518_v36, %v5180_v52  ;;  %v5181_v49 = vmul.f32 %v9509_v39, %v11512_v26 }
 0x4cd   : > { %v5209_v13 = vadd.f32 %v11518_v36, %v5178_v46  ;;  %v5179_v14 = vmul.f32 %v9510_v24, %v11512_v26 }
 0x4ce   : > { %v5235_v47 = vmax.f32 %v5211_v15, 0.0  ;;  %v5212_v54 = vadd.f32 %v11518_v36, %v5181_v49 }
 0x4cf   : > { %v5233_v32 = vmax.f32 %v5209_v13, 0.0  ;;  %v5210_v20 = vadd.f32 %v11518_v36, %v5179_v14  ;;  %v9237_v37 = vpop.f32.mrb[4].mxu1 }
 0x4d0   : > { %5259 = vst.msk [vmem:[#allocation3 + $0x10] sm:$0xff] %vm2868_vm0, %v5235_v47  ;;  %v5236_v33 = vmax.f32 %v5212_v54, 0.0  ;;  %v9511_v53 = vadd.f32 %v9237_v37, %v11419_v38  ;;  %v5068_v34 = vpop.f32.mrb[5].mxu1 }
 0x4d1   : > { %5257 = vst.msk [vmem:[#allocation3] sm:$0xff] %vm2868_vm0, %v5233_v32  ;;  %v5234_v42 = vmax.f32 %v5210_v20, 0.0  ;;  %v9512_v43 = vadd.f32 %v5068_v34, %v11421_v63  ;;  %v9238_v25 = vpop.f32.mrb[6].mxu1 }
 0x4d2   : > { %5260 = vst.msk [vmem:[#allocation3 + $0x18] sm:$0xff] %vm2868_vm0, %v5236_v33  ;;  %v5184_v59 = vmul.f32 %v9511_v53, %v11512_v26  ;;  %v9513_v61 = vadd.f32 %v9238_v25, %v11423_v18  ;;  %v5071_v5 = vpop.f32.mrb[7].mxu1 }
 0x4d3   : > { %5258 = vst.msk [vmem:[#allocation3 + $0x8] sm:$0xff] %vm2868_vm0, %v5234_v42  ;;  %v5182_v4 = vmul.f32 %v9512_v43, %v11512_v26  ;;  %v9514_v38 = vadd.f32 %v5071_v5, %v11425_v27 }
 0x4d4   : > { %v5215_v48 = vadd.f32 %v11518_v36, %v5184_v59  ;;  %v5185_v10 = vmul.f32 %v9513_v61, %v11512_v26 }
 0x4d5   : > { %v5213_v63 = vadd.f32 %v11518_v36, %v5182_v4  ;;  %v5183_v11 = vmul.f32 %v9514_v38, %v11512_v26 }
 0x4d6   : > { %v5239_v51 = vmax.f32 %v5215_v48, 0.0  ;;  %v5216_v6 = vadd.f32 %v11518_v36, %v5185_v10 }
 0x4d7   : > { %v5237_v2 = vmax.f32 %v5213_v63, 0.0  ;;  %v5214_v18 = vadd.f32 %v11518_v36, %v5183_v11  ;;  %v9241_v0 = vpop.f32.mrb[8].mxu1  ;;  %v5284_v15 = vld [vmem:[#allocation3 + $0x10] sm:$0xff] }
 0x4d8   : > { %5263 = vst.msk [vmem:[#allocation3 + $0x30] sm:$0xff] %vm2868_vm0, %v5239_v51  ;;  %v5240_v35 = vmax.f32 %v5216_v6, 0.0  ;;  %v9515_v27 = vadd.f32 %v9241_v0, %v11431_v1  ;;  %v5084_v3 = vpop.f32.mrb[9].mxu1  ;;  %v5282_v21 = vld [vmem:[#allocation3] sm:$0xff] }
 0x4d9   : > { %5261 = vst.msk [vmem:[#allocation3 + $0x20] sm:$0xff] %vm2868_vm0, %v5237_v2  ;;  %v5238_v57 = vmax.f32 %v5214_v18, 0.0  ;;  %v9516_v23 = vadd.f32 %v5084_v3, %v11433_v17  ;;  %v9242_v55 = vpop.f32.mrb[10].mxu1  ;;  %v5285_v29 = vld [vmem:[#allocation3 + $0x18] sm:$0xff] }
 0x4da   : > { %5264 = vst.msk [vmem:[#allocation3 + $0x38] sm:$0xff] %vm2868_vm0, %v5240_v35  ;;  %v5188_v31 = vmul.f32 %v9515_v27, %v11512_v26  ;;  %v9517_v44 = vadd.f32 %v9242_v55, %v11435_v45  ;;  %v5087_v62 = vpop.f32.mrb[11].mxu1  ;;  %v5320_v52 = vld [vmem:[#allocation3 + $0x1] sm:$0xff]  ;;  %v5321_v39 = vld [vmem:[#allocation3 + $0x9] sm:$0xff]  ;;  %v11559_v14 = vpack.c.bf16 %v5285_v29, %v5284_v15  ;;  %v5322_v43 = vld [vmem:[#allocation3 + $0x11] sm:$0xff] }
 0x4db   : > { %v5283_v16 = vld [vmem:[#allocation3 + $0x8] sm:$0xff]  ;;  %5262 = vst.msk [vmem:[#allocation3 + $0x28] sm:$0xff] %vm2868_vm0, %v5238_v57  ;;  %v5186_v1 = vmul.f32 %v9516_v23, %v11512_v26  ;;  %v9518_v46 = vadd.f32 %v5087_v62, %v11437_v56  ;;  %v5340_v17 = vpack.c.bf16 %v5321_v39, %v5320_v52 }
 0x4dc   : > { %v5302_v24 = vpack.c.bf16 %v5283_v16, %v5282_v21  ;;  %v5219_v49 = vadd.f32 %v11518_v36, %v5188_v31  ;;  %v5189_v13 = vmul.f32 %v9517_v44, %v11512_v26  ;;  %v10209_v45 = vld [vmem:[%s12035_s3 + $0x48] sm:$0xff]  }
 0x4dd   : > { %v5217_v47 = vadd.f32 %v11518_v36, %v5186_v1  ;;  %v5187_v54 = vmul.f32 %v9518_v46, %v11512_v26  ;;  %9263 = vmatprep.mubr.msk.bf16.mxu0 %vm2868_vm0, %v5340_v17 }
 0x4de   : > { %9291 = vmatprep.mubr.msk.bf16.mxu1 %vm2868_vm0, %v5302_v24  ;;  %v5243_v56 = vmax.f32 %v5219_v49, 0.0  ;;  %v5220_v32 = vadd.f32 %v11518_v36, %v5189_v13 }
 0x4df   : > { %9292 = vmatmul.mubr.msk.bf16.vlgmr.msra.gmra.mrb[24].mxu1 %vm2868_vm0, %v11559_v14  ;;  %v5241_v20 = vmax.f32 %v5217_v47, 0.0  ;;  %v5218_v37 = vadd.f32 %v11518_v36, %v5187_v54  ;;  %v9245_v33 = vpop.f32.mrb[12].mxu1  ;;  %v5288_v35 = vld [vmem:[#allocation3 + $0x30] sm:$0xff] }
 0x4e0   : > { %9312 = vmatpush3.bf16.msra.mxu1 %v11506_v19  ;;  %5267 = vst.msk [vmem:[#allocation3 + $0x50] sm:$0xff] %vm2868_vm0, %v5243_v56  ;;  %v5244_v53 = vmax.f32 %v5220_v32, 0.0  ;;  %v9519_v34 = vadd.f32 %v9245_v33, %v11441_v28  ;;  %v5100_v42 = vpop.f32.mrb[13].mxu1  ;;  %v5323_v25 = vld [vmem:[#allocation3 + $0x19] sm:$0xff]  ;;  %v10210_v19 = vld [vmem:[%s12035_s3 + $0x50] sm:$0xff]  }
 0x4e1   : > { %9313 = vmatprep.subr.bf16.mxu1 %v10209_v45  ;;  %5265 = vst.msk [vmem:[#allocation3 + $0x40] sm:$0xff] %vm2868_vm0, %v5241_v20  ;;  %v5242_v59 = vmax.f32 %v5218_v37, 0.0  ;;  %v9520_v61 = vadd.f32 %v5100_v42, %v11443_v12  ;;  %v9246_v5 = vpop.f32.mrb[14].mxu1  ;;  %v11577_v4 = vpack.c.bf16 %v5323_v25, %v5322_v43  ;;  %v5286_v38 = vld [vmem:[#allocation3 + $0x20] sm:$0xff]  ;;  %v5289_v48 = vld [vmem:[#allocation3 + $0x38] sm:$0xff] }
 0x4e2   : > { %5268 = vst.msk [vmem:[#allocation3 + $0x58] sm:$0xff] %vm2868_vm0, %v5244_v53  ;;  %v5192_v28 = vmul.f32 %v9519_v34, %v11512_v26  ;;  %v9521_v10 = vadd.f32 %v9246_v5, %v11445_v22  ;;  %v5103_v63 = vpop.f32.mrb[15].mxu1  ;;  %v5324_v11 = vld [vmem:[#allocation3 + $0x21] sm:$0xff]  ;;  %v5325_v51 = vld [vmem:[#allocation3 + $0x29] sm:$0xff]  ;;  %v11596_v3 = vpack.c.bf16 %v5289_v48, %v5288_v35  ;;  %v5326_v16 = vld [vmem:[#allocation3 + $0x31] sm:$0xff] }
 0x4e3   : > { %v5287_v6 = vld [vmem:[#allocation3 + $0x28] sm:$0xff]  ;;  %5266 = vst.msk [vmem:[#allocation3 + $0x48] sm:$0xff] %vm2868_vm0, %v5242_v59  ;;  %v5190_v12 = vmul.f32 %v9520_v61, %v11512_v26  ;;  %v9522_v2 = vadd.f32 %v5103_v63, %v11447_v30  ;;  %9264 = vmatmul.mubr.msk.bf16.vlgmr.msra.gmra.mrb[52].mxu0 %vm2868_vm0, %v11577_v4  ;;  %v11590_v18 = vpack.c.bf16 %v5325_v51, %v5324_v11  ;;  %v10211_v30 = vld [vmem:[%s12035_s3 + $0x58] sm:$0xff]  }
 0x4e4   : > { %v11592_v0 = vpack.c.bf16 %v5287_v6, %v5286_v38  ;;  %v5223_v22 = vadd.f32 %v11518_v36, %v5192_v28  ;;  %v5193_v27 = vmul.f32 %v9521_v10, %v11512_v26  ;;  %9314 = vmatpush3.bf16.msra.mxu1 %v10209_v45  ;;  %v11620_v45 = vld [vmem:[%s12035_s3 + $0x60] sm:$0xff]  }
 0x4e5   : > { %v5221_v57 = vadd.f32 %v11518_v36, %v5190_v12  ;;  %v5191_v23 = vmul.f32 %v9522_v2, %v11512_v26  ;;  %9267 = vmatprep.mubr.msk.bf16.mxu0 %vm2868_vm0, %v11590_v18  ;;  %9315 = vmatprep.subr.bf16.mxu1 %v10210_v19 }
 0x4e6   : > { %9295 = vmatprep.mubr.msk.bf16.mxu1 %vm2868_vm0, %v11592_v0  ;;  %v5247_v55 = vmax.f32 %v5223_v22, 0.0  ;;  %v5224_v21 = vadd.f32 %v11518_v36, %v5193_v27 }
 0x4e7   : > { %9296 = vmatmul.mubr.msk.bf16.gmra.mrb[28].mxu1 %vm2868_vm0, %v11596_v3  ;;  %v5245_v29 = vmax.f32 %v5221_v57, 0.0  ;;  %v5222_v31 = vadd.f32 %v11518_v36, %v5191_v23  ;;  %v9249_v44 = vpop.f32.mrb[16].mxu1  ;;  %v5292_v34 = vld [vmem:[#allocation3 + $0x50] sm:$0xff] }
 0x4e8   : > { %5271 = vst.msk [vmem:[#allocation3 + $0x70] sm:$0xff] %vm2868_vm0, %v5247_v55  ;;  %v5248_v62 = vmax.f32 %v5224_v21, 0.0  ;;  %v9523_v52 = vadd.f32 %v9249_v44, %v11457_v58  ;;  %v5116_v39 = vpop.f32.mrb[17].mxu1  ;;  %v5327_v1 = vld [vmem:[#allocation3 + $0x39] sm:$0xff]  ;;  %9316 = vmatpush3.bf16.msra.mxu1 %v10210_v19 }
 0x4e9   : > { %5269 = vst.msk [vmem:[#allocation3 + $0x60] sm:$0xff] %vm2868_vm0, %v5245_v29  ;;  %v5246_v46 = vmax.f32 %v5222_v31, 0.0  ;;  %v9524_v17 = vadd.f32 %v5116_v39, %v11459_v60  ;;  %v9250_v24 = vpop.f32.mrb[18].mxu1  ;;  %v11615_v15 = vpack.c.bf16 %v5327_v1, %v5326_v16  ;;  %v5290_v49 = vld [vmem:[#allocation3 + $0x40] sm:$0xff]  ;;  %v5293_v13 = vld [vmem:[#allocation3 + $0x58] sm:$0xff]  ;;  %9317 = vmatprep.subr.bf16.mxu1 %v10211_v30 }
 0x4ea   : > { %5272 = vst.msk [vmem:[#allocation3 + $0x78] sm:$0xff] %vm2868_vm0, %v5248_v62  ;;  %v5196_v58 = vmul.f32 %v9523_v52, %v11512_v26  ;;  %v9525_v47 = vadd.f32 %v9250_v24, %v11461_v7  ;;  %v5119_v54 = vpop.f32.mrb[19].mxu1  ;;  %v5328_v56 = vld [vmem:[#allocation3 + $0x41] sm:$0xff]  ;;  %v5329_v60 = vld [vmem:[#allocation3 + $0x49] sm:$0xff]  ;;  %v11636_v43 = vpack.c.bf16 %v5293_v13, %v5292_v34  ;;  %v5330_v63 = vld [vmem:[#allocation3 + $0x51] sm:$0xff] }
 0x4eb   : > { %v5291_v32 = vld [vmem:[#allocation3 + $0x48] sm:$0xff]  ;;  %5270 = vst.msk [vmem:[#allocation3 + $0x68] sm:$0xff] %vm2868_vm0, %v5246_v46  ;;  %v5194_v20 = vmul.f32 %v9524_v17, %v11512_v26  ;;  %v9526_v37 = vadd.f32 %v5119_v54, %v11463_v8  ;;  %9268 = vmatmul.mubr.msk.bf16.gmra.mrb[56].mxu0 %vm2868_vm0, %v11615_v15  ;;  %v11630_v33 = vpack.c.bf16 %v5329_v60, %v5328_v56 }
 0x4ec   : > { %v11632_v53 = vpack.c.bf16 %v5291_v32, %v5290_v49  ;;  %v5227_v7 = vadd.f32 %v11518_v36, %v5196_v58  ;;  %v5197_v42 = vmul.f32 %v9525_v47, %v11512_v26  ;;  %9318 = vmatpush3.bf16.msra.mxu1 %v10211_v30  ;;  %v5693_v13 = vld [vmem:[#allocation3 + $0x2] sm:$0xff]  ;;  %v5694_v60 = vld [vmem:[#allocation3 + $0xa] sm:$0xff] }
 0x4ed   : > { %v5225_v25 = vadd.f32 %v11518_v36, %v5194_v20  ;;  %v5195_v59 = vmul.f32 %v9526_v37, %v11512_v26  ;;  %9271 = vmatprep.mubr.msk.bf16.mxu0 %vm2868_vm0, %v11630_v33  ;;  %9339 = vmatprep.subr.bf16.mxu1 %v11620_v45 }
 0x4ee   : > { %9299 = vmatprep.mubr.msk.bf16.mxu1 %vm2868_vm0, %v11632_v53  ;;  %v5251_v8 = vmax.f32 %v5227_v7, 0.0  ;;  %v5228_v61 = vadd.f32 %v11518_v36, %v5197_v42 }
 0x4ef   : > { %9300 = vmatmul.mubr.msk.bf16.gmra.mrb[32].mxu1 %vm2868_vm0, %v11636_v43  ;;  %v5249_v5 = vmax.f32 %v5225_v25, 0.0  ;;  %v5226_v38 = vadd.f32 %v11518_v36, %v5195_v59  ;;  %v9253_v48 = vpop.f32.mrb[20].mxu1  ;;  %v5296_v44 = vld [vmem:[#allocation3 + $0x70] sm:$0xff]  ;;  %v5713_v25 = vpack.c.bf16 %v5694_v60, %v5693_v13 }
 0x4f0   : > { %5275 = vst.msk [vmem:[#allocation3 + $0x90] sm:$0xff] %vm2868_vm0, %v5251_v8  ;;  %v5252_v19 = vmax.f32 %v5228_v61, 0.0  ;;  %v9527_v28 = vadd.f32 %v9253_v48, %v11467_v50  ;;  %v5132_v10 = vpop.f32.mrb[21].mxu1  ;;  %v5331_v11 = vld [vmem:[#allocation3 + $0x59] sm:$0xff]  ;;  %v5698_v48 = vld [vmem:[#allocation3 + $0x2a] sm:$0xff] }
 0x4f1   : > { %5273 = vst.msk [vmem:[#allocation3 + $0x80] sm:$0xff] %vm2868_vm0, %v5249_v5  ;;  %v5250_v51 = vmax.f32 %v5226_v38, 0.0  ;;  %v9528_v6 = vadd.f32 %v5132_v10, %v11469_v41  ;;  %v9254_v12 = vpop.f32.mrb[22].mxu1  ;;  %v11653_v2 = vpack.c.bf16 %v5331_v11, %v5330_v63  ;;  %v5294_v35 = vld [vmem:[#allocation3 + $0x60] sm:$0xff]  ;;  %v5297_v22 = vld [vmem:[#allocation3 + $0x78] sm:$0xff]  ;;  %v10213_v10 = vld [vmem:[%s12035_s3 + $0x68] sm:$0xff]  }
 0x4f2   : > { %5276 = vst.msk [vmem:[#allocation3 + $0x98] sm:$0xff] %vm2868_vm0, %v5252_v19  ;;  %v5200_v27 = vmul.f32 %v9527_v28, %v11512_v26  ;;  %v9529_v57 = vadd.f32 %v9254_v12, %v11471_v9  ;;  %v5135_v50 = vpop.f32.mrb[23].mxu1  ;;  %v5332_v23 = vld [vmem:[#allocation3 + $0x61] sm:$0xff]  ;;  %v5333_v30 = vld [vmem:[#allocation3 + $0x69] sm:$0xff]  ;;  %v11669_v52 = vpack.c.bf16 %v5297_v22, %v5296_v44  ;;  %v5695_v19 = vld [vmem:[#allocation3 + $0x12] sm:$0xff] }
 0x4f3   : > { %v5295_v55 = vld [vmem:[#allocation3 + $0x68] sm:$0xff]  ;;  %5274 = vst.msk [vmem:[#allocation3 + $0x88] sm:$0xff] %vm2868_vm0, %v5250_v51  ;;  %v5198_v21 = vmul.f32 %v9528_v6, %v11512_v26  ;;  %v9530_v41 = vadd.f32 %v5135_v50, %v11473_v40  ;;  %9272 = vmatmul.mubr.msk.bf16.gmra.mrb[60].mxu0 %vm2868_vm0, %v11653_v2  ;;  %v11663_v29 = vpack.c.bf16 %v5333_v30, %v5332_v23  ;;  %v5696_v5 = vld [vmem:[#allocation3 + $0x1a] sm:$0xff]  ;;  %v10214_v11 = vld [vmem:[%s12035_s3 + $0x70] sm:$0xff]  }
 0x4f4   : > { %v11665_v31 = vpack.c.bf16 %v5295_v55, %v5294_v35  ;;  %v5231_v9 = vadd.f32 %v11518_v36, %v5200_v27  ;;  %v5201_v62 = vmul.f32 %v9529_v57, %v11512_v26  ;;  %v5697_v38 = vld [vmem:[#allocation3 + $0x22] sm:$0xff]  ;;  %v11705_v28 = vpack.c.bf16 %v5696_v5, %v5695_v19  ;;  %v5700_v51 = vld [vmem:[#allocation3 + $0x3a] sm:$0xff]  ;;  %v5702_v12 = vld [vmem:[#allocation3 + $0x4a] sm:$0xff] }
 0x4f5   : > { %v5229_v39 = vadd.f32 %v11518_v36, %v5198_v21  ;;  %v5199_v16 = vmul.f32 %v9530_v41, %v11512_v26  ;;  %9275 = vmatprep.mubr.msk.bf16.mxu0 %vm2868_vm0, %v11663_v29  ;;  %v5334_v26 = vld [vmem:[#allocation3 + $0x71] sm:$0xff]  ;;  %v11710_v63 = vpack.c.bf16 %v5698_v48, %v5697_v38  ;;  %v5701_v6 = vld [vmem:[#allocation3 + $0x42] sm:$0xff]  ;;  %v5704_v50 = vld [vmem:[#allocation3 + $0x5a] sm:$0xff] }
 0x4f6   : > { %9303 = vmatprep.mubr.msk.bf16.mxu1 %vm2868_vm0, %v11665_v31  ;;  %v5255_v40 = vmax.f32 %v5231_v9, 0.0  ;;  %v5232_v1 = vadd.f32 %v11518_v36, %v5201_v62  ;;  %v5699_v35 = vld [vmem:[#allocation3 + $0x32] sm:$0xff]  ;;  %v11725_v57 = vpack.c.bf16 %v5702_v12, %v5701_v6  ;;  %v5705_v23 = vld [vmem:[#allocation3 + $0x62] sm:$0xff]  ;;  %v5706_v30 = vld [vmem:[#allocation3 + $0x6a] sm:$0xff] }
 0x4f7   : > { %9304 = vmatmul.mubr.msk.bf16.gmra.mrb[36].mxu1 %vm2868_vm0, %v11669_v52  ;;  %v5253_v46 = vmax.f32 %v5229_v39, 0.0  ;;  %v5230_v17 = vadd.f32 %v11518_v36, %v5199_v16  ;;  %v11692_v7 = vld [vmem:[#allocation3 + $0x90] sm:$0xff]  ;;  %v11720_v22 = vpack.c.bf16 %v5700_v51, %v5699_v35  ;;  %v10215_v27 = vld [vmem:[%s12035_s3 + $0x78] sm:$0xff]   ;;  %v11736_v41 = vpack.c.bf16 %v5706_v30, %v5705_v23  ;;  %v10228_v48 = vld [vmem:[%s12035_s3 + $0xe0] sm:$0xff]  }
 0x4f8   : > { %5279 = vst.msk [vmem:[#allocation3 + $0xb0] sm:$0xff] %vm2868_vm0, %v5255_v40  ;;  %v5256_v24 = vmax.f32 %v5232_v1, 0.0  ;;  %v5335_v49 = vld [vmem:[#allocation3 + $0x79] sm:$0xff]  ;;  %v10226_v5 = vld [vmem:[%s12035_s3 + $0xd0] sm:$0xff]   ;;  %v10229_v6 = vld [vmem:[%s12035_s3 + $0xe8] sm:$0xff]  }
 0x4f9   : > { %5277 = vst.msk [vmem:[#allocation3 + $0xa0] sm:$0xff] %vm2868_vm0, %v5253_v46  ;;  %v5254_v58 = vmax.f32 %v5230_v17, 0.0  ;;  %v11683_v47 = vpack.c.bf16 %v5335_v49, %v5334_v26  ;;  %v5298_v54 = vld [vmem:[#allocation3 + $0x80] sm:$0xff]  ;;  %v5301_v56 = vld [vmem:[#allocation3 + $0x98] sm:$0x3]  ;;  %v10218_v26 = vld [vmem:[%s12035_s3 + $0x90] sm:$0xff]  }
 0x4fa   : > { %5281 = vst.msk [vmem:[#allocation3 + $0xb8] sm:$0xf] %vm5280_vm2, %v5256_v24  ;;  %v5336_v32 = vld [vmem:[#allocation3 + $0x81] sm:$0xff]  ;;  %v5337_v20 = vld [vmem:[#allocation3 + $0x89] sm:$0xff]  ;;  %v5311_v42 = vpack.c.bf16 %v5301_v56, %v11692_v7  ;;  %v11700_v59 = vld [vmem:[#allocation3 + $0x91] sm:$0xff] }
 0x4fb   : > { %v5299_v37 = vld [vmem:[#allocation3 + $0x88] sm:$0xff]  ;;  %5278 = vst.msk [vmem:[#allocation3 + $0xa8] sm:$0xff] %vm2868_vm0, %v5254_v58  ;;  %9276 = vmatmul.mubr.msk.bf16.gmra.mrb[64].mxu0 %vm2868_vm0, %v11683_v47  ;;  %v11688_v36 = vpack.c.bf16 %v5337_v20, %v5336_v32  ;;  %v5339_v8 = vld [vmem:[#allocation3 + $0x99] sm:$0x3]  ;;  %v10220_v49 = vld [vmem:[%s12035_s3 + $0xa0] sm:$0xff]  }
 0x4fc   : > { %v11690_v34 = vpack.c.bf16 %v5299_v37, %v5298_v54  ;;  %v5349_v61 = vpack.c.bf16 %v5339_v8, %v11700_v59  ;;  %v5703_v55 = vld [vmem:[#allocation3 + $0x52] sm:$0xff]  ;;  %v5708_v44 = vld [vmem:[#allocation3 + $0x7a] sm:$0xff]  ;;  %v5709_v9 = vld [vmem:[#allocation3 + $0x82] sm:$0xff] }
 0x4fd   : > { %9279 = vmatprep.mubr.msk.bf16.mxu0 %vm2868_vm0, %v11688_v36  ;;  %v11734_v21 = vpack.c.bf16 %v5704_v50, %v5703_v55  ;;  %v5710_v62 = vld [vmem:[#allocation3 + $0x8a] sm:$0xff]  ;;  %v5707_v39 = vld [vmem:[#allocation3 + $0x72] sm:$0xff]  ;;  %v5712_v46 = vld [vmem:[#allocation3 + $0x9a] sm:$0x3] }
 0x4fe   : > { %9307 = vmatprep.mubr.msk.bf16.mxu1 %vm2868_vm0, %v11690_v34  ;;  %v11742_v16 = vpack.c.bf16 %v5708_v44, %v5707_v39  ;;  %v11744_v40 = vpack.c.bf16 %v5710_v62, %v5709_v9  ;;  %v11750_v1 = vld [vmem:[#allocation3 + $0x92] sm:$0xff]  ;;  %v10217_v24 = vld [vmem:[%s12035_s3 + $0x88] sm:$0xff]   ;;  %v10224_v37 = vld [vmem:[%s12035_s3 + $0xc0] sm:$0xff]  }
 0x4ff   : > { %9308 = vmatmul.mubr.msk.bf16.gmra.mrb[40].mxu1 %vm2868_vm0, %v5311_v42  ;;  %v5722_v17 = vpack.c.bf16 %v5712_v46, %v11750_v1  ;;  %v5936_v13 = vld [vmem:[#allocation3 + $0x98] sm:$0xff]  ;;  %v10221_v32 = vld [vmem:[%s12035_s3 + $0xa8] sm:$0xff]   ;;  %v10222_v20 = vld [vmem:[%s12035_s3 + $0xb0] sm:$0xff]  }
 0x500   : > { %9319 = vmatprep.mubr.msk.bf16.mxu1 %vm2868_vm0, %v5713_v25  ;;  %v11781_v58 = vpack.c.bf16 %v5936_v13, %v11692_v7  ;;  %v11787_v56 = vld [vmem:[#allocation3 + $0xa0] sm:$0xff]  ;;  %v10227_v38 = vld [vmem:[%s12035_s3 + $0xd8] sm:$0xff]   ;;  %v10230_v12 = vld [vmem:[%s12035_s3 + $0xf0] sm:$0xff]  }
 0x501   : > { %v6162_v7 = vld [vmem:[#allocation3 + $0x99] sm:$0xff]  ;;  %v6615_v55 = vld [vmem:[#allocation3 + $0xb0] sm:$0xff]  ;;  %v10233_v46 = vld [vmem:[%s12035_s3 + $0x108] sm:$0xff]  }
 0x502   : > { %v5938_v54 = vld [vmem:[#allocation3 + $0xa8] sm:$0x3]  ;;  %v11818_v42 = vpack.c.bf16 %v6162_v7, %v11700_v59  ;;  %v6388_v19 = vld [vmem:[#allocation3 + $0x9a] sm:$0xff] }
 0x503   : > { %9280 = vmatmul.mubr.msk.bf16.gmra.mrb[68].mxu0 %vm2868_vm0, %v5349_v61  ;;  %v5948_v60 = vpack.c.bf16 %v5938_v54, %v11787_v56  ;;  %v11824_v25 = vld [vmem:[#allocation3 + $0xa1] sm:$0xff]  ;;  %v6164_v8 = vld [vmem:[#allocation3 + $0xa9] sm:$0x3] }
 0x504   : > { %v6174_v61 = vpack.c.bf16 %v6164_v8, %v11824_v25  ;;  %v10225_v59 = vld [vmem:[%s12035_s3 + $0xc8] sm:$0xff]  }
 0x505   : > { %v6840_v54 = vld [vmem:[#allocation3 + $0xa9] sm:$0xff] }
 0x507   : > { %9320 = vmatmul.mubr.msk.bf16.vlgmr.msra.gmra.mrb[24].mxu1 %vm2868_vm0, %v11705_v28 }
 0x508   : > { %9323 = vmatprep.mubr.msk.bf16.mxu1 %vm2868_vm0, %v11710_v63  ;;  %9340 = vmatpush3.bf16.msra.mxu1 %v11620_v45  ;;  %v10216_v45 = vld [vmem:[%s12035_s3 + $0x80] sm:$0xff]  }
 0x509   : > { %9341 = vmatprep.subr.bf16.mxu1 %v10213_v10 }
 0x50c   : > { %9342 = vmatpush3.bf16.msra.mxu1 %v10213_v10  ;;  %v11861_v10 = vld [vmem:[#allocation3 + $0xa2] sm:$0xff] }
 0x50d   : > { %9343 = vmatprep.subr.bf16.mxu1 %v10214_v11 }
 0x50f   : > { %9324 = vmatmul.mubr.msk.bf16.gmra.mrb[28].mxu1 %vm2868_vm0, %v11720_v22 }
 0x510   : > { %9327 = vmatprep.mubr.msk.bf16.mxu1 %vm2868_vm0, %v11725_v57  ;;  %9344 = vmatpush3.bf16.msra.mxu1 %v10214_v11  ;;  %v6390_v11 = vld [vmem:[#allocation3 + $0xaa] sm:$0x3] }
 0x511   : > { %9345 = vmatprep.subr.bf16.mxu1 %v10215_v27  ;;  %v6400_v51 = vpack.c.bf16 %v6390_v11, %v11861_v10 }
 0x514   : > { %9346 = vmatpush3.bf16.msra.mxu1 %v10215_v27  ;;  %v6614_v27 = vld [vmem:[#allocation3 + $0xa8] sm:$0xff] }
 0x515   : > { %9367 = vmatprep.subr.bf16.mxu1 %v10216_v45 }
 0x517   : > { %9328 = vmatmul.mubr.msk.bf16.gmra.mrb[32].mxu1 %vm2868_vm0, %v11734_v21 }
 0x518   : > { %9331 = vmatprep.mubr.msk.bf16.mxu1 %vm2868_vm0, %v11736_v41 }
 0x51f   : > { %9332 = vmatmul.mubr.msk.bf16.gmra.mrb[36].mxu1 %vm2868_vm0, %v11742_v16 }
 0x520   : > { %9335 = vmatprep.mubr.msk.bf16.mxu1 %vm2868_vm0, %v11744_v40 }
 0x527   : > { %9336 = vmatmul.mubr.msk.bf16.gmra.mrb[40].mxu1 %vm2868_vm0, %v5722_v17 }
 0x528   : > { %9347 = vmatprep.mubr.msk.bf16.mxu1 %vm2868_vm0, %v11559_v14  ;;  %v10219_v14 = vld [vmem:[%s12035_s3 + $0x98] sm:$0xff]  }
 0x52f   : > { %9348 = vmatmul.mubr.msk.bf16.vlgmr.msra.gmra.mrb[24].mxu1 %vm2868_vm0, %v11592_v0 }
 0x530   : > { %9351 = vmatprep.mubr.msk.bf16.mxu1 %vm2868_vm0, %v11596_v3  ;;  %9368 = vmatpush3.bf16.msra.mxu1 %v10216_v45  ;;  %v6625_v45 = vpack.c.bf16 %v6614_v27, %v11787_v56  ;;  %v6842_v56 = vld [vmem:[#allocation3 + $0xb9] sm:$0x3] }
 0x531   : > { %9369 = vmatprep.subr.bf16.mxu1 %v10217_v24 }
 0x534   : > { %9370 = vmatpush3.bf16.msra.mxu1 %v10217_v24 }
 0x535   : > { %9371 = vmatprep.subr.bf16.mxu1 %v10218_v26 }
 0x537   : > { %9352 = vmatmul.mubr.msk.bf16.gmra.mrb[28].mxu1 %vm2868_vm0, %v11632_v53 }
 0x538   : > { %9355 = vmatprep.mubr.msk.bf16.mxu1 %vm2868_vm0, %v11636_v43  ;;  %9372 = vmatpush3.bf16.msra.mxu1 %v10218_v26  ;;  %v10234_v26 = vld [vmem:[%s12035_s3 + $0x110] sm:$0xff]  }
 0x539   : > { %9373 = vmatprep.subr.bf16.mxu1 %v10219_v14 }
 0x53c   : > { %9374 = vmatpush3.bf16.msra.mxu1 %v10219_v14 }
 0x53d   : > { %9395 = vmatprep.subr.bf16.mxu1 %v10220_v49 }
 0x53f   : > { %9356 = vmatmul.mubr.msk.bf16.gmra.mrb[32].mxu1 %vm2868_vm0, %v11665_v31 }
 0x540   : > { %9359 = vmatprep.mubr.msk.bf16.mxu1 %vm2868_vm0, %v11669_v52 }
 0x547   : > { %9360 = vmatmul.mubr.msk.bf16.gmra.mrb[36].mxu1 %vm2868_vm0, %v11690_v34 }
 0x548   : > { %9363 = vmatprep.mubr.msk.bf16.mxu1 %vm2868_vm0, %v11781_v58 }
 0x54f   : > { %9364 = vmatmul.mubr.msk.bf16.gmra.mrb[40].mxu1 %vm2868_vm0, %v5948_v60 }
 0x550   : > { %9375 = vmatprep.mubr.msk.bf16.mxu1 %vm2868_vm0, %v11577_v4  ;;  %v10223_v4 = vld [vmem:[%s12035_s3 + $0xb8] sm:$0xff]  }
 0x557   : > { %9376 = vmatmul.mubr.msk.bf16.vlgmr.msra.gmra.mrb[24].mxu1 %vm2868_vm0, %v11590_v18 }
 0x558   : > { %9379 = vmatprep.mubr.msk.bf16.mxu1 %vm2868_vm0, %v11615_v15  ;;  %9396 = vmatpush3.bf16.msra.mxu1 %v10220_v49 }
 0x559   : > { %9397 = vmatprep.subr.bf16.mxu1 %v10221_v32 }
 0x55c   : > { %9398 = vmatpush3.bf16.msra.mxu1 %v10221_v32 }
 0x55d   : > { %9399 = vmatprep.subr.bf16.mxu1 %v10222_v20 }
 0x55f   : > { %9380 = vmatmul.mubr.msk.bf16.gmra.mrb[28].mxu1 %vm2868_vm0, %v11630_v33 }
 0x560   : > { %9383 = vmatprep.mubr.msk.bf16.mxu1 %vm2868_vm0, %v11653_v2  ;;  %9400 = vmatpush3.bf16.msra.mxu1 %v10222_v20 }
 0x561   : > { %9401 = vmatprep.subr.bf16.mxu1 %v10223_v4 }
 0x564   : > { %9402 = vmatpush3.bf16.msra.mxu1 %v10223_v4 }
 0x565   : > { %9423 = vmatprep.subr.bf16.mxu1 %v10224_v37 }
 0x567   : > { %9384 = vmatmul.mubr.msk.bf16.gmra.mrb[32].mxu1 %vm2868_vm0, %v11663_v29 }
 0x568   : > { %9387 = vmatprep.mubr.msk.bf16.mxu1 %vm2868_vm0, %v11683_v47 }
 0x56f   : > { %9388 = vmatmul.mubr.msk.bf16.gmra.mrb[36].mxu1 %vm2868_vm0, %v11688_v36 }
 0x570   : > { %9391 = vmatprep.mubr.msk.bf16.mxu1 %vm2868_vm0, %v11818_v42 }
 0x577   : > { %9392 = vmatmul.mubr.msk.bf16.gmra.mrb[40].mxu1 %vm2868_vm0, %v6174_v61 }
 0x578   : > { %9403 = vmatprep.mubr.msk.bf16.mxu1 %vm2868_vm0, %v11705_v28  ;;  %v11855_v28 = vpack.c.bf16 %v6388_v19, %v11750_v1 }
 0x57f   : > { %9404 = vmatmul.mubr.msk.bf16.vlgmr.msra.gmra.mrb[24].mxu1 %vm2868_vm0, %v11710_v63 }
 0x580   : > { %9407 = vmatprep.mubr.msk.bf16.mxu1 %vm2868_vm0, %v11720_v22  ;;  %9424 = vmatpush3.bf16.msra.mxu1 %v10224_v37 }
 0x581   : > { %9425 = vmatprep.subr.bf16.mxu1 %v10225_v59 }
 0x584   : > { %9426 = vmatpush3.bf16.msra.mxu1 %v10225_v59 }
 0x585   : > { %9427 = vmatprep.subr.bf16.mxu1 %v10226_v5 }
 0x587   : > { %9408 = vmatmul.mubr.msk.bf16.gmra.mrb[28].mxu1 %vm2868_vm0, %v11725_v57 }
 0x588   : > { %9411 = vmatprep.mubr.msk.bf16.mxu1 %vm2868_vm0, %v11734_v21  ;;  %9428 = vmatpush3.bf16.msra.mxu1 %v10226_v5 }
 0x589   : > { %9429 = vmatprep.subr.bf16.mxu1 %v10227_v38 }
 0x58c   : > { %9430 = vmatpush3.bf16.msra.mxu1 %v10227_v38 }
 0x58d   : > { %9451 = vmatprep.subr.bf16.mxu1 %v10228_v48 }
 0x58f   : > { %9412 = vmatmul.mubr.msk.bf16.gmra.mrb[32].mxu1 %vm2868_vm0, %v11736_v41 }
 0x590   : > { %9415 = vmatprep.mubr.msk.bf16.mxu1 %vm2868_vm0, %v11742_v16 }
 0x597   : > { %9416 = vmatmul.mubr.msk.bf16.gmra.mrb[36].mxu1 %vm2868_vm0, %v11744_v40 }
 0x598   : > { %9419 = vmatprep.mubr.msk.bf16.mxu1 %vm2868_vm0, %v11855_v28 }
 0x59f   : > { %9420 = vmatmul.mubr.msk.bf16.gmra.mrb[40].mxu1 %vm2868_vm0, %v6400_v51 }
 0x5a0   : > { %9431 = vmatprep.mubr.msk.bf16.mxu1 %vm2868_vm0, %v11592_v0  ;;  %v10231_v0 = vld [vmem:[%s12035_s3 + $0xf8] sm:$0xff]  }
 0x5a7   : > { %9432 = vmatmul.mubr.msk.bf16.vlgmr.msra.gmra.mrb[24].mxu1 %vm2868_vm0, %v11596_v3  ;;  %v10232_v3 = vld [vmem:[%s12035_s3 + $0x100] sm:$0xff]  }
 0x5a8   : > { %9435 = vmatprep.mubr.msk.bf16.mxu1 %vm2868_vm0, %v11632_v53  ;;  %9452 = vmatpush3.bf16.msra.mxu1 %v10228_v48 }
 0x5a9   : > { %9453 = vmatprep.subr.bf16.mxu1 %v10229_v6 }
 0x5ac   : > { %9454 = vmatpush3.bf16.msra.mxu1 %v10229_v6 }
 0x5ad   : > { %9455 = vmatprep.subr.bf16.mxu1 %v10230_v12 }
 0x5af   : > { %9436 = vmatmul.mubr.msk.bf16.gmra.mrb[28].mxu1 %vm2868_vm0, %v11636_v43 }
 0x5b0   : > { %9439 = vmatprep.mubr.msk.bf16.mxu1 %vm2868_vm0, %v11665_v31  ;;  %9456 = vmatpush3.bf16.msra.mxu1 %v10230_v12 }
 0x5b1   : > { %9457 = vmatprep.subr.bf16.mxu1 %v10231_v0 }
 0x5b4   : > { %9458 = vmatpush3.bf16.msra.mxu1 %v10231_v0 }
 0x5b5   : > { %9479 = vmatprep.subr.bf16.mxu1 %v10232_v3 }
 0x5b6   : > { %v11887_v53 = vpop.f32.mrb[52].mxu0 }
 0x5b7   : > { %9440 = vmatmul.mubr.msk.bf16.gmra.mrb[32].mxu1 %vm2868_vm0, %v11669_v52  ;;  %v11891_v35 = vpop.f32.mrb[53].mxu0 }
 0x5b8   : > { %9443 = vmatprep.mubr.msk.bf16.mxu1 %vm2868_vm0, %v11690_v34  ;;  %v11895_v43 = vpop.f32.mrb[54].mxu0  ;;  %v6616_v34 = vld [vmem:[#allocation3 + $0xb8] sm:$0x3] }
 0x5b9   : > { %v11897_v31 = vpop.f32.mrb[55].mxu0  ;;  %v6626_v44 = vpack.c.bf16 %v6616_v34, %v6615_v55 }
 0x5be   : > { %v11900_v50 = vpop.f32.mrb[56].mxu0 }
 0x5bf   : > { %9444 = vmatmul.mubr.msk.bf16.gmra.mrb[36].mxu1 %vm2868_vm0, %v11781_v58  ;;  %v11904_v23 = vpop.f32.mrb[57].mxu0 }
 0x5c0   : > { %9447 = vmatprep.mubr.msk.bf16.mxu1 %vm2868_vm0, %v6625_v45  ;;  %v11907_v52 = vpop.f32.mrb[58].mxu0 }
 0x5c1   : > { %v11909_v30 = vpop.f32.mrb[59].mxu0 }
 0x5c6   : > { %v11911_v9 = vpop.f32.mrb[60].mxu0 }
 0x5c7   : > { %9448 = vmatmul.mubr.msk.bf16.gmra.mrb[40].mxu1 %vm2868_vm0, %v6626_v44  ;;  %v11914_v62 = vpop.f32.mrb[61].mxu0 }
 0x5c8   : > { %9459 = vmatprep.mubr.msk.bf16.mxu1 %vm2868_vm0, %v11590_v18  ;;  %v11918_v39 = vpop.f32.mrb[62].mxu0 }
 0x5c9   : > { %v11920_v1 = vpop.f32.mrb[63].mxu0 }
 0x5ce   : > { %v11925_v17 = vpop.f32.mrb[64].mxu0 }
 0x5cf   : > { %9460 = vmatmul.mubr.msk.bf16.vlgmr.msra.gmra.mrb[24].mxu1 %vm2868_vm0, %v11615_v15  ;;  %v11929_v24 = vpop.f32.mrb[65].mxu0  ;;  %v10235_v15 = vld [vmem:[%s12035_s3 + $0x118] sm:$0xff]  }
 0x5d0   : > { %9463 = vmatprep.mubr.msk.bf16.mxu1 %vm2868_vm0, %v11630_v33  ;;  %9480 = vmatpush3.bf16.msra.mxu1 %v10232_v3  ;;  %v11933_v18 = vpop.f32.mrb[66].mxu0 }
 0x5d1   : > { %9481 = vmatprep.subr.bf16.mxu1 %v10233_v46  ;;  %v11938_v14 = vpop.f32.mrb[67].mxu0 }
 0x5d4   : > { %9482 = vmatpush3.bf16.msra.mxu1 %v10233_v46 }
 0x5d5   : > { %9483 = vmatprep.subr.bf16.mxu1 %v10234_v26 }
 0x5d6   : > { %v11943_v49 = vpop.f32.mrb[68].mxu0 }
 0x5d7   : > { %9464 = vmatmul.mubr.msk.bf16.gmra.mrb[28].mxu1 %vm2868_vm0, %v11653_v2  ;;  %v11947_v33 = vpop.f32.mrb[69].mxu0  ;;  %v6851_v2 = vpack.c.bf16 %v6840_v54, %v11824_v25 }
 0x5d8   : > { %9467 = vmatprep.mubr.msk.bf16.mxu1 %vm2868_vm0, %v11663_v29  ;;  %9484 = vmatpush3.bf16.msra.mxu1 %v10234_v26  ;;  %v11951_v13 = vpop.f32.mrb[70].mxu0  ;;  %v6841_v29 = vld [vmem:[#allocation3 + $0xb1] sm:$0xff] }
 0x5d9   : > { %9485 = vmatprep.subr.bf16.mxu1 %v10235_v15  ;;  %v11953_v58 = vpop.f32.mrb[71].mxu0  ;;  %v6852_v60 = vpack.c.bf16 %v6842_v56, %v6841_v29 }
 0x5dc   : > { %9486 = vmatpush3.bf16.msra.mxu1 %v10235_v15 }
 0x5df   : > { %9468 = vmatmul.mubr.msk.bf16.gmra.mrb[32].mxu1 %vm2868_vm0, %v11683_v47  ;;  %v7066_v47 = vld [vmem:[#allocation3 + $0xaa] sm:$0xff] }
 0x5e0   : > { %9471 = vmatprep.mubr.msk.bf16.mxu1 %vm2868_vm0, %v11688_v36  ;;  %v7077_v36 = vpack.c.bf16 %v7066_v47, %v11861_v10 }
 0x5e7   : > { %9472 = vmatmul.mubr.msk.bf16.gmra.mrb[36].mxu1 %vm2868_vm0, %v11818_v42 }
 0x5e8   : > { %9475 = vmatprep.mubr.msk.bf16.mxu1 %vm2868_vm0, %v6851_v2 }
 0x5ef   : > { %9476 = vmatmul.mubr.msk.bf16.gmra.mrb[40].mxu1 %vm2868_vm0, %v6852_v60 }
 0x5f0   : > { %9487 = vmatprep.mubr.msk.bf16.mxu1 %vm2868_vm0, %v11710_v63  ;;  %v7067_v63 = vld [vmem:[#allocation3 + $0xb2] sm:$0xff] }
 0x5f7   : > { %9488 = vmatmul.mubr.msk.bf16.vlgmr.msra.gmra.mrb[24].mxu1 %vm2868_vm0, %v11720_v22  ;;  %v7068_v22 = vld [vmem:[#allocation3 + $0xba] sm:$0x3] }
 0x5f8   : > { %9491 = vmatprep.mubr.msk.bf16.mxu1 %vm2868_vm0, %v11725_v57  ;;  %v7078_v57 = vpack.c.bf16 %v7068_v22, %v7067_v63 }
 0x5ff   : > { %9492 = vmatmul.mubr.msk.bf16.gmra.mrb[28].mxu1 %vm2868_vm0, %v11734_v21 }
 0x600   : > { %9495 = vmatprep.mubr.msk.bf16.mxu1 %vm2868_vm0, %v11736_v41 }
 0x607   : > { %9496 = vmatmul.mubr.msk.bf16.gmra.mrb[32].mxu1 %vm2868_vm0, %v11742_v16 }
 0x608   : > { %9499 = vmatprep.mubr.msk.bf16.mxu1 %vm2868_vm0, %v11744_v40 }
 0x60f   : > { %9500 = vmatmul.mubr.msk.bf16.gmra.mrb[36].mxu1 %vm2868_vm0, %v11855_v28 }
 0x610   : > { %9503 = vmatprep.mubr.msk.bf16.mxu1 %vm2868_vm0, %v7077_v36 }
 0x617   : > { %9504 = vmatmul.mubr.msk.bf16.gmra.mrb[40].mxu1 %vm2868_vm0, %v7078_v57 }
 0x6ca   : > { %v9489_v21 = vpop.f32.mrb[24].mxu1 }
 0x6cb   : > { %v9531_v41 = vadd.f32 %v9489_v21, %v11887_v53  ;;  %v7176_v16 = vpop.f32.mrb[25].mxu1 }
 0x6cc   : > { %v9532_v32 = vadd.f32 %v7176_v16, %v11891_v35  ;;  %v9490_v40 = vpop.f32.mrb[26].mxu1 }
 0x6cd   : > { %v8082_v20 = vmul.f32 -1.442695, %v9531_v41  ;;  %v9533_v4 = vadd.f32 %v9490_v40, %v11895_v43  ;;  %v7179_v37 = vpop.f32.mrb[27].mxu1 }
 0x6ce   : > { %v8080_v7 = vmul.f32 -1.442695, %v9532_v32  ;;  %v9534_v42 = vadd.f32 %v7179_v37, %v11897_v31 }
 0x6cf   : > { %10236 = vpow2.f32 %v8082_v20  ;;  %v8083_v25 = vmul.f32 -1.442695, %v9533_v4 }
 0x6d0   : > { %10238 = vpow2.f32 %v8080_v7  ;;  %v8081_v8 = vmul.f32 -1.442695, %v9534_v42 }
 0x6d1   : > { %10240 = vpow2.f32 %v8083_v25 }
 0x6d2   : > { %10242 = vpow2.f32 %v8081_v8  ;;  %v9493_v61 = vpop.f32.mrb[28].mxu1 }
 0x6d3   : > { %v9535_v59 = vadd.f32 %v9493_v61, %v11900_v50  ;;  %v7192_v5 = vpop.f32.mrb[29].mxu1 }
 0x6d4   : > { %v9536_v38 = vadd.f32 %v7192_v5, %v11904_v23  ;;  %v9494_v48 = vpop.f32.mrb[30].mxu1 }
 0x6d5   : > { %v8086_v19 = vmul.f32 -1.442695, %v9535_v59  ;;  %v9537_v28 = vadd.f32 %v9494_v48, %v11907_v52  ;;  %v7195_v10 = vpop.f32.mrb[31].mxu1 }
 0x6d6   : > { %v8084_v11 = vmul.f32 -1.442695, %v9536_v38  ;;  %v9538_v51 = vadd.f32 %v7195_v10, %v11909_v30 }
 0x6d7   : > { %10244 = vpow2.f32 %v8086_v19  ;;  %v8087_v6 = vmul.f32 -1.442695, %v9537_v28 }
 0x6d8   : > { %10246 = vpow2.f32 %v8084_v11  ;;  %v8085_v12 = vmul.f32 -1.442695, %v9538_v51 }
 0x6d9   : > { %v10237_v0 = vpop.eup %10236  ;;  %10248 = vpow2.f32 %v8087_v6 }
 0x6da   : > { %v10239_v3 = vpop.eup %10238  ;;  %v7337_v53 = vadd.f32 1.0, %v10237_v0  ;;  %10250 = vpow2.f32 %v8085_v12  ;;  %v9497_v35 = vpop.f32.mrb[32].mxu1 }
 0x6db   : > { %v10241_v43 = vpop.eup %10240  ;;  %v7335_v31 = vadd.f32 1.0, %v10239_v3  ;;  %v9539_v27 = vadd.f32 %v9497_v35, %v11911_v9  ;;  %v7208_v45 = vpop.f32.mrb[33].mxu1 }
 0x6dc   : > { %v10243_v50 = vpop.eup %10242  ;;  %10252 = vrcp.f32 %v7337_v53  ;;  %v7338_v23 = vadd.f32 1.0, %v10241_v43  ;;  %v9540_v52 = vadd.f32 %v7208_v45, %v11914_v62  ;;  %v9498_v30 = vpop.f32.mrb[34].mxu1 }
 0x6dd   : > { %10254 = vrcp.f32 %v7335_v31  ;;  %v7336_v34 = vadd.f32 1.0, %v10243_v50  ;;  %v8090_v55 = vmul.f32 -1.442695, %v9539_v27  ;;  %v9541_v44 = vadd.f32 %v9498_v30, %v11918_v39  ;;  %v7211_v46 = vpop.f32.mrb[35].mxu1 }
 0x6de   : > { %10256 = vrcp.f32 %v7338_v23  ;;  %v8088_v26 = vmul.f32 -1.442695, %v9540_v52  ;;  %v9542_v15 = vadd.f32 %v7211_v46, %v11920_v1 }
 0x6df   : > { %10258 = vrcp.f32 %v7336_v34  ;;  %v8091_v9 = vmul.f32 -1.442695, %v9541_v44 }
 0x6e0   : > { %10260 = vpow2.f32 %v8090_v55  ;;  %v8089_v54 = vmul.f32 -1.442695, %v9542_v15 }
 0x6e1   : > { %v10245_v2 = vpop.eup %10244  ;;  %10262 = vpow2.f32 %v8088_v26 }
 0x6e2   : > { %v10247_v29 = vpop.eup %10246  ;;  %v7341_v62 = vadd.f32 1.0, %v10245_v2  ;;  %10264 = vpow2.f32 %v8091_v9  ;;  %v9501_v56 = vpop.f32.mrb[36].mxu1 }
 0x6e3   : > { %v10249_v60 = vpop.eup %10248  ;;  %v7339_v47 = vadd.f32 1.0, %v10247_v29  ;;  %10266 = vpow2.f32 %v8089_v54  ;;  %v9543_v39 = vadd.f32 %v9501_v56, %v11925_v17  ;;  %v7224_v36 = vpop.f32.mrb[37].mxu1 }
 0x6e4   : > { %v10251_v63 = vpop.eup %10250  ;;  %10268 = vrcp.f32 %v7341_v62  ;;  %v7342_v1 = vadd.f32 1.0, %v10249_v60  ;;  %v9544_v22 = vadd.f32 %v7224_v36, %v11929_v24  ;;  %v9502_v57 = vpop.f32.mrb[38].mxu1 }
 0x6e5   : > { %10270 = vrcp.f32 %v7339_v47  ;;  %v7340_v21 = vadd.f32 1.0, %v10251_v63  ;;  %v8094_v41 = vmul.f32 -1.442695, %v9543_v39  ;;  %v9545_v17 = vadd.f32 %v9502_v57, %v11933_v18  ;;  %v7227_v16 = vpop.f32.mrb[39].mxu1 }
 0x6e6   : > { %v10253_v32 = vpop.eup %10252  ;;  %10272 = vrcp.f32 %v7342_v1  ;;  %v8092_v40 = vmul.f32 -1.442695, %v9544_v22  ;;  %v9546_v20 = vadd.f32 %v7227_v16, %v11938_v14 }
 0x6e7   : > { %v10255_v4 = vpop.eup %10254  ;;  %7397 = vst [vmem:[%s12000_s17 + $0x10] sm:$0xff] %v10253_v32  ;;  %10274 = vrcp.f32 %v7340_v21  ;;  %v8095_v37 = vmul.f32 -1.442695, %v9545_v17 }
 0x6e8   : > { %v10257_v24 = vpop.eup %10256  ;;  %7395 = vst [vmem:[%s12000_s17] sm:$0xff] %v10255_v4  ;;  %10276 = vpow2.f32 %v8094_v41  ;;  %v8093_v7 = vmul.f32 -1.442695, %v9546_v20 }
 0x6e9   : > { %v10259_v42 = vpop.eup %10258  ;;  %7398 = vst [vmem:[%s12000_s17 + $0x18] sm:$0xff] %v10257_v24  ;;  %10278 = vpow2.f32 %v8092_v40 }
 0x6ea   : > { %v10261_v25 = vpop.eup %10260  ;;  %7396 = vst [vmem:[%s12000_s17 + $0x8] sm:$0xff] %v10259_v42  ;;  %10280 = vpow2.f32 %v8095_v37  ;;  %v9505_v18 = vpop.f32.mrb[40].mxu1 }
 0x6eb   : > { %v10263_v8 = vpop.eup %10262  ;;  %v7345_v61 = vadd.f32 1.0, %v10261_v25  ;;  %10282 = vpow2.f32 %v8093_v7  ;;  %v9547_v14 = vadd.f32 %v9505_v18, %v11943_v49  ;;  %v7240_v59 = vpop.f32.mrb[41].mxu1 }
 0x6ec   : > { %v10265_v5 = vpop.eup %10264  ;;  %v7343_v38 = vadd.f32 1.0, %v10263_v8  ;;  %v9548_v48 = vadd.f32 %v7240_v59, %v11947_v33  ;;  %v9506_v19 = vpop.f32.mrb[42].mxu1 }
 0x6ed   : > { %v10267_v28 = vpop.eup %10266  ;;  %10284 = vrcp.f32 %v7345_v61  ;;  %v7346_v10 = vadd.f32 1.0, %v10265_v5  ;;  %v8098_v11 = vmul.f32 -1.442695, %v9547_v14  ;;  %v9549_v51 = vadd.f32 %v9506_v19, %v11951_v13  ;;  %v7243_v6 = vpop.f32.mrb[43].mxu1 }
 0x6ee   : > { %v10269_v12 = vpop.eup %10268  ;;  %10286 = vrcp.f32 %v7343_v38  ;;  %v7344_v49 = vadd.f32 1.0, %v10267_v28  ;;  %v8096_v0 = vmul.f32 -1.442695, %v9548_v48  ;;  %v9550_v3 = vadd.f32 %v7243_v6, %v11953_v58 }
 0x6ef   : > { %v10271_v53 = vpop.eup %10270  ;;  %7401 = vst [vmem:[%s12000_s17 + $0x30] sm:$0xff] %v10269_v12  ;;  %10288 = vrcp.f32 %v7346_v10  ;;  %v8099_v33 = vmul.f32 -1.442695, %v9549_v51 }
 0x6f0   : > { %v10273_v35 = vpop.eup %10272  ;;  %7399 = vst [vmem:[%s12000_s17 + $0x20] sm:$0xff] %v10271_v53  ;;  %10290 = vrcp.f32 %v7344_v49  ;;  %v8097_v43 = vmul.f32 -1.442695, %v9550_v3 }
 0x6f1   : > { %v10275_v31 = vpop.eup %10274  ;;  %7402 = vst [vmem:[%s12000_s17 + $0x38] sm:$0xff] %v10273_v35  ;;  %10292 = vpow2.f32 %v8098_v11 }
 0x6f2   : > { %v10277_v13 = vpop.eup %10276  ;;  %7400 = vst [vmem:[%s12000_s17 + $0x28] sm:$0xff] %v10275_v31  ;;  %10294 = vpow2.f32 %v8096_v0 }
 0x6f3   : > { %v10279_v27 = vpop.eup %10278  ;;  %v7349_v45 = vadd.f32 1.0, %v10277_v13  ;;  %10296 = vpow2.f32 %v8099_v33 }
 0x6f4   : > { %v10281_v58 = vpop.eup %10280  ;;  %v7347_v50 = vadd.f32 1.0, %v10279_v27  ;;  %10298 = vpow2.f32 %v8097_v43 }
 0x6f5   : > { %v10283_v23 = vpop.eup %10282  ;;  %10300 = vrcp.f32 %v7349_v45  ;;  %v7350_v52 = vadd.f32 1.0, %v10281_v58 }
 0x6f6   : > { %10302 = vrcp.f32 %v7347_v50  ;;  %v7348_v30 = vadd.f32 1.0, %v10283_v23 }
 0x6f7   : > { %v10285_v34 = vpop.eup %10284  ;;  %10304 = vrcp.f32 %v7350_v52 }
 0x6f8   : > { %v10287_v55 = vpop.eup %10286  ;;  %7405 = vst [vmem:[%s12000_s17 + $0x50] sm:$0xff] %v10285_v34  ;;  %10306 = vrcp.f32 %v7348_v30 }
 0x6f9   : > { %v10289_v44 = vpop.eup %10288  ;;  %7403 = vst [vmem:[%s12000_s17 + $0x40] sm:$0xff] %v10287_v55 }
 0x6fa   : > { %v10291_v46 = vpop.eup %10290  ;;  %7406 = vst [vmem:[%s12000_s17 + $0x58] sm:$0xff] %v10289_v44 }
 0x6fb   : > { %v10293_v26 = vpop.eup %10292  ;;  %7404 = vst [vmem:[%s12000_s17 + $0x48] sm:$0xff] %v10291_v46 }
 0x6fc   : > { %v10295_v15 = vpop.eup %10294  ;;  %v7353_v9 = vadd.f32 1.0, %v10293_v26 }
 0x6fd   : > { %v10297_v54 = vpop.eup %10296  ;;  %v7351_v2 = vadd.f32 1.0, %v10295_v15 }
 0x6fe   : > { %v10299_v29 = vpop.eup %10298  ;;  %10308 = vrcp.f32 %v7353_v9  ;;  %v7354_v62 = vadd.f32 1.0, %v10297_v54 }
 0x6ff   : > { %v10301_v56 = vpop.eup %10300  ;;  %10310 = vrcp.f32 %v7351_v2  ;;  %v7352_v60 = vadd.f32 1.0, %v10299_v29 }
 0x700   : > { %v10303_v47 = vpop.eup %10302  ;;  %7409 = vst [vmem:[%s12000_s17 + $0x70] sm:$0xff] %v10301_v56  ;;  %10312 = vrcp.f32 %v7354_v62 }
 0x701   : > { %v10305_v39 = vpop.eup %10304  ;;  %7407 = vst [vmem:[%s12000_s17 + $0x60] sm:$0xff] %v10303_v47  ;;  %10314 = vrcp.f32 %v7352_v60 }
 0x702   : > { %v10307_v36 = vpop.eup %10306  ;;  %7410 = vst [vmem:[%s12000_s17 + $0x78] sm:$0xff] %v10305_v39 }
 0x703   : > { %7408 = vst [vmem:[%s12000_s17 + $0x68] sm:$0xff] %v10307_v36 }
 0x708   : > { %v10309_v63 = vpop.eup %10308 }
 0x709   : > { %v10311_v1 = vpop.eup %10310  ;;  %7413 = vst [vmem:[%s12000_s17 + $0x90] sm:$0xff] %v10309_v63 }
 0x70a   : > { %v10313_v22 = vpop.eup %10312  ;;  %7411 = vst [vmem:[%s12000_s17 + $0x80] sm:$0xff] %v10311_v1 }
 0x70b   : > { %v10315_v57 = vpop.eup %10314  ;;  %7414 = vst [vmem:[%s12000_s17 + $0x98] sm:$0x3] %v10313_v22 }
 0x70c   : > { %7412 = vst [vmem:[%s12000_s17 + $0x88] sm:$0xff] %v10315_v57 }
 0x70d PF: > { %s18_s27 = sadd.s32 1, %s10322_s27  }
 0x70e   : > { %p15_p4 = scmp.ge.s32.totalorder %s18_s27, 4  }
 0x710   :  { %17 = sbr.rel (!%p15_p4) target bundleno = 1 (0x1), region = 106 }

</bundles_post_ra>
